<compile_context>
chip_gen: v5e
topology: v5e:2x2
jax: 0.10.0
libtpu: 0.0.40
codegen_flags: <defaults>
</compile_context>

<pallas_src>
import functools
import math

import jax
import jax.numpy as jnp
from jax.experimental import pallas as pl
from jax.experimental.pallas import tpu as pltpu


def _fill_border(ref, value):
    """Write `value` into the 1-pixel spatial border of a (Hp, Wp, C) scratch.

    Only the border is touched (perf feedback): the interior is always fully
    overwritten before each use, so re-filling the whole buffer is wasted work.
    """
    Hp, Wp, Cc = ref.shape
    ref[0:1, :, :] = jnp.full((1, Wp, Cc), value, jnp.float32)
    ref[Hp - 1:Hp, :, :] = jnp.full((1, Wp, Cc), value, jnp.float32)
    ref[:, 0:1, :] = jnp.full((Hp, 1, Cc), value, jnp.float32)
    ref[:, Wp - 1:Wp, :] = jnp.full((Hp, 1, Cc), value, jnp.float32)


def _conv3x3_im2col(pad_ref, pat_ref, w_bf16, b_f32):
    """3x3 'same' convolution as a single MXU matmul (im2col).

    pad_ref : (H+2, W+2, Cin) f32 VMEM, zero border, interior = conv input.
    pat_ref : (H*W, 9*Cin)    f32 VMEM im2col buffer.
    w_bf16  : (9*Cin, Cout)   bf16 weights, rows ordered (ky, kx, cin).
    b_f32   : (Cout,)         f32 bias.
    Returns (H*W, Cout) f32.
    """
    Hp, Wp, Cin = pad_ref.shape
    H, W = Hp - 2, Wp - 2
    for ky in range(3):
        for kx in range(3):
            k = ky * 3 + kx
            pat_ref[:, k * Cin:(k + 1) * Cin] = (
                pad_ref[ky:ky + H, kx:kx + W, :].reshape(H * W, Cin))
    # bf16 MXU operands, f32 accumulation.
    return jnp.dot(pat_ref[...].astype(jnp.bfloat16), w_bf16,
                   preferred_element_type=jnp.float32) + b_f32


def _down_stack_kernel(x_ref, wf_ref, bf_ref, wb_ref, bb_ref, o_ref,
                       pad_in, pat_in, pad_blk, pat_blk, pad_pool,
                       *, nblock, pool):
    """One grid step = the whole CnnDownStack forward for one image.

    x_ref : (1, H, W, Cin)       f32  NHWC input image
    wf_ref: (9*Cin, C)           bf16 firstconv weight (im2col layout)
    bf_ref: (1, C)               f32  firstconv bias
    wb_ref: (2*nblock, 9*C, C)   bf16 block weights [b0.conv0, b0.conv1, b1.conv0, ...]
    bb_ref: (2*nblock, C)        f32  block biases
    o_ref : (1, H2, W2, C)       f32  output
    pad_* / pat_* / pad_pool     VMEM scratch (padded images + im2col buffers)
    """
    H, W, Cin = x_ref.shape[1], x_ref.shape[2], x_ref.shape[3]
    H2, W2, C = o_ref.shape[1], o_ref.shape[2], o_ref.shape[3]

    # (Re)initialise only the padding borders; interiors are always overwritten.
    # Not gated on program_id == 0, so it stays correct when the "parallel"
    # batch axis is split across v7x's two TensorCores (per-core scratch).
    _fill_border(pad_in, 0.0)
    _fill_border(pad_blk, 0.0)

    # ---------------- firstconv: 3x3 same conv, Cin -> C (no relu before) ----
    pad_in[1:H + 1, 1:W + 1, :] = x_ref[0]
    h = _conv3x3_im2col(pad_in, pat_in, wf_ref[...], bf_ref[0])     # (H*W, C) f32

    # ---------------- max_pool2d(kernel=3, stride=2, padding=1) --------------
    if pool:
        _fill_border(pad_pool, -jnp.inf)
        pad_pool[1:H + 1, 1:W + 1, :] = h.reshape(H, W, C)
        cur = None
        for dy in range(3):
            for dx in range(3):
                win = pad_pool[pl.ds(dy, H2, 2), pl.ds(dx, W2, 2), :]
                cur = win if cur is None else jnp.maximum(cur, win)   # (H2, W2, C)
    else:
        cur = h.reshape(H, W, C)

    # ---------------- nblock residual basic blocks ---------------------------
    for blk in range(nblock):
        pad_blk[1:H2 + 1, 1:W2 + 1, :] = jnp.maximum(cur, 0.0)              # relu
        h0 = _conv3x3_im2col(pad_blk, pat_blk, wb_ref[2 * blk], bb_ref[2 * blk])
        pad_blk[1:H2 + 1, 1:W2 + 1, :] = jnp.maximum(h0, 0.0).reshape(H2, W2, C)
        h1 = _conv3x3_im2col(pad_blk, pat_blk, wb_ref[2 * blk + 1],
                             bb_ref[2 * blk + 1])
        cur = cur + h1.reshape(H2, W2, C)                                    # skip

    o_ref[0] = cur


def cnn_down_stack(x_nchw, first_w, first_b, block_params, *, pool=True):
    """Fused CnnDownStack forward.

    x_nchw       : (B, Cin, H, W) f32 (PyTorch layout)
    first_w/b    : (C, Cin, 3, 3) / (C,)   firstconv params (PyTorch layout)
    block_params : list of (w0, b0, w1, b1) per CnnBasicBlock, (C, C, 3, 3)/(C,)
    Returns (B, C, H2, W2) f32, H2 = (H+1)//2 if pool else H.
    """
    B, Cin, H, W = x_nchw.shape
    C = first_w.shape[0]
    nblock = len(block_params)
    assert nblock >= 1
    if pool:
        assert H % 2 == 0 and W % 2 == 0, "even H/W required with pool=True"
        H2, W2 = H // 2, W // 2
    else:
        H2, W2 = H, W

    # NCHW -> NHWC (channels on the lane axis); kept only for interface fidelity.
    x_nhwc = jnp.transpose(x_nchw, (0, 2, 3, 1)).astype(jnp.float32)

    def pack_w(w):  # (Cout, Cin, 3, 3) -> (9*Cin, Cout) bf16, rows = (ky, kx, cin)
        co, ci = w.shape[0], w.shape[1]
        return jnp.transpose(w, (2, 3, 1, 0)).reshape(9 * ci, co).astype(jnp.bfloat16)

    wf = pack_w(first_w)                                        # (9*Cin, C) bf16
    bf = first_b.reshape(1, C).astype(jnp.float32)
    wb = jnp.stack([pack_w(w) for p in block_params for w in (p[0], p[2])])
    bb = jnp.stack([b.astype(jnp.float32) for p in block_params for b in (p[1], p[3])])

    kernel = functools.partial(_down_stack_kernel, nblock=nblock, pool=pool)

    out_nhwc = pl.pallas_call(
        kernel,
        out_shape=jax.ShapeDtypeStruct((B, H2, W2, C), jnp.float32),
        grid_spec=pltpu.PrefetchScalarGridSpec(
            num_scalar_prefetch=0,
            grid=(B,),                     # one image per step; "parallel" so both
                                           # v7x TensorCores split the batch.
            in_specs=[
                pl.BlockSpec((1, H, W, Cin), lambda b: (b, 0, 0, 0)),
                pl.BlockSpec((9 * Cin, C), lambda b: (0, 0)),
                pl.BlockSpec((1, C), lambda b: (0, 0)),
                pl.BlockSpec((2 * nblock, 9 * C, C), lambda b: (0, 0, 0)),
                pl.BlockSpec((2 * nblock, C), lambda b: (0, 0)),
            ],
            out_specs=pl.BlockSpec((1, H2, W2, C), lambda b: (b, 0, 0, 0)),
            scratch_shapes=[
                pltpu.VMEM((H + 2, W + 2, Cin), jnp.float32),    # padded input
                pltpu.VMEM((H * W, 9 * Cin), jnp.float32),       # im2col (firstconv)
                pltpu.VMEM((H2 + 2, W2 + 2, C), jnp.float32),    # padded block acts
                pltpu.VMEM((H2 * W2, 9 * C), jnp.float32),       # im2col (blocks)
                pltpu.VMEM((H + 2, W + 2, C), jnp.float32),      # -inf-padded pool in
            ],
        ),
        compiler_params=pltpu.CompilerParams(
            dimension_semantics=("parallel",)),
    )(x_nhwc, wf, bf, wb, bb)

    return jnp.transpose(out_nhwc, (0, 3, 1, 2))  # back to NCHW


def make_normed_conv_weight(key, cin, cout, scale):
    """Synthetic weights matching NormedConv2d init: per-output-filter L2 norm
    == scale, bias zeroed."""
    w = jax.random.normal(key, (cout, cin, 3, 3), dtype=jnp.float32)
    norm = jnp.sqrt(jnp.sum(w * w, axis=(1, 2, 3), keepdims=True))
    w = w * (scale / norm)
    b = jnp.zeros((cout,), jnp.float32)
    return w, b


def _reference(x, first_w, first_b, block_params, pool=True):
    """Pure-JAX (XLA) reference with the same bf16-operand / f32-accumulate
    matmul precision as the kernel."""
    dn = ("NCHW", "OIHW", "NCHW")

    def conv(h, w, b):
        out = jax.lax.conv_general_dilated(
            h.astype(jnp.bfloat16), w.astype(jnp.bfloat16),
            window_strides=(1, 1), padding=((1, 1), (1, 1)),
            dimension_numbers=dn, preferred_element_type=jnp.float32)
        return out + b.reshape(1, -1, 1, 1)

    h = conv(x, first_w, first_b)
    if pool:
        h = jax.lax.reduce_window(
            h, jnp.array(-jnp.inf, dtype=h.dtype), jax.lax.max,
            (1, 1, 3, 3), (1, 1, 2, 2),
            ((0, 0), (0, 0), (1, 1), (1, 1)))
    for (w0, b0, w1, b1) in block_params:
        r = jax.nn.relu(h)
        r = conv(r, w0, b0)
        r = jax.nn.relu(r)
        r = conv(r, w1, b1)
        h = h + r
    return h


if __name__ == "__main__":
    B, Cin, H, W = 2, 4, 16, 16
    C, nblock, scale = 16, 2, 1.0

    key = jax.random.PRNGKey(0)
    keys = jax.random.split(key, 2 + 2 * nblock)
    kx, kf, kb = keys[0], keys[1], keys[2:]

    x = jax.random.normal(kx, (B, Cin, H, W), dtype=jnp.float32)

    # firstconv: NormedConv2d default scale=1.0;
    # block convs: per-filter norm = sqrt(scale / sqrt(nblock)) (per the module).
    first_w, first_b = make_normed_conv_weight(kf, Cin, C, 1.0)
    s_block = math.sqrt(scale / math.sqrt(nblock))
    block_params = []
    for i in range(nblock):
        w0, b0 = make_normed_conv_weight(kb[2 * i], C, C, s_block)
        w1, b1 = make_normed_conv_weight(kb[2 * i + 1], C, C, s_block)
        block_params.append((w0, b0, w1, b1))

    fwd = jax.jit(functools.partial(cnn_down_stack, pool=True))
    out = jax.block_until_ready(fwd(x, first_w, first_b, block_params))

    ref = jax.block_until_ready(
        _reference(x, first_w, first_b, block_params, pool=True))

    assert out.shape == (B, C, (H + 1) // 2, (W + 1) // 2), out.shape
    err = float(jnp.max(jnp.abs(out - ref)))
    assert err < 3e-3, f"max abs err {err}"

    print("KERNEL_OK")
</pallas_src>

<mosaic_0001>
module attributes {stable_mosaic.version = 11 : i64} {
  func.func @_down_stack_kernel(%arg0: i32, %arg1: memref<1x16x16x4xf32, #tpu.memory_space<vmem>>, %arg2: memref<36x16xbf16, #tpu.memory_space<vmem>>, %arg3: memref<1x16xf32, #tpu.memory_space<vmem>>, %arg4: memref<4x144x16xbf16, #tpu.memory_space<vmem>>, %arg5: memref<4x16xf32, #tpu.memory_space<vmem>>, %arg6: memref<1x8x8x16xf32, #tpu.memory_space<vmem>>, %arg7: memref<18x18x4xf32, #tpu.memory_space<vmem>>, %arg8: memref<256x36xf32, #tpu.memory_space<vmem>>, %arg9: memref<10x10x16xf32, #tpu.memory_space<vmem>>, %arg10: memref<64x144xf32, #tpu.memory_space<vmem>>, %arg11: memref<18x18x16xf32, #tpu.memory_space<vmem>>) attributes {dimension_semantics = [#tpu.dimension_semantics<parallel>], iteration_bounds = array<i64: 2>, scalar_prefetch = 0 : i64, scratch_operands = 5 : i64, tpu.core_type = #tpu.core_type<tc>, window_params = [{transform_indices = @transform_0, window_bounds = array<i64: 1, 16, 16, 4>}, {pipeline_mode = #tpu.pipeline_mode<synchronous>, transform_indices = @transform_1, window_bounds = array<i64: 36, 16>}, {pipeline_mode = #tpu.pipeline_mode<synchronous>, transform_indices = @transform_2, window_bounds = array<i64: 1, 16>}, {pipeline_mode = #tpu.pipeline_mode<synchronous>, transform_indices = @transform_3, window_bounds = array<i64: 4, 144, 16>}, {pipeline_mode = #tpu.pipeline_mode<synchronous>, transform_indices = @transform_4, window_bounds = array<i64: 4, 16>}, {transform_indices = @transform_5, window_bounds = array<i64: 1, 8, 8, 16>}]} {
    %cst = arith.constant 0.000000e+00 : f32
    %0 = vector.broadcast %cst : f32 to vector<1x18x4xf32>
    %c0 = arith.constant 0 : index
    %c0_0 = arith.constant 0 : index
    %c0_1 = arith.constant 0 : index
    %1 = vector.load %arg7[%c0, %c0_0, %c0_1] : memref<18x18x4xf32, #tpu.memory_space<vmem>>, vector<1x18x4xf32>
    tpu.vector_store %arg7[%c0, %c0_0, %c0_1], %0 {strides = array<i32>} : memref<18x18x4xf32, #tpu.memory_space<vmem>>, vector<1x18x4xf32>,
    %cst_2 = arith.constant 0.000000e+00 : f32
    %2 = vector.broadcast %cst_2 : f32 to vector<1x18x4xf32>
    %c17 = arith.constant 17 : index
    %c0_3 = arith.constant 0 : index
    %c0_4 = arith.constant 0 : index
    %3 = vector.load %arg7[%c17, %c0_3, %c0_4] : memref<18x18x4xf32, #tpu.memory_space<vmem>>, vector<1x18x4xf32>
    tpu.vector_store %arg7[%c17, %c0_3, %c0_4], %2 {strides = array<i32>} : memref<18x18x4xf32, #tpu.memory_space<vmem>>, vector<1x18x4xf32>,
    %cst_5 = arith.constant 0.000000e+00 : f32
    %4 = vector.broadcast %cst_5 : f32 to vector<18x1x4xf32>
    %c0_6 = arith.constant 0 : index
    %c0_7 = arith.constant 0 : index
    %c0_8 = arith.constant 0 : index
    %5 = vector.load %arg7[%c0_6, %c0_7, %c0_8] : memref<18x18x4xf32, #tpu.memory_space<vmem>>, vector<18x1x4xf32>
    tpu.vector_store %arg7[%c0_6, %c0_7, %c0_8], %4 {strides = array<i32>} : memref<18x18x4xf32, #tpu.memory_space<vmem>>, vector<18x1x4xf32>,
    %cst_9 = arith.constant 0.000000e+00 : f32
    %6 = vector.broadcast %cst_9 : f32 to vector<18x1x4xf32>
    %c0_10 = arith.constant 0 : index
    %c17_11 = arith.constant 17 : index
    %c0_12 = arith.constant 0 : index
    %7 = vector.load %arg7[%c0_10, %c17_11, %c0_12] : memref<18x18x4xf32, #tpu.memory_space<vmem>>, vector<18x1x4xf32>
    tpu.vector_store %arg7[%c0_10, %c17_11, %c0_12], %6 {strides = array<i32>} : memref<18x18x4xf32, #tpu.memory_space<vmem>>, vector<18x1x4xf32>,
    %cst_13 = arith.constant 0.000000e+00 : f32
    %8 = vector.broadcast %cst_13 : f32 to vector<1x10x16xf32>
    %c0_14 = arith.constant 0 : index
    %c0_15 = arith.constant 0 : index
    %c0_16 = arith.constant 0 : index
    %9 = vector.load %arg9[%c0_14, %c0_15, %c0_16] : memref<10x10x16xf32, #tpu.memory_space<vmem>>, vector<1x10x16xf32>
    tpu.vector_store %arg9[%c0_14, %c0_15, %c0_16], %8 {strides = array<i32>} : memref<10x10x16xf32, #tpu.memory_space<vmem>>, vector<1x10x16xf32>,
    %cst_17 = arith.constant 0.000000e+00 : f32
    %10 = vector.broadcast %cst_17 : f32 to vector<1x10x16xf32>
    %c9 = arith.constant 9 : index
    %c0_18 = arith.constant 0 : index
    %c0_19 = arith.constant 0 : index
    %11 = vector.load %arg9[%c9, %c0_18, %c0_19] : memref<10x10x16xf32, #tpu.memory_space<vmem>>, vector<1x10x16xf32>
    tpu.vector_store %arg9[%c9, %c0_18, %c0_19], %10 {strides = array<i32>} : memref<10x10x16xf32, #tpu.memory_space<vmem>>, vector<1x10x16xf32>,
    %cst_20 = arith.constant 0.000000e+00 : f32
    %12 = vector.broadcast %cst_20 : f32 to vector<10x1x16xf32>
    %c0_21 = arith.constant 0 : index
    %c0_22 = arith.constant 0 : index
    %c0_23 = arith.constant 0 : index
    %13 = vector.load %arg9[%c0_21, %c0_22, %c0_23] : memref<10x10x16xf32, #tpu.memory_space<vmem>>, vector<10x1x16xf32>
    tpu.vector_store %arg9[%c0_21, %c0_22, %c0_23], %12 {strides = array<i32>} : memref<10x10x16xf32, #tpu.memory_space<vmem>>, vector<10x1x16xf32>,
    %cst_24 = arith.constant 0.000000e+00 : f32
    %14 = vector.broadcast %cst_24 : f32 to vector<10x1x16xf32>
    %c0_25 = arith.constant 0 : index
    %c9_26 = arith.constant 9 : index
    %c0_27 = arith.constant 0 : index
    %15 = vector.load %arg9[%c0_25, %c9_26, %c0_27] : memref<10x10x16xf32, #tpu.memory_space<vmem>>, vector<10x1x16xf32>
    tpu.vector_store %arg9[%c0_25, %c9_26, %c0_27], %14 {strides = array<i32>} : memref<10x10x16xf32, #tpu.memory_space<vmem>>, vector<10x1x16xf32>,
    %c0_28 = arith.constant 0 : index
    %c0_29 = arith.constant 0 : index
    %c0_30 = arith.constant 0 : index
    %c0_31 = arith.constant 0 : index
    %16 = vector.load %arg1[%c0_28, %c0_29, %c0_30, %c0_31] : memref<1x16x16x4xf32, #tpu.memory_space<vmem>>, vector<1x16x16x4xf32>
    %17 = vector.shape_cast %16 : vector<1x16x16x4xf32> to vector<16x16x4xf32>
    %c1 = arith.constant 1 : index
    %c1_32 = arith.constant 1 : index
    %c0_33 = arith.constant 0 : index
    %18 = vector.load %arg7[%c1, %c1_32, %c0_33] : memref<18x18x4xf32, #tpu.memory_space<vmem>>, vector<16x16x4xf32>
    tpu.vector_store %arg7[%c1, %c1_32, %c0_33], %17 {strides = array<i32>} : memref<18x18x4xf32, #tpu.memory_space<vmem>>, vector<16x16x4xf32>,
    %c0_34 = arith.constant 0 : index
    %c0_35 = arith.constant 0 : index
    %19 = vector.load %arg2[%c0_34, %c0_35] : memref<36x16xbf16, #tpu.memory_space<vmem>>, vector<36x16xbf16>
    %c0_36 = arith.constant 0 : index
    %c0_37 = arith.constant 0 : index
    %20 = vector.load %arg3[%c0_36, %c0_37] : memref<1x16xf32, #tpu.memory_space<vmem>>, vector<1x16xf32>
    %21 = vector.shape_cast %20 : vector<1x16xf32> to vector<16xf32>
    %c0_38 = arith.constant 0 : index
    %c0_39 = arith.constant 0 : index
    %c0_40 = arith.constant 0 : index
    %22 = vector.load %arg7[%c0_38, %c0_39, %c0_40] : memref<18x18x4xf32, #tpu.memory_space<vmem>>, vector<16x16x4xf32>
    %23 = vector.shape_cast %22 : vector<16x16x4xf32> to vector<256x4xf32>
    %c0_41 = arith.constant 0 : index
    %c0_42 = arith.constant 0 : index
    %24 = vector.load %arg8[%c0_41, %c0_42] : memref<256x36xf32, #tpu.memory_space<vmem>>, vector<256x4xf32>
    tpu.vector_store %arg8[%c0_41, %c0_42], %23 {strides = array<i32>} : memref<256x36xf32, #tpu.memory_space<vmem>>, vector<256x4xf32>,
    %c0_43 = arith.constant 0 : index
    %c1_44 = arith.constant 1 : index
    %c0_45 = arith.constant 0 : index
    %25 = vector.load %arg7[%c0_43, %c1_44, %c0_45] : memref<18x18x4xf32, #tpu.memory_space<vmem>>, vector<16x16x4xf32>
    %26 = vector.shape_cast %25 : vector<16x16x4xf32> to vector<256x4xf32>
    %c0_46 = arith.constant 0 : index
    %c4 = arith.constant 4 : index
    %27 = vector.load %arg8[%c0_46, %c4] : memref<256x36xf32, #tpu.memory_space<vmem>>, vector<256x4xf32>
    tpu.vector_store %arg8[%c0_46, %c4], %26 {strides = array<i32>} : memref<256x36xf32, #tpu.memory_space<vmem>>, vector<256x4xf32>,
    %c0_47 = arith.constant 0 : index
    %c2 = arith.constant 2 : index
    %c0_48 = arith.constant 0 : index
    %28 = vector.load %arg7[%c0_47, %c2, %c0_48] : memref<18x18x4xf32, #tpu.memory_space<vmem>>, vector<16x16x4xf32>
    %29 = vector.shape_cast %28 : vector<16x16x4xf32> to vector<256x4xf32>
    %c0_49 = arith.constant 0 : index
    %c8 = arith.constant 8 : index
    %30 = vector.load %arg8[%c0_49, %c8] : memref<256x36xf32, #tpu.memory_space<vmem>>, vector<256x4xf32>
    tpu.vector_store %arg8[%c0_49, %c8], %29 {strides = array<i32>} : memref<256x36xf32, #tpu.memory_space<vmem>>, vector<256x4xf32>,
    %c1_50 = arith.constant 1 : index
    %c0_51 = arith.constant 0 : index
    %c0_52 = arith.constant 0 : index
    %31 = vector.load %arg7[%c1_50, %c0_51, %c0_52] : memref<18x18x4xf32, #tpu.memory_space<vmem>>, vector<16x16x4xf32>
    %32 = vector.shape_cast %31 : vector<16x16x4xf32> to vector<256x4xf32>
    %c0_53 = arith.constant 0 : index
    %c12 = arith.constant 12 : index
    %33 = vector.load %arg8[%c0_53, %c12] : memref<256x36xf32, #tpu.memory_space<vmem>>, vector<256x4xf32>
    tpu.vector_store %arg8[%c0_53, %c12], %32 {strides = array<i32>} : memref<256x36xf32, #tpu.memory_space<vmem>>, vector<256x4xf32>,
    %c1_54 = arith.constant 1 : index
    %c1_55 = arith.constant 1 : index
    %c0_56 = arith.constant 0 : index
    %34 = vector.load %arg7[%c1_54, %c1_55, %c0_56] : memref<18x18x4xf32, #tpu.memory_space<vmem>>, vector<16x16x4xf32>
    %35 = vector.shape_cast %34 : vector<16x16x4xf32> to vector<256x4xf32>
    %c0_57 = arith.constant 0 : index
    %c16 = arith.constant 16 : index
    %36 = vector.load %arg8[%c0_57, %c16] : memref<256x36xf32, #tpu.memory_space<vmem>>, vector<256x4xf32>
    tpu.vector_store %arg8[%c0_57, %c16], %35 {strides = array<i32>} : memref<256x36xf32, #tpu.memory_space<vmem>>, vector<256x4xf32>,
    %c1_58 = arith.constant 1 : index
    %c2_59 = arith.constant 2 : index
    %c0_60 = arith.constant 0 : index
    %37 = vector.load %arg7[%c1_58, %c2_59, %c0_60] : memref<18x18x4xf32, #tpu.memory_space<vmem>>, vector<16x16x4xf32>
    %38 = vector.shape_cast %37 : vector<16x16x4xf32> to vector<256x4xf32>
    %c0_61 = arith.constant 0 : index
    %c20 = arith.constant 20 : index
    %39 = vector.load %arg8[%c0_61, %c20] : memref<256x36xf32, #tpu.memory_space<vmem>>, vector<256x4xf32>
    tpu.vector_store %arg8[%c0_61, %c20], %38 {strides = array<i32>} : memref<256x36xf32, #tpu.memory_space<vmem>>, vector<256x4xf32>,
    %c2_62 = arith.constant 2 : index
    %c0_63 = arith.constant 0 : index
    %c0_64 = arith.constant 0 : index
    %40 = vector.load %arg7[%c2_62, %c0_63, %c0_64] : memref<18x18x4xf32, #tpu.memory_space<vmem>>, vector<16x16x4xf32>
    %41 = vector.shape_cast %40 : vector<16x16x4xf32> to vector<256x4xf32>
    %c0_65 = arith.constant 0 : index
    %c24 = arith.constant 24 : index
    %42 = vector.load %arg8[%c0_65, %c24] : memref<256x36xf32, #tpu.memory_space<vmem>>, vector<256x4xf32>
    tpu.vector_store %arg8[%c0_65, %c24], %41 {strides = array<i32>} : memref<256x36xf32, #tpu.memory_space<vmem>>, vector<256x4xf32>,
    %c2_66 = arith.constant 2 : index
    %c1_67 = arith.constant 1 : index
    %c0_68 = arith.constant 0 : index
    %43 = vector.load %arg7[%c2_66, %c1_67, %c0_68] : memref<18x18x4xf32, #tpu.memory_space<vmem>>, vector<16x16x4xf32>
    %44 = vector.shape_cast %43 : vector<16x16x4xf32> to vector<256x4xf32>
    %c0_69 = arith.constant 0 : index
    %c28 = arith.constant 28 : index
    %45 = vector.load %arg8[%c0_69, %c28] : memref<256x36xf32, #tpu.memory_space<vmem>>, vector<256x4xf32>
    tpu.vector_store %arg8[%c0_69, %c28], %44 {strides = array<i32>} : memref<256x36xf32, #tpu.memory_space<vmem>>, vector<256x4xf32>,
    %c2_70 = arith.constant 2 : index
    %c2_71 = arith.constant 2 : index
    %c0_72 = arith.constant 0 : index
    %46 = vector.load %arg7[%c2_70, %c2_71, %c0_72] : memref<18x18x4xf32, #tpu.memory_space<vmem>>, vector<16x16x4xf32>
    %47 = vector.shape_cast %46 : vector<16x16x4xf32> to vector<256x4xf32>
    %c0_73 = arith.constant 0 : index
    %c32 = arith.constant 32 : index
    %48 = vector.load %arg8[%c0_73, %c32] : memref<256x36xf32, #tpu.memory_space<vmem>>, vector<256x4xf32>
    tpu.vector_store %arg8[%c0_73, %c32], %47 {strides = array<i32>} : memref<256x36xf32, #tpu.memory_space<vmem>>, vector<256x4xf32>,
    %c0_74 = arith.constant 0 : index
    %c0_75 = arith.constant 0 : index
    %49 = vector.load %arg8[%c0_74, %c0_75] : memref<256x36xf32, #tpu.memory_space<vmem>>, vector<256x36xf32>
    %50 = arith.truncf %49 : vector<256x36xf32> to vector<256x36xbf16>
    %cst_76 = arith.constant dense<0.000000e+00> : vector<256x16xf32>
    %51 = tpu.matmul %50, %19, %cst_76 {dimension_numbers = #tpu.dot_dimension_numbers<[1], [0], [0], [1], [0, 0, 1, 1], [], []>} : vector<256x36xbf16>, vector<36x16xbf16>, vector<256x16xf32> -> vector<256x16xf32>
    %52 = vector.shape_cast %21 : vector<16xf32> to vector<1x16xf32>
    %53 = vector.broadcast %52 : vector<1x16xf32> to vector<256x16xf32>
    %54 = arith.addf %51, %53 : vector<256x16xf32>
    %cst_77 = arith.constant 0xFF800000 : f32
    %55 = vector.broadcast %cst_77 : f32 to vector<1x18x16xf32>
    %c0_78 = arith.constant 0 : index
    %c0_79 = arith.constant 0 : index
    %c0_80 = arith.constant 0 : index
    %56 = vector.load %arg11[%c0_78, %c0_79, %c0_80] : memref<18x18x16xf32, #tpu.memory_space<vmem>>, vector<1x18x16xf32>
    tpu.vector_store %arg11[%c0_78, %c0_79, %c0_80], %55 {strides = array<i32>} : memref<18x18x16xf32, #tpu.memory_space<vmem>>, vector<1x18x16xf32>,
    %cst_81 = arith.constant 0xFF800000 : f32
    %57 = vector.broadcast %cst_81 : f32 to vector<1x18x16xf32>
    %c17_82 = arith.constant 17 : index
    %c0_83 = arith.constant 0 : index
    %c0_84 = arith.constant 0 : index
    %58 = vector.load %arg11[%c17_82, %c0_83, %c0_84] : memref<18x18x16xf32, #tpu.memory_space<vmem>>, vector<1x18x16xf32>
    tpu.vector_store %arg11[%c17_82, %c0_83, %c0_84], %57 {strides = array<i32>} : memref<18x18x16xf32, #tpu.memory_space<vmem>>, vector<1x18x16xf32>,
    %cst_85 = arith.constant 0xFF800000 : f32
    %59 = vector.broadcast %cst_85 : f32 to vector<18x1x16xf32>
    %c0_86 = arith.constant 0 : index
    %c0_87 = arith.constant 0 : index
    %c0_88 = arith.constant 0 : index
    %60 = vector.load %arg11[%c0_86, %c0_87, %c0_88] : memref<18x18x16xf32, #tpu.memory_space<vmem>>, vector<18x1x16xf32>
    tpu.vector_store %arg11[%c0_86, %c0_87, %c0_88], %59 {strides = array<i32>} : memref<18x18x16xf32, #tpu.memory_space<vmem>>, vector<18x1x16xf32>,
    %cst_89 = arith.constant 0xFF800000 : f32
    %61 = vector.broadcast %cst_89 : f32 to vector<18x1x16xf32>
    %c0_90 = arith.constant 0 : index
    %c17_91 = arith.constant 17 : index
    %c0_92 = arith.constant 0 : index
    %62 = vector.load %arg11[%c0_90, %c17_91, %c0_92] : memref<18x18x16xf32, #tpu.memory_space<vmem>>, vector<18x1x16xf32>
    tpu.vector_store %arg11[%c0_90, %c17_91, %c0_92], %61 {strides = array<i32>} : memref<18x18x16xf32, #tpu.memory_space<vmem>>, vector<18x1x16xf32>,
    %63 = vector.shape_cast %54 : vector<256x16xf32> to vector<16x16x16xf32>
    %c1_93 = arith.constant 1 : index
    %c1_94 = arith.constant 1 : index
    %c0_95 = arith.constant 0 : index
    %64 = vector.load %arg11[%c1_93, %c1_94, %c0_95] : memref<18x18x16xf32, #tpu.memory_space<vmem>>, vector<16x16x16xf32>
    tpu.vector_store %arg11[%c1_93, %c1_94, %c0_95], %63 {strides = array<i32>} : memref<18x18x16xf32, #tpu.memory_space<vmem>>, vector<16x16x16xf32>,
    %c0_96 = arith.constant 0 : index
    %c0_97 = arith.constant 0 : index
    %c0_98 = arith.constant 0 : index
    %65 = tpu.strided_load %arg11[%c0_96, %c0_97, %c0_98] {strides = array<i32: 2, 2, 1>} : memref<18x18x16xf32, #tpu.memory_space<vmem>>, vector<8x8x16xf32>
    %c0_99 = arith.constant 0 : index
    %c1_100 = arith.constant 1 : index
    %c0_101 = arith.constant 0 : index
    %66 = tpu.strided_load %arg11[%c0_99, %c1_100, %c0_101] {strides = array<i32: 2, 2, 1>} : memref<18x18x16xf32, #tpu.memory_space<vmem>>, vector<8x8x16xf32>
    %67 = arith.maximumf %65, %66 : vector<8x8x16xf32>
    %c0_102 = arith.constant 0 : index
    %c2_103 = arith.constant 2 : index
    %c0_104 = arith.constant 0 : index
    %68 = tpu.strided_load %arg11[%c0_102, %c2_103, %c0_104] {strides = array<i32: 2, 2, 1>} : memref<18x18x16xf32, #tpu.memory_space<vmem>>, vector<8x8x16xf32>
    %69 = arith.maximumf %67, %68 : vector<8x8x16xf32>
    %c1_105 = arith.constant 1 : index
    %c0_106 = arith.constant 0 : index
    %c0_107 = arith.constant 0 : index
    %70 = tpu.strided_load %arg11[%c1_105, %c0_106, %c0_107] {strides = array<i32: 2, 2, 1>} : memref<18x18x16xf32, #tpu.memory_space<vmem>>, vector<8x8x16xf32>
    %71 = arith.maximumf %69, %70 : vector<8x8x16xf32>
    %c1_108 = arith.constant 1 : index
    %c1_109 = arith.constant 1 : index
    %c0_110 = arith.constant 0 : index
    %72 = tpu.strided_load %arg11[%c1_108, %c1_109, %c0_110] {strides = array<i32: 2, 2, 1>} : memref<18x18x16xf32, #tpu.memory_space<vmem>>, vector<8x8x16xf32>
    %73 = arith.maximumf %71, %72 : vector<8x8x16xf32>
    %c1_111 = arith.constant 1 : index
    %c2_112 = arith.constant 2 : index
    %c0_113 = arith.constant 0 : index
    %74 = tpu.strided_load %arg11[%c1_111, %c2_112, %c0_113] {strides = array<i32: 2, 2, 1>} : memref<18x18x16xf32, #tpu.memory_space<vmem>>, vector<8x8x16xf32>
    %75 = arith.maximumf %73, %74 : vector<8x8x16xf32>
    %c2_114 = arith.constant 2 : index
    %c0_115 = arith.constant 0 : index
    %c0_116 = arith.constant 0 : index
    %76 = tpu.strided_load %arg11[%c2_114, %c0_115, %c0_116] {strides = array<i32: 2, 2, 1>} : memref<18x18x16xf32, #tpu.memory_space<vmem>>, vector<8x8x16xf32>
    %77 = arith.maximumf %75, %76 : vector<8x8x16xf32>
    %c2_117 = arith.constant 2 : index
    %c1_118 = arith.constant 1 : index
    %c0_119 = arith.constant 0 : index
    %78 = tpu.strided_load %arg11[%c2_117, %c1_118, %c0_119] {strides = array<i32: 2, 2, 1>} : memref<18x18x16xf32, #tpu.memory_space<vmem>>, vector<8x8x16xf32>
    %79 = arith.maximumf %77, %78 : vector<8x8x16xf32>
    %c2_120 = arith.constant 2 : index
    %c2_121 = arith.constant 2 : index
    %c0_122 = arith.constant 0 : index
    %80 = tpu.strided_load %arg11[%c2_120, %c2_121, %c0_122] {strides = array<i32: 2, 2, 1>} : memref<18x18x16xf32, #tpu.memory_space<vmem>>, vector<8x8x16xf32>
    %81 = arith.maximumf %79, %80 : vector<8x8x16xf32>
    %cst_123 = arith.constant 0.000000e+00 : f32
    %82 = vector.broadcast %cst_123 : f32 to vector<8x8x16xf32>
    %83 = arith.maximumf %81, %82 : vector<8x8x16xf32>
    %c1_124 = arith.constant 1 : index
    %c1_125 = arith.constant 1 : index
    %c0_126 = arith.constant 0 : index
    %84 = vector.load %arg9[%c1_124, %c1_125, %c0_126] : memref<10x10x16xf32, #tpu.memory_space<vmem>>, vector<8x8x16xf32>
    tpu.vector_store %arg9[%c1_124, %c1_125, %c0_126], %83 {strides = array<i32>} : memref<10x10x16xf32, #tpu.memory_space<vmem>>, vector<8x8x16xf32>,
    %c0_127 = arith.constant 0 : index
    %c0_128 = arith.constant 0 : index
    %c0_129 = arith.constant 0 : index
    %85 = vector.load %arg4[%c0_127, %c0_128, %c0_129] : memref<4x144x16xbf16, #tpu.memory_space<vmem>>, vector<1x144x16xbf16>
    %86 = vector.shape_cast %85 : vector<1x144x16xbf16> to vector<144x16xbf16>
    %c0_130 = arith.constant 0 : index
    %c0_131 = arith.constant 0 : index
    %87 = vector.load %arg5[%c0_130, %c0_131] : memref<4x16xf32, #tpu.memory_space<vmem>>, vector<1x16xf32>
    %88 = vector.shape_cast %87 : vector<1x16xf32> to vector<16xf32>
    %c0_132 = arith.constant 0 : index
    %c0_133 = arith.constant 0 : index
    %c0_134 = arith.constant 0 : index
    %89 = vector.load %arg9[%c0_132, %c0_133, %c0_134] : memref<10x10x16xf32, #tpu.memory_space<vmem>>, vector<8x8x16xf32>
    %90 = vector.shape_cast %89 : vector<8x8x16xf32> to vector<64x16xf32>
    %c0_135 = arith.constant 0 : index
    %c0_136 = arith.constant 0 : index
    %91 = vector.load %arg10[%c0_135, %c0_136] : memref<64x144xf32, #tpu.memory_space<vmem>>, vector<64x16xf32>
    tpu.vector_store %arg10[%c0_135, %c0_136], %90 {strides = array<i32>} : memref<64x144xf32, #tpu.memory_space<vmem>>, vector<64x16xf32>,
    %c0_137 = arith.constant 0 : index
    %c1_138 = arith.constant 1 : index
    %c0_139 = arith.constant 0 : index
    %92 = vector.load %arg9[%c0_137, %c1_138, %c0_139] : memref<10x10x16xf32, #tpu.memory_space<vmem>>, vector<8x8x16xf32>
    %93 = vector.shape_cast %92 : vector<8x8x16xf32> to vector<64x16xf32>
    %c0_140 = arith.constant 0 : index
    %c16_141 = arith.constant 16 : index
    %94 = vector.load %arg10[%c0_140, %c16_141] : memref<64x144xf32, #tpu.memory_space<vmem>>, vector<64x16xf32>
    tpu.vector_store %arg10[%c0_140, %c16_141], %93 {strides = array<i32>} : memref<64x144xf32, #tpu.memory_space<vmem>>, vector<64x16xf32>,
    %c0_142 = arith.constant 0 : index
    %c2_143 = arith.constant 2 : index
    %c0_144 = arith.constant 0 : index
    %95 = vector.load %arg9[%c0_142, %c2_143, %c0_144] : memref<10x10x16xf32, #tpu.memory_space<vmem>>, vector<8x8x16xf32>
    %96 = vector.shape_cast %95 : vector<8x8x16xf32> to vector<64x16xf32>
    %c0_145 = arith.constant 0 : index
    %c32_146 = arith.constant 32 : index
    %97 = vector.load %arg10[%c0_145, %c32_146] : memref<64x144xf32, #tpu.memory_space<vmem>>, vector<64x16xf32>
    tpu.vector_store %arg10[%c0_145, %c32_146], %96 {strides = array<i32>} : memref<64x144xf32, #tpu.memory_space<vmem>>, vector<64x16xf32>,
    %c1_147 = arith.constant 1 : index
    %c0_148 = arith.constant 0 : index
    %c0_149 = arith.constant 0 : index
    %98 = vector.load %arg9[%c1_147, %c0_148, %c0_149] : memref<10x10x16xf32, #tpu.memory_space<vmem>>, vector<8x8x16xf32>
    %99 = vector.shape_cast %98 : vector<8x8x16xf32> to vector<64x16xf32>
    %c0_150 = arith.constant 0 : index
    %c48 = arith.constant 48 : index
    %100 = vector.load %arg10[%c0_150, %c48] : memref<64x144xf32, #tpu.memory_space<vmem>>, vector<64x16xf32>
    tpu.vector_store %arg10[%c0_150, %c48], %99 {strides = array<i32>} : memref<64x144xf32, #tpu.memory_space<vmem>>, vector<64x16xf32>,
    %c1_151 = arith.constant 1 : index
    %c1_152 = arith.constant 1 : index
    %c0_153 = arith.constant 0 : index
    %101 = vector.load %arg9[%c1_151, %c1_152, %c0_153] : memref<10x10x16xf32, #tpu.memory_space<vmem>>, vector<8x8x16xf32>
    %102 = vector.shape_cast %101 : vector<8x8x16xf32> to vector<64x16xf32>
    %c0_154 = arith.constant 0 : index
    %c64 = arith.constant 64 : index
    %103 = vector.load %arg10[%c0_154, %c64] : memref<64x144xf32, #tpu.memory_space<vmem>>, vector<64x16xf32>
    tpu.vector_store %arg10[%c0_154, %c64], %102 {strides = array<i32>} : memref<64x144xf32, #tpu.memory_space<vmem>>, vector<64x16xf32>,
    %c1_155 = arith.constant 1 : index
    %c2_156 = arith.constant 2 : index
    %c0_157 = arith.constant 0 : index
    %104 = vector.load %arg9[%c1_155, %c2_156, %c0_157] : memref<10x10x16xf32, #tpu.memory_space<vmem>>, vector<8x8x16xf32>
    %105 = vector.shape_cast %104 : vector<8x8x16xf32> to vector<64x16xf32>
    %c0_158 = arith.constant 0 : index
    %c80 = arith.constant 80 : index
    %106 = vector.load %arg10[%c0_158, %c80] : memref<64x144xf32, #tpu.memory_space<vmem>>, vector<64x16xf32>
    tpu.vector_store %arg10[%c0_158, %c80], %105 {strides = array<i32>} : memref<64x144xf32, #tpu.memory_space<vmem>>, vector<64x16xf32>,
    %c2_159 = arith.constant 2 : index
    %c0_160 = arith.constant 0 : index
    %c0_161 = arith.constant 0 : index
    %107 = vector.load %arg9[%c2_159, %c0_160, %c0_161] : memref<10x10x16xf32, #tpu.memory_space<vmem>>, vector<8x8x16xf32>
    %108 = vector.shape_cast %107 : vector<8x8x16xf32> to vector<64x16xf32>
    %c0_162 = arith.constant 0 : index
    %c96 = arith.constant 96 : index
    %109 = vector.load %arg10[%c0_162, %c96] : memref<64x144xf32, #tpu.memory_space<vmem>>, vector<64x16xf32>
    tpu.vector_store %arg10[%c0_162, %c96], %108 {strides = array<i32>} : memref<64x144xf32, #tpu.memory_space<vmem>>, vector<64x16xf32>,
    %c2_163 = arith.constant 2 : index
    %c1_164 = arith.constant 1 : index
    %c0_165 = arith.constant 0 : index
    %110 = vector.load %arg9[%c2_163, %c1_164, %c0_165] : memref<10x10x16xf32, #tpu.memory_space<vmem>>, vector<8x8x16xf32>
    %111 = vector.shape_cast %110 : vector<8x8x16xf32> to vector<64x16xf32>
    %c0_166 = arith.constant 0 : index
    %c112 = arith.constant 112 : index
    %112 = vector.load %arg10[%c0_166, %c112] : memref<64x144xf32, #tpu.memory_space<vmem>>, vector<64x16xf32>
    tpu.vector_store %arg10[%c0_166, %c112], %111 {strides = array<i32>} : memref<64x144xf32, #tpu.memory_space<vmem>>, vector<64x16xf32>,
    %c2_167 = arith.constant 2 : index
    %c2_168 = arith.constant 2 : index
    %c0_169 = arith.constant 0 : index
    %113 = vector.load %arg9[%c2_167, %c2_168, %c0_169] : memref<10x10x16xf32, #tpu.memory_space<vmem>>, vector<8x8x16xf32>
    %114 = vector.shape_cast %113 : vector<8x8x16xf32> to vector<64x16xf32>
    %c0_170 = arith.constant 0 : index
    %c128 = arith.constant 128 : index
    %115 = vector.load %arg10[%c0_170, %c128] : memref<64x144xf32, #tpu.memory_space<vmem>>, vector<64x16xf32>
    tpu.vector_store %arg10[%c0_170, %c128], %114 {strides = array<i32>} : memref<64x144xf32, #tpu.memory_space<vmem>>, vector<64x16xf32>,
    %c0_171 = arith.constant 0 : index
    %c0_172 = arith.constant 0 : index
    %116 = vector.load %arg10[%c0_171, %c0_172] : memref<64x144xf32, #tpu.memory_space<vmem>>, vector<64x144xf32>
    %117 = arith.truncf %116 : vector<64x144xf32> to vector<64x144xbf16>
    %cst_173 = arith.constant dense<0.000000e+00> : vector<64x16xf32>
    %118 = tpu.matmul %117, %86, %cst_173 {dimension_numbers = #tpu.dot_dimension_numbers<[1], [0], [0], [1], [0, 0, 1, 1], [], []>} : vector<64x144xbf16>, vector<144x16xbf16>, vector<64x16xf32> -> vector<64x16xf32>
    %119 = vector.shape_cast %88 : vector<16xf32> to vector<1x16xf32>
    %120 = vector.broadcast %119 : vector<1x16xf32> to vector<64x16xf32>
    %121 = arith.addf %118, %120 : vector<64x16xf32>
    %cst_174 = arith.constant 0.000000e+00 : f32
    %122 = vector.broadcast %cst_174 : f32 to vector<64x16xf32>
    %123 = arith.maximumf %121, %122 : vector<64x16xf32>
    %124 = vector.shape_cast %123 : vector<64x16xf32> to vector<8x8x16xf32>
    %c1_175 = arith.constant 1 : index
    %c1_176 = arith.constant 1 : index
    %c0_177 = arith.constant 0 : index
    %125 = vector.load %arg9[%c1_175, %c1_176, %c0_177] : memref<10x10x16xf32, #tpu.memory_space<vmem>>, vector<8x8x16xf32>
    tpu.vector_store %arg9[%c1_175, %c1_176, %c0_177], %124 {strides = array<i32>} : memref<10x10x16xf32, #tpu.memory_space<vmem>>, vector<8x8x16xf32>,
    %c1_178 = arith.constant 1 : index
    %c0_179 = arith.constant 0 : index
    %c0_180 = arith.constant 0 : index
    %126 = vector.load %arg4[%c1_178, %c0_179, %c0_180] : memref<4x144x16xbf16, #tpu.memory_space<vmem>>, vector<1x144x16xbf16>
    %127 = vector.shape_cast %126 : vector<1x144x16xbf16> to vector<144x16xbf16>
    %c1_181 = arith.constant 1 : index
    %c0_182 = arith.constant 0 : index
    %128 = vector.load %arg5[%c1_181, %c0_182] : memref<4x16xf32, #tpu.memory_space<vmem>>, vector<1x16xf32>
    %129 = vector.shape_cast %128 : vector<1x16xf32> to vector<16xf32>
    %c0_183 = arith.constant 0 : index
    %c0_184 = arith.constant 0 : index
    %c0_185 = arith.constant 0 : index
    %130 = vector.load %arg9[%c0_183, %c0_184, %c0_185] : memref<10x10x16xf32, #tpu.memory_space<vmem>>, vector<8x8x16xf32>
    %131 = vector.shape_cast %130 : vector<8x8x16xf32> to vector<64x16xf32>
    %c0_186 = arith.constant 0 : index
    %c0_187 = arith.constant 0 : index
    %132 = vector.load %arg10[%c0_186, %c0_187] : memref<64x144xf32, #tpu.memory_space<vmem>>, vector<64x16xf32>
    tpu.vector_store %arg10[%c0_186, %c0_187], %131 {strides = array<i32>} : memref<64x144xf32, #tpu.memory_space<vmem>>, vector<64x16xf32>,
    %c0_188 = arith.constant 0 : index
    %c1_189 = arith.constant 1 : index
    %c0_190 = arith.constant 0 : index
    %133 = vector.load %arg9[%c0_188, %c1_189, %c0_190] : memref<10x10x16xf32, #tpu.memory_space<vmem>>, vector<8x8x16xf32>
    %134 = vector.shape_cast %133 : vector<8x8x16xf32> to vector<64x16xf32>
    %c0_191 = arith.constant 0 : index
    %c16_192 = arith.constant 16 : index
    %135 = vector.load %arg10[%c0_191, %c16_192] : memref<64x144xf32, #tpu.memory_space<vmem>>, vector<64x16xf32>
    tpu.vector_store %arg10[%c0_191, %c16_192], %134 {strides = array<i32>} : memref<64x144xf32, #tpu.memory_space<vmem>>, vector<64x16xf32>,
    %c0_193 = arith.constant 0 : index
    %c2_194 = arith.constant 2 : index
    %c0_195 = arith.constant 0 : index
    %136 = vector.load %arg9[%c0_193, %c2_194, %c0_195] : memref<10x10x16xf32, #tpu.memory_space<vmem>>, vector<8x8x16xf32>
    %137 = vector.shape_cast %136 : vector<8x8x16xf32> to vector<64x16xf32>
    %c0_196 = arith.constant 0 : index
    %c32_197 = arith.constant 32 : index
    %138 = vector.load %arg10[%c0_196, %c32_197] : memref<64x144xf32, #tpu.memory_space<vmem>>, vector<64x16xf32>
    tpu.vector_store %arg10[%c0_196, %c32_197], %137 {strides = array<i32>} : memref<64x144xf32, #tpu.memory_space<vmem>>, vector<64x16xf32>,
    %c1_198 = arith.constant 1 : index
    %c0_199 = arith.constant 0 : index
    %c0_200 = arith.constant 0 : index
    %139 = vector.load %arg9[%c1_198, %c0_199, %c0_200] : memref<10x10x16xf32, #tpu.memory_space<vmem>>, vector<8x8x16xf32>
    %140 = vector.shape_cast %139 : vector<8x8x16xf32> to vector<64x16xf32>
    %c0_201 = arith.constant 0 : index
    %c48_202 = arith.constant 48 : index
    %141 = vector.load %arg10[%c0_201, %c48_202] : memref<64x144xf32, #tpu.memory_space<vmem>>, vector<64x16xf32>
    tpu.vector_store %arg10[%c0_201, %c48_202], %140 {strides = array<i32>} : memref<64x144xf32, #tpu.memory_space<vmem>>, vector<64x16xf32>,
    %c1_203 = arith.constant 1 : index
    %c1_204 = arith.constant 1 : index
    %c0_205 = arith.constant 0 : index
    %142 = vector.load %arg9[%c1_203, %c1_204, %c0_205] : memref<10x10x16xf32, #tpu.memory_space<vmem>>, vector<8x8x16xf32>
    %143 = vector.shape_cast %142 : vector<8x8x16xf32> to vector<64x16xf32>
    %c0_206 = arith.constant 0 : index
    %c64_207 = arith.constant 64 : index
    %144 = vector.load %arg10[%c0_206, %c64_207] : memref<64x144xf32, #tpu.memory_space<vmem>>, vector<64x16xf32>
    tpu.vector_store %arg10[%c0_206, %c64_207], %143 {strides = array<i32>} : memref<64x144xf32, #tpu.memory_space<vmem>>, vector<64x16xf32>,
    %c1_208 = arith.constant 1 : index
    %c2_209 = arith.constant 2 : index
    %c0_210 = arith.constant 0 : index
    %145 = vector.load %arg9[%c1_208, %c2_209, %c0_210] : memref<10x10x16xf32, #tpu.memory_space<vmem>>, vector<8x8x16xf32>
    %146 = vector.shape_cast %145 : vector<8x8x16xf32> to vector<64x16xf32>
    %c0_211 = arith.constant 0 : index
    %c80_212 = arith.constant 80 : index
    %147 = vector.load %arg10[%c0_211, %c80_212] : memref<64x144xf32, #tpu.memory_space<vmem>>, vector<64x16xf32>
    tpu.vector_store %arg10[%c0_211, %c80_212], %146 {strides = array<i32>} : memref<64x144xf32, #tpu.memory_space<vmem>>, vector<64x16xf32>,
    %c2_213 = arith.constant 2 : index
    %c0_214 = arith.constant 0 : index
    %c0_215 = arith.constant 0 : index
    %148 = vector.load %arg9[%c2_213, %c0_214, %c0_215] : memref<10x10x16xf32, #tpu.memory_space<vmem>>, vector<8x8x16xf32>
    %149 = vector.shape_cast %148 : vector<8x8x16xf32> to vector<64x16xf32>
    %c0_216 = arith.constant 0 : index
    %c96_217 = arith.constant 96 : index
    %150 = vector.load %arg10[%c0_216, %c96_217] : memref<64x144xf32, #tpu.memory_space<vmem>>, vector<64x16xf32>
    tpu.vector_store %arg10[%c0_216, %c96_217], %149 {strides = array<i32>} : memref<64x144xf32, #tpu.memory_space<vmem>>, vector<64x16xf32>,
    %c2_218 = arith.constant 2 : index
    %c1_219 = arith.constant 1 : index
    %c0_220 = arith.constant 0 : index
    %151 = vector.load %arg9[%c2_218, %c1_219, %c0_220] : memref<10x10x16xf32, #tpu.memory_space<vmem>>, vector<8x8x16xf32>
    %152 = vector.shape_cast %151 : vector<8x8x16xf32> to vector<64x16xf32>
    %c0_221 = arith.constant 0 : index
    %c112_222 = arith.constant 112 : index
    %153 = vector.load %arg10[%c0_221, %c112_222] : memref<64x144xf32, #tpu.memory_space<vmem>>, vector<64x16xf32>
    tpu.vector_store %arg10[%c0_221, %c112_222], %152 {strides = array<i32>} : memref<64x144xf32, #tpu.memory_space<vmem>>, vector<64x16xf32>,
    %c2_223 = arith.constant 2 : index
    %c2_224 = arith.constant 2 : index
    %c0_225 = arith.constant 0 : index
    %154 = vector.load %arg9[%c2_223, %c2_224, %c0_225] : memref<10x10x16xf32, #tpu.memory_space<vmem>>, vector<8x8x16xf32>
    %155 = vector.shape_cast %154 : vector<8x8x16xf32> to vector<64x16xf32>
    %c0_226 = arith.constant 0 : index
    %c128_227 = arith.constant 128 : index
    %156 = vector.load %arg10[%c0_226, %c128_227] : memref<64x144xf32, #tpu.memory_space<vmem>>, vector<64x16xf32>
    tpu.vector_store %arg10[%c0_226, %c128_227], %155 {strides = array<i32>} : memref<64x144xf32, #tpu.memory_space<vmem>>, vector<64x16xf32>,
    %c0_228 = arith.constant 0 : index
    %c0_229 = arith.constant 0 : index
    %157 = vector.load %arg10[%c0_228, %c0_229] : memref<64x144xf32, #tpu.memory_space<vmem>>, vector<64x144xf32>
    %158 = arith.truncf %157 : vector<64x144xf32> to vector<64x144xbf16>
    %cst_230 = arith.constant dense<0.000000e+00> : vector<64x16xf32>
    %159 = tpu.matmul %158, %127, %cst_230 {dimension_numbers = #tpu.dot_dimension_numbers<[1], [0], [0], [1], [0, 0, 1, 1], [], []>} : vector<64x144xbf16>, vector<144x16xbf16>, vector<64x16xf32> -> vector<64x16xf32>
    %160 = vector.shape_cast %129 : vector<16xf32> to vector<1x16xf32>
    %161 = vector.broadcast %160 : vector<1x16xf32> to vector<64x16xf32>
    %162 = arith.addf %159, %161 : vector<64x16xf32>
    %163 = vector.shape_cast %162 : vector<64x16xf32> to vector<8x8x16xf32>
    %164 = arith.addf %81, %163 : vector<8x8x16xf32>
    %cst_231 = arith.constant 0.000000e+00 : f32
    %165 = vector.broadcast %cst_231 : f32 to vector<8x8x16xf32>
    %166 = arith.maximumf %164, %165 : vector<8x8x16xf32>
    %c1_232 = arith.constant 1 : index
    %c1_233 = arith.constant 1 : index
    %c0_234 = arith.constant 0 : index
    %167 = vector.load %arg9[%c1_232, %c1_233, %c0_234] : memref<10x10x16xf32, #tpu.memory_space<vmem>>, vector<8x8x16xf32>
    tpu.vector_store %arg9[%c1_232, %c1_233, %c0_234], %166 {strides = array<i32>} : memref<10x10x16xf32, #tpu.memory_space<vmem>>, vector<8x8x16xf32>,
    %c2_235 = arith.constant 2 : index
    %c0_236 = arith.constant 0 : index
    %c0_237 = arith.constant 0 : index
    %168 = vector.load %arg4[%c2_235, %c0_236, %c0_237] : memref<4x144x16xbf16, #tpu.memory_space<vmem>>, vector<1x144x16xbf16>
    %169 = vector.shape_cast %168 : vector<1x144x16xbf16> to vector<144x16xbf16>
    %c2_238 = arith.constant 2 : index
    %c0_239 = arith.constant 0 : index
    %170 = vector.load %arg5[%c2_238, %c0_239] : memref<4x16xf32, #tpu.memory_space<vmem>>, vector<1x16xf32>
    %171 = vector.shape_cast %170 : vector<1x16xf32> to vector<16xf32>
    %c0_240 = arith.constant 0 : index
    %c0_241 = arith.constant 0 : index
    %c0_242 = arith.constant 0 : index
    %172 = vector.load %arg9[%c0_240, %c0_241, %c0_242] : memref<10x10x16xf32, #tpu.memory_space<vmem>>, vector<8x8x16xf32>
    %173 = vector.shape_cast %172 : vector<8x8x16xf32> to vector<64x16xf32>
    %c0_243 = arith.constant 0 : index
    %c0_244 = arith.constant 0 : index
    %174 = vector.load %arg10[%c0_243, %c0_244] : memref<64x144xf32, #tpu.memory_space<vmem>>, vector<64x16xf32>
    tpu.vector_store %arg10[%c0_243, %c0_244], %173 {strides = array<i32>} : memref<64x144xf32, #tpu.memory_space<vmem>>, vector<64x16xf32>,
    %c0_245 = arith.constant 0 : index
    %c1_246 = arith.constant 1 : index
    %c0_247 = arith.constant 0 : index
    %175 = vector.load %arg9[%c0_245, %c1_246, %c0_247] : memref<10x10x16xf32, #tpu.memory_space<vmem>>, vector<8x8x16xf32>
    %176 = vector.shape_cast %175 : vector<8x8x16xf32> to vector<64x16xf32>
    %c0_248 = arith.constant 0 : index
    %c16_249 = arith.constant 16 : index
    %177 = vector.load %arg10[%c0_248, %c16_249] : memref<64x144xf32, #tpu.memory_space<vmem>>, vector<64x16xf32>
    tpu.vector_store %arg10[%c0_248, %c16_249], %176 {strides = array<i32>} : memref<64x144xf32, #tpu.memory_space<vmem>>, vector<64x16xf32>,
    %c0_250 = arith.constant 0 : index
    %c2_251 = arith.constant 2 : index
    %c0_252 = arith.constant 0 : index
    %178 = vector.load %arg9[%c0_250, %c2_251, %c0_252] : memref<10x10x16xf32, #tpu.memory_space<vmem>>, vector<8x8x16xf32>
    %179 = vector.shape_cast %178 : vector<8x8x16xf32> to vector<64x16xf32>
    %c0_253 = arith.constant 0 : index
    %c32_254 = arith.constant 32 : index
    %180 = vector.load %arg10[%c0_253, %c32_254] : memref<64x144xf32, #tpu.memory_space<vmem>>, vector<64x16xf32>
    tpu.vector_store %arg10[%c0_253, %c32_254], %179 {strides = array<i32>} : memref<64x144xf32, #tpu.memory_space<vmem>>, vector<64x16xf32>,
    %c1_255 = arith.constant 1 : index
    %c0_256 = arith.constant 0 : index
    %c0_257 = arith.constant 0 : index
    %181 = vector.load %arg9[%c1_255, %c0_256, %c0_257] : memref<10x10x16xf32, #tpu.memory_space<vmem>>, vector<8x8x16xf32>
    %182 = vector.shape_cast %181 : vector<8x8x16xf32> to vector<64x16xf32>
    %c0_258 = arith.constant 0 : index
    %c48_259 = arith.constant 48 : index
    %183 = vector.load %arg10[%c0_258, %c48_259] : memref<64x144xf32, #tpu.memory_space<vmem>>, vector<64x16xf32>
    tpu.vector_store %arg10[%c0_258, %c48_259], %182 {strides = array<i32>} : memref<64x144xf32, #tpu.memory_space<vmem>>, vector<64x16xf32>,
    %c1_260 = arith.constant 1 : index
    %c1_261 = arith.constant 1 : index
    %c0_262 = arith.constant 0 : index
    %184 = vector.load %arg9[%c1_260, %c1_261, %c0_262] : memref<10x10x16xf32, #tpu.memory_space<vmem>>, vector<8x8x16xf32>
    %185 = vector.shape_cast %184 : vector<8x8x16xf32> to vector<64x16xf32>
    %c0_263 = arith.constant 0 : index
    %c64_264 = arith.constant 64 : index
    %186 = vector.load %arg10[%c0_263, %c64_264] : memref<64x144xf32, #tpu.memory_space<vmem>>, vector<64x16xf32>
    tpu.vector_store %arg10[%c0_263, %c64_264], %185 {strides = array<i32>} : memref<64x144xf32, #tpu.memory_space<vmem>>, vector<64x16xf32>,
    %c1_265 = arith.constant 1 : index
    %c2_266 = arith.constant 2 : index
    %c0_267 = arith.constant 0 : index
    %187 = vector.load %arg9[%c1_265, %c2_266, %c0_267] : memref<10x10x16xf32, #tpu.memory_space<vmem>>, vector<8x8x16xf32>
    %188 = vector.shape_cast %187 : vector<8x8x16xf32> to vector<64x16xf32>
    %c0_268 = arith.constant 0 : index
    %c80_269 = arith.constant 80 : index
    %189 = vector.load %arg10[%c0_268, %c80_269] : memref<64x144xf32, #tpu.memory_space<vmem>>, vector<64x16xf32>
    tpu.vector_store %arg10[%c0_268, %c80_269], %188 {strides = array<i32>} : memref<64x144xf32, #tpu.memory_space<vmem>>, vector<64x16xf32>,
    %c2_270 = arith.constant 2 : index
    %c0_271 = arith.constant 0 : index
    %c0_272 = arith.constant 0 : index
    %190 = vector.load %arg9[%c2_270, %c0_271, %c0_272] : memref<10x10x16xf32, #tpu.memory_space<vmem>>, vector<8x8x16xf32>
    %191 = vector.shape_cast %190 : vector<8x8x16xf32> to vector<64x16xf32>
    %c0_273 = arith.constant 0 : index
    %c96_274 = arith.constant 96 : index
    %192 = vector.load %arg10[%c0_273, %c96_274] : memref<64x144xf32, #tpu.memory_space<vmem>>, vector<64x16xf32>
    tpu.vector_store %arg10[%c0_273, %c96_274], %191 {strides = array<i32>} : memref<64x144xf32, #tpu.memory_space<vmem>>, vector<64x16xf32>,
    %c2_275 = arith.constant 2 : index
    %c1_276 = arith.constant 1 : index
    %c0_277 = arith.constant 0 : index
    %193 = vector.load %arg9[%c2_275, %c1_276, %c0_277] : memref<10x10x16xf32, #tpu.memory_space<vmem>>, vector<8x8x16xf32>
    %194 = vector.shape_cast %193 : vector<8x8x16xf32> to vector<64x16xf32>
    %c0_278 = arith.constant 0 : index
    %c112_279 = arith.constant 112 : index
    %195 = vector.load %arg10[%c0_278, %c112_279] : memref<64x144xf32, #tpu.memory_space<vmem>>, vector<64x16xf32>
    tpu.vector_store %arg10[%c0_278, %c112_279], %194 {strides = array<i32>} : memref<64x144xf32, #tpu.memory_space<vmem>>, vector<64x16xf32>,
    %c2_280 = arith.constant 2 : index
    %c2_281 = arith.constant 2 : index
    %c0_282 = arith.constant 0 : index
    %196 = vector.load %arg9[%c2_280, %c2_281, %c0_282] : memref<10x10x16xf32, #tpu.memory_space<vmem>>, vector<8x8x16xf32>
    %197 = vector.shape_cast %196 : vector<8x8x16xf32> to vector<64x16xf32>
    %c0_283 = arith.constant 0 : index
    %c128_284 = arith.constant 128 : index
    %198 = vector.load %arg10[%c0_283, %c128_284] : memref<64x144xf32, #tpu.memory_space<vmem>>, vector<64x16xf32>
    tpu.vector_store %arg10[%c0_283, %c128_284], %197 {strides = array<i32>} : memref<64x144xf32, #tpu.memory_space<vmem>>, vector<64x16xf32>,
    %c0_285 = arith.constant 0 : index
    %c0_286 = arith.constant 0 : index
    %199 = vector.load %arg10[%c0_285, %c0_286] : memref<64x144xf32, #tpu.memory_space<vmem>>, vector<64x144xf32>
    %200 = arith.truncf %199 : vector<64x144xf32> to vector<64x144xbf16>
    %cst_287 = arith.constant dense<0.000000e+00> : vector<64x16xf32>
    %201 = tpu.matmul %200, %169, %cst_287 {dimension_numbers = #tpu.dot_dimension_numbers<[1], [0], [0], [1], [0, 0, 1, 1], [], []>} : vector<64x144xbf16>, vector<144x16xbf16>, vector<64x16xf32> -> vector<64x16xf32>
    %202 = vector.shape_cast %171 : vector<16xf32> to vector<1x16xf32>
    %203 = vector.broadcast %202 : vector<1x16xf32> to vector<64x16xf32>
    %204 = arith.addf %201, %203 : vector<64x16xf32>
    %cst_288 = arith.constant 0.000000e+00 : f32
    %205 = vector.broadcast %cst_288 : f32 to vector<64x16xf32>
    %206 = arith.maximumf %204, %205 : vector<64x16xf32>
    %207 = vector.shape_cast %206 : vector<64x16xf32> to vector<8x8x16xf32>
    %c1_289 = arith.constant 1 : index
    %c1_290 = arith.constant 1 : index
    %c0_291 = arith.constant 0 : index
    %208 = vector.load %arg9[%c1_289, %c1_290, %c0_291] : memref<10x10x16xf32, #tpu.memory_space<vmem>>, vector<8x8x16xf32>
    tpu.vector_store %arg9[%c1_289, %c1_290, %c0_291], %207 {strides = array<i32>} : memref<10x10x16xf32, #tpu.memory_space<vmem>>, vector<8x8x16xf32>,
    %c3 = arith.constant 3 : index
    %c0_292 = arith.constant 0 : index
    %c0_293 = arith.constant 0 : index
    %209 = vector.load %arg4[%c3, %c0_292, %c0_293] : memref<4x144x16xbf16, #tpu.memory_space<vmem>>, vector<1x144x16xbf16>
    %210 = vector.shape_cast %209 : vector<1x144x16xbf16> to vector<144x16xbf16>
    %c3_294 = arith.constant 3 : index
    %c0_295 = arith.constant 0 : index
    %211 = vector.load %arg5[%c3_294, %c0_295] : memref<4x16xf32, #tpu.memory_space<vmem>>, vector<1x16xf32>
    %212 = vector.shape_cast %211 : vector<1x16xf32> to vector<16xf32>
    %c0_296 = arith.constant 0 : index
    %c0_297 = arith.constant 0 : index
    %c0_298 = arith.constant 0 : index
    %213 = vector.load %arg9[%c0_296, %c0_297, %c0_298] : memref<10x10x16xf32, #tpu.memory_space<vmem>>, vector<8x8x16xf32>
    %214 = vector.shape_cast %213 : vector<8x8x16xf32> to vector<64x16xf32>
    %c0_299 = arith.constant 0 : index
    %c0_300 = arith.constant 0 : index
    %215 = vector.load %arg10[%c0_299, %c0_300] : memref<64x144xf32, #tpu.memory_space<vmem>>, vector<64x16xf32>
    tpu.vector_store %arg10[%c0_299, %c0_300], %214 {strides = array<i32>} : memref<64x144xf32, #tpu.memory_space<vmem>>, vector<64x16xf32>,
    %c0_301 = arith.constant 0 : index
    %c1_302 = arith.constant 1 : index
    %c0_303 = arith.constant 0 : index
    %216 = vector.load %arg9[%c0_301, %c1_302, %c0_303] : memref<10x10x16xf32, #tpu.memory_space<vmem>>, vector<8x8x16xf32>
    %217 = vector.shape_cast %216 : vector<8x8x16xf32> to vector<64x16xf32>
    %c0_304 = arith.constant 0 : index
    %c16_305 = arith.constant 16 : index
    %218 = vector.load %arg10[%c0_304, %c16_305] : memref<64x144xf32, #tpu.memory_space<vmem>>, vector<64x16xf32>
    tpu.vector_store %arg10[%c0_304, %c16_305], %217 {strides = array<i32>} : memref<64x144xf32, #tpu.memory_space<vmem>>, vector<64x16xf32>,
    %c0_306 = arith.constant 0 : index
    %c2_307 = arith.constant 2 : index
    %c0_308 = arith.constant 0 : index
    %219 = vector.load %arg9[%c0_306, %c2_307, %c0_308] : memref<10x10x16xf32, #tpu.memory_space<vmem>>, vector<8x8x16xf32>
    %220 = vector.shape_cast %219 : vector<8x8x16xf32> to vector<64x16xf32>
    %c0_309 = arith.constant 0 : index
    %c32_310 = arith.constant 32 : index
    %221 = vector.load %arg10[%c0_309, %c32_310] : memref<64x144xf32, #tpu.memory_space<vmem>>, vector<64x16xf32>
    tpu.vector_store %arg10[%c0_309, %c32_310], %220 {strides = array<i32>} : memref<64x144xf32, #tpu.memory_space<vmem>>, vector<64x16xf32>,
    %c1_311 = arith.constant 1 : index
    %c0_312 = arith.constant 0 : index
    %c0_313 = arith.constant 0 : index
    %222 = vector.load %arg9[%c1_311, %c0_312, %c0_313] : memref<10x10x16xf32, #tpu.memory_space<vmem>>, vector<8x8x16xf32>
    %223 = vector.shape_cast %222 : vector<8x8x16xf32> to vector<64x16xf32>
    %c0_314 = arith.constant 0 : index
    %c48_315 = arith.constant 48 : index
    %224 = vector.load %arg10[%c0_314, %c48_315] : memref<64x144xf32, #tpu.memory_space<vmem>>, vector<64x16xf32>
    tpu.vector_store %arg10[%c0_314, %c48_315], %223 {strides = array<i32>} : memref<64x144xf32, #tpu.memory_space<vmem>>, vector<64x16xf32>,
    %c1_316 = arith.constant 1 : index
    %c1_317 = arith.constant 1 : index
    %c0_318 = arith.constant 0 : index
    %225 = vector.load %arg9[%c1_316, %c1_317, %c0_318] : memref<10x10x16xf32, #tpu.memory_space<vmem>>, vector<8x8x16xf32>
    %226 = vector.shape_cast %225 : vector<8x8x16xf32> to vector<64x16xf32>
    %c0_319 = arith.constant 0 : index
    %c64_320 = arith.constant 64 : index
    %227 = vector.load %arg10[%c0_319, %c64_320] : memref<64x144xf32, #tpu.memory_space<vmem>>, vector<64x16xf32>
    tpu.vector_store %arg10[%c0_319, %c64_320], %226 {strides = array<i32>} : memref<64x144xf32, #tpu.memory_space<vmem>>, vector<64x16xf32>,
    %c1_321 = arith.constant 1 : index
    %c2_322 = arith.constant 2 : index
    %c0_323 = arith.constant 0 : index
    %228 = vector.load %arg9[%c1_321, %c2_322, %c0_323] : memref<10x10x16xf32, #tpu.memory_space<vmem>>, vector<8x8x16xf32>
    %229 = vector.shape_cast %228 : vector<8x8x16xf32> to vector<64x16xf32>
    %c0_324 = arith.constant 0 : index
    %c80_325 = arith.constant 80 : index
    %230 = vector.load %arg10[%c0_324, %c80_325] : memref<64x144xf32, #tpu.memory_space<vmem>>, vector<64x16xf32>
    tpu.vector_store %arg10[%c0_324, %c80_325], %229 {strides = array<i32>} : memref<64x144xf32, #tpu.memory_space<vmem>>, vector<64x16xf32>,
    %c2_326 = arith.constant 2 : index
    %c0_327 = arith.constant 0 : index
    %c0_328 = arith.constant 0 : index
    %231 = vector.load %arg9[%c2_326, %c0_327, %c0_328] : memref<10x10x16xf32, #tpu.memory_space<vmem>>, vector<8x8x16xf32>
    %232 = vector.shape_cast %231 : vector<8x8x16xf32> to vector<64x16xf32>
    %c0_329 = arith.constant 0 : index
    %c96_330 = arith.constant 96 : index
    %233 = vector.load %arg10[%c0_329, %c96_330] : memref<64x144xf32, #tpu.memory_space<vmem>>, vector<64x16xf32>
    tpu.vector_store %arg10[%c0_329, %c96_330], %232 {strides = array<i32>} : memref<64x144xf32, #tpu.memory_space<vmem>>, vector<64x16xf32>,
    %c2_331 = arith.constant 2 : index
    %c1_332 = arith.constant 1 : index
    %c0_333 = arith.constant 0 : index
    %234 = vector.load %arg9[%c2_331, %c1_332, %c0_333] : memref<10x10x16xf32, #tpu.memory_space<vmem>>, vector<8x8x16xf32>
    %235 = vector.shape_cast %234 : vector<8x8x16xf32> to vector<64x16xf32>
    %c0_334 = arith.constant 0 : index
    %c112_335 = arith.constant 112 : index
    %236 = vector.load %arg10[%c0_334, %c112_335] : memref<64x144xf32, #tpu.memory_space<vmem>>, vector<64x16xf32>
    tpu.vector_store %arg10[%c0_334, %c112_335], %235 {strides = array<i32>} : memref<64x144xf32, #tpu.memory_space<vmem>>, vector<64x16xf32>,
    %c2_336 = arith.constant 2 : index
    %c2_337 = arith.constant 2 : index
    %c0_338 = arith.constant 0 : index
    %237 = vector.load %arg9[%c2_336, %c2_337, %c0_338] : memref<10x10x16xf32, #tpu.memory_space<vmem>>, vector<8x8x16xf32>
    %238 = vector.shape_cast %237 : vector<8x8x16xf32> to vector<64x16xf32>
    %c0_339 = arith.constant 0 : index
    %c128_340 = arith.constant 128 : index
    %239 = vector.load %arg10[%c0_339, %c128_340] : memref<64x144xf32, #tpu.memory_space<vmem>>, vector<64x16xf32>
    tpu.vector_store %arg10[%c0_339, %c128_340], %238 {strides = array<i32>} : memref<64x144xf32, #tpu.memory_space<vmem>>, vector<64x16xf32>,
    %c0_341 = arith.constant 0 : index
    %c0_342 = arith.constant 0 : index
    %240 = vector.load %arg10[%c0_341, %c0_342] : memref<64x144xf32, #tpu.memory_space<vmem>>, vector<64x144xf32>
    %241 = arith.truncf %240 : vector<64x144xf32> to vector<64x144xbf16>
    %cst_343 = arith.constant dense<0.000000e+00> : vector<64x16xf32>
    %242 = tpu.matmul %241, %210, %cst_343 {dimension_numbers = #tpu.dot_dimension_numbers<[1], [0], [0], [1], [0, 0, 1, 1], [], []>} : vector<64x144xbf16>, vector<144x16xbf16>, vector<64x16xf32> -> vector<64x16xf32>
    %243 = vector.shape_cast %212 : vector<16xf32> to vector<1x16xf32>
    %244 = vector.broadcast %243 : vector<1x16xf32> to vector<64x16xf32>
    %245 = arith.addf %242, %244 : vector<64x16xf32>
    %246 = vector.shape_cast %245 : vector<64x16xf32> to vector<8x8x16xf32>
    %247 = arith.addf %164, %246 : vector<8x8x16xf32>
    %c0_344 = arith.constant 0 : index
    %c0_345 = arith.constant 0 : index
    %c0_346 = arith.constant 0 : index
    %c0_347 = arith.constant 0 : index
    %248 = vector.load %arg6[%c0_344, %c0_345, %c0_346, %c0_347] : memref<1x8x8x16xf32, #tpu.memory_space<vmem>>, vector<1x8x8x16xf32>
    %249 = vector.shape_cast %248 : vector<1x8x8x16xf32> to vector<8x8x16xf32>
    %250 = vector.shape_cast %247 : vector<8x8x16xf32> to vector<1x8x8x16xf32>
    tpu.vector_store %arg6[%c0_344, %c0_345, %c0_346, %c0_347], %250 {strides = array<i32>} : memref<1x8x8x16xf32, #tpu.memory_space<vmem>>, vector<1x8x8x16xf32>,
    return
  }
  func.func @transform_0(%arg0: i32) -> (i32, i32, i32, i32) {
    %c0_i32 = arith.constant 0 : i32
    %c0_i32_0 = arith.constant 0 : i32
    %c0_i32_1 = arith.constant 0 : i32
    %c0_i32_2 = arith.constant 0 : i32
    return %arg0, %c0_i32, %c0_i32_0, %c0_i32_1 : i32, i32, i32, i32
  }
  func.func @transform_1(%arg0: i32) -> (i32, i32) {
    %c0_i32 = arith.constant 0 : i32
    %c0_i32_0 = arith.constant 0 : i32
    %c0_i32_1 = arith.constant 0 : i32
    return %c0_i32, %c0_i32_0 : i32, i32
  }
  func.func @transform_2(%arg0: i32) -> (i32, i32) {
    %c0_i32 = arith.constant 0 : i32
    %c0_i32_0 = arith.constant 0 : i32
    %c0_i32_1 = arith.constant 0 : i32
    return %c0_i32, %c0_i32_0 : i32, i32
  }
  func.func @transform_3(%arg0: i32) -> (i32, i32, i32) {
    %c0_i32 = arith.constant 0 : i32
    %c0_i32_0 = arith.constant 0 : i32
    %c0_i32_1 = arith.constant 0 : i32
    %c0_i32_2 = arith.constant 0 : i32
    return %c0_i32, %c0_i32_0, %c0_i32_1 : i32, i32, i32
  }
  func.func @transform_4(%arg0: i32) -> (i32, i32) {
    %c0_i32 = arith.constant 0 : i32
    %c0_i32_0 = arith.constant 0 : i32
    %c0_i32_1 = arith.constant 0 : i32
    return %c0_i32, %c0_i32_0 : i32, i32
  }
  func.func @transform_5(%arg0: i32) -> (i32, i32, i32, i32) {
    %c0_i32 = arith.constant 0 : i32
    %c0_i32_0 = arith.constant 0 : i32
    %c0_i32_1 = arith.constant 0 : i32
    %c0_i32_2 = arith.constant 0 : i32
    return %arg0, %c0_i32, %c0_i32_0, %c0_i32_1 : i32, i32, i32, i32
  }
}

</mosaic_0001>

<bundles_post_ra>
// kernel: cnn_down_stack.1
= control target key start
LH: loop header
LB: loop body
LE: loop exit
PB: predicated region body
PF: predicated region fallthrough
CT: control target
= control target key end

     0   :  { %10 = vsyncpa [#allocation8], 0  ;;  %s7621_s0 = inlined_call_operand.vmem [shape: f32[2,16,16,4], index: 0, kind: input, shape index: {}]   ;;  %s7622_s1 = inlined_call_operand.vmem [shape: bf16[36,16], index: 1, kind: input, shape index: {}]   ;;  %s7623_s2 = inlined_call_operand.vmem [shape: f32[1,16], index: 2, kind: input, shape index: {}]   ;;  %s7624_s3 = inlined_call_operand.vmem [shape: bf16[4,144,16], index: 3, kind: input, shape index: {}]   ;;  %s7625_s4 = inlined_call_operand.vmem [shape: f32[4,16], index: 4, kind: input, shape index: {}]   ;;  %s7626_s5 = inlined_call_operand.hbm [shape: f32[2,8,8,16], index: 5, kind: output, shape index: {}]  }
   0x1   :  { %12 = vsyncpa [#allocation8 + $0x1], 0  ;;  %s5308_s18 = smov 0   ;;  %s5310_s19 = smov 0  }
   0x2   :  { %s5312_s20 = smov 0   ;;  %s5314_s21 = smov 0  }
   0x3 LB: > { %s5329_s22 = sadd.s32 4294967295, %s5260_s21   ;;  %s4836_s23 = sadd.s32 4294967294, %s5260_s21   ;;  %s5260_s21 = sphi %s5314_s21, %s7632_s21   ;;  %s5256_s20 = sphi %s5312_s20, %s7631_s20   ;;  %s5252_s19 = sphi %s5310_s19, %s7630_s19   ;;  %s5248_s18 = sphi %s5308_s18, %s7629_s18  }
   0x4   : > { %s5333_s24 = sadd.s32 1, %s5260_s21   ;;  %s135_s25 = sadd.s32 1, %s5256_s20 }
   0x5   : > { %s132_s26 = ssub.s32 %s5260_s21, %s5333_s24  ;;  %p145_p0 = scmp.ne.s32.totalorder %s5256_s20, %s5252_s19 }
   0x6   : > { %p133_p1 = scmp.eq.s32.totalorder %s132_s26, 0  ;;  %p146_p2 = scmp.eq.s32.totalorder %s5329_s22, 1 }
   0x7   : > { %p151_p3 = scmp.ne.s32.totalorder %s5252_s19, %s5248_s18  ;;  %p152_p4 = scmp.eq.s32.totalorder %s4836_s23, 1 }
   0x8   : > { %s5344_s27 = scalar_select %p133_p1, %s5256_s20, %s135_s25  }
   0x9   : > { %p5346_p5 = por %p146_p2, %p145_p0  ;;  %p5350_p6 = por %p152_p4, %p151_p3 }
   0xa   : > { %p4839_p7 = scmp.ge.s32.totalorder %s5260_s21, 1  ;;  %p190_p8 = scmp.lt.s32.totalorder %s5260_s21, 3 }
   0xc   : > { %p191_p9 = pnand %p4839_p7, %p190_p8 }
   0xd   : > { %s5263_s30 = smov (!%p191_p9), 4   ;;  %p218_p10 = scmp.lt.s32.totalorder (!%p191_p9), %s5329_s22, 1 }
   0xe   : > { %194 = sbr.rel (%p191_p9) target bundleno = 2351 (0x92f), region = 40  ;;  %s5264_s11 = smov (!%p191_p9), 8  }
   0xf   : > { %s5265_s12 = smov (!%p191_p9), 12   ;;  %s5266_s13 = smov (!%p191_p9), 16  }
  0x10   : > { %s5267_s14 = smov (!%p191_p9), 20   ;;  %s5268_s15 = smov (!%p191_p9), 24  }
  0x11   : > { %s5269_s16 = smov (!%p191_p9), 28   ;;  %s5270_s17 = smov (!%p191_p9), 32  }
  0x13   : > { %vm224_vm0 = vcmask 31744   ;;  %v5262_v0 = vmov 0.0   ;;  %vm233_vm1 = vcmask 24576   ;;  %s219_s6 = scalar_select %p218_p10, %s5329_s22, 1  ;;  %vm227_vm2 = vcmask 25600  }
  0x14   : > { %225 = vst.msk [vmem:[#allocation2] sm:$0xff] %vm224_vm0, %v5262_v0  ;;  %vm593_vm3 = vcmask 64544   ;;  %vm786_vm4 = vcmask 97344   ;;  %vm2093_vm5 = vcmask 1041408   ;;  %vm979_vm6 = vcmask 130144  }
  0x15   : > { %226 = vst.msk [vmem:[#allocation2 + $0x8] sm:$0xff] %vm224_vm0, %v5262_v0  ;;  %s5086_s7 = sshll.u32 %s219_s6, 8  ;;  %vm1172_vm7 = vcmask 162944   ;;  %vm1365_vm8 = vcmask 195744   ;;  %vm1559_vm9 = vcmask 228544   ;;  %vm1752_vm10 = vcmask 261344  }
  0x16   : > { %234 = vst.msk [vmem:[#allocation2] sm:$0x1] %vm233_vm1, %v5262_v0  ;;  %s5426_s10 = scalar_lea.vmem %s7621_s0, %s5086_s7  ;;  %vm1945_vm11 = vcmask 294144   ;;  %vm2044_vm12 = vcmask 293888   ;;  %vm270_vm13 = vcmask 130048   ;;  %vm272_vm14 = vcmask 123904  }
  0x17   : > { %230 = vst.msk [vmem:[#allocation2 + $0x198] sm:$0xff] %vm224_vm0, %v5262_v0  ;;  %v300_v2 = vld [vmem:[%s5426_s10 + $0x10] sm:$0xff]  ;;  %v298_v3 = vld [vmem:[%s5426_s10] sm:$0xff]  ;;  %v301_v4 = vld [vmem:[%s5426_s10 + $0x18] sm:$0xff]  ;;  %vm277_vm15 = vcmask 122880  }
  0x18   : > { %231 = vst.msk [vmem:[#allocation2 + $0x1a0] sm:$0xff] %vm224_vm0, %v5262_v0  ;;  %v299_v5 = vld [vmem:[%s5426_s10 + $0x8] sm:$0xff]  ;;  %v302_v6 = vld [vmem:[%s5426_s10 + $0x20] sm:$0xff]  ;;  %v304_v8 = vld [vmem:[%s5426_s10 + $0x30] sm:$0xff] }
  0x19   : > { %235 = vst.msk [vmem:[#allocation2 + $0x18] sm:$0x1] %vm233_vm1, %v5262_v0  ;;  %v303_v9 = vld [vmem:[%s5426_s10 + $0x28] sm:$0xff]  ;;  %v305_v11 = vld [vmem:[%s5426_s10 + $0x38] sm:$0xff]  ;;  %v306_v14 = vld [vmem:[%s5426_s10 + $0x40] sm:$0xff] }
  0x1a   : > { %236 = vst.msk [vmem:[#allocation2 + $0x30] sm:$0x1] %vm233_vm1, %v5262_v0  ;;  %v307_v13 = vld [vmem:[%s5426_s10 + $0x48] sm:$0xff]  ;;  %v308_v15 = vld [vmem:[%s5426_s10 + $0x50] sm:$0xff]  ;;  %v310_v17 = vld [vmem:[%s5426_s10 + $0x60] sm:$0xff] }
  0x1b   : > { %237 = vst.msk [vmem:[#allocation2 + $0x48] sm:$0x1] %vm233_vm1, %v5262_v0  ;;  %v309_v18 = vld [vmem:[%s5426_s10 + $0x58] sm:$0xff]  ;;  %v311_v20 = vld [vmem:[%s5426_s10 + $0x68] sm:$0xff]  ;;  %v312_v23 = vld [vmem:[%s5426_s10 + $0x70] sm:$0xff] }
  0x1c   : > { %v433_v1 = vld [vmem:[#allocation2 + $0x1] sm:$0xff]  ;;  %238 = vst.msk [vmem:[#allocation2 + $0x60] sm:$0x1] %vm233_vm1, %v5262_v0  ;;  %v313_v22 = vld [vmem:[%s5426_s10 + $0x78] sm:$0xff]  ;;  %v316_v25 = vld [vmem:[%s5426_s10 + $0x90] sm:$0xff] }
  0x1d   : > { %497 = vrot.lane.b32.xlu0 %v433_v1, %s5263_s30  ;;  %239 = vst.msk [vmem:[#allocation2 + $0x78] sm:$0x1] %vm233_vm1, %v5262_v0  ;;  %v314_v24 = vld [vmem:[%s5426_s10 + $0x80] sm:$0xff]  ;;  %v315_v26 = vld [vmem:[%s5426_s10 + $0x88] sm:$0xff]  ;;  %v317_v28 = vld [vmem:[%s5426_s10 + $0x98] sm:$0xff] }
  0x1e   : > { %240 = vst.msk [vmem:[#allocation2 + $0x90] sm:$0x1] %vm233_vm1, %v5262_v0  ;;  %v319_v31 = vld [vmem:[%s5426_s10 + $0xa8] sm:$0xff]  ;;  %v318_v32 = vld [vmem:[%s5426_s10 + $0xa0] sm:$0xff]  ;;  %v320_v33 = vld [vmem:[%s5426_s10 + $0xb0] sm:$0xff] }
  0x1f   : > { %241 = vst.msk [vmem:[#allocation2 + $0xa8] sm:$0x1] %vm233_vm1, %v5262_v0  ;;  %v322_v37 = vld [vmem:[%s5426_s10 + $0xc0] sm:$0xff]  ;;  %v321_v38 = vld [vmem:[%s5426_s10 + $0xb8] sm:$0xff]  ;;  %v323_v39 = vld [vmem:[%s5426_s10 + $0xc8] sm:$0xff] }
  0x20   : > { %242 = vst.msk [vmem:[#allocation2 + $0xc0] sm:$0x1] %vm233_vm1, %v5262_v0  ;;  %v325_v43 = vld [vmem:[%s5426_s10 + $0xd8] sm:$0xff]  ;;  %v324_v44 = vld [vmem:[%s5426_s10 + $0xd0] sm:$0xff]  ;;  %v326_v45 = vld [vmem:[%s5426_s10 + $0xe0] sm:$0xff] }
  0x21   : > { %243 = vst.msk [vmem:[#allocation2 + $0xd8] sm:$0x1] %vm233_vm1, %v5262_v0  ;;  %v327_v49 = vld [vmem:[%s5426_s10 + $0xe8] sm:$0xff] }
  0x22   : > { %244 = vst.msk [vmem:[#allocation2 + $0xf0] sm:$0x1] %vm233_vm1, %v5262_v0 }
  0x23   : > { %245 = vst.msk [vmem:[#allocation2 + $0x108] sm:$0x1] %vm233_vm1, %v5262_v0 }
  0x24   : > { %246 = vst.msk [vmem:[#allocation2 + $0x120] sm:$0x1] %vm233_vm1, %v5262_v0 }
  0x25   : > { %247 = vst.msk [vmem:[#allocation2 + $0x138] sm:$0x1] %vm233_vm1, %v5262_v0 }
  0x26   : > { %248 = vst.msk [vmem:[#allocation2 + $0x150] sm:$0x1] %vm233_vm1, %v5262_v0 }
  0x27   : > { %249 = vst.msk [vmem:[#allocation2 + $0x168] sm:$0x1] %vm233_vm1, %v5262_v0 }
  0x28   : > { %250 = vst.msk [vmem:[#allocation2 + $0x180] sm:$0x1] %vm233_vm1, %v5262_v0 }
  0x29   : > { %253 = vst.msk [vmem:[#allocation2 + $0x29] sm:$0x1] %vm233_vm1, %v5262_v0 }
  0x2a   : > { %254 = vst.msk [vmem:[#allocation2 + $0x41] sm:$0x1] %vm233_vm1, %v5262_v0 }
  0x2b   : > { %255 = vst.msk [vmem:[#allocation2 + $0x59] sm:$0x1] %vm233_vm1, %v5262_v0 }
  0x2c   : > { %256 = vst.msk [vmem:[#allocation2 + $0x71] sm:$0x1] %vm233_vm1, %v5262_v0 }
  0x2d   : > { %257 = vst.msk [vmem:[#allocation2 + $0x89] sm:$0x1] %vm233_vm1, %v5262_v0 }
  0x2e   : > { %258 = vst.msk [vmem:[#allocation2 + $0xa1] sm:$0x1] %vm233_vm1, %v5262_v0 }
  0x2f   : > { %259 = vst.msk [vmem:[#allocation2 + $0xb9] sm:$0x1] %vm233_vm1, %v5262_v0 }
  0x30   : > { %260 = vst.msk [vmem:[#allocation2 + $0xd1] sm:$0x1] %vm233_vm1, %v5262_v0 }
  0x31   : > { %261 = vst.msk [vmem:[#allocation2 + $0xe9] sm:$0x1] %vm233_vm1, %v5262_v0 }
  0x32   : > { %262 = vst.msk [vmem:[#allocation2 + $0x101] sm:$0x1] %vm233_vm1, %v5262_v0 }
  0x33   : > { %263 = vst.msk [vmem:[#allocation2 + $0x119] sm:$0x1] %vm233_vm1, %v5262_v0 }
  0x34   : > { %264 = vst.msk [vmem:[#allocation2 + $0x131] sm:$0x1] %vm233_vm1, %v5262_v0 }
  0x35   : > { %265 = vst.msk [vmem:[#allocation2 + $0x149] sm:$0x1] %vm233_vm1, %v5262_v0 }
  0x36   : > { %266 = vst.msk [vmem:[#allocation2 + $0x161] sm:$0x1] %vm233_vm1, %v5262_v0 }
  0x37   : > { %267 = vst.msk [vmem:[#allocation2 + $0x179] sm:$0x1] %vm233_vm1, %v5262_v0 }
  0x38   : > { %268 = vst.msk [vmem:[#allocation2 + $0x191] sm:$0x1] %vm233_vm1, %v5262_v0 }
  0x39   : > { %333 = vst.msk [vmem:[#allocation2 + $0x31] sm:$0xff] %vm224_vm0, %v300_v2  ;;  %v369_v2 = vld [vmem:[#allocation2] sm:$0xff] }
  0x3a   : > { %251 = vst.msk [vmem:[#allocation2 + $0x198] sm:$0x1] %vm233_vm1, %v5262_v0 }
  0x3b   : > { %331 = vst.msk [vmem:[#allocation2 + $0x19] sm:$0xff] %vm224_vm0, %v298_v3 }
  0x3c   : > { %228 = vst.msk [vmem:[#allocation2 + $0x10] sm:$0x3] %vm227_vm2, %v5262_v0 }
  0x3d   : > { %232 = vst.msk [vmem:[#allocation2 + $0x1a8] sm:$0x3] %vm227_vm2, %v5262_v0  ;;  %vm2658_vm2 = vcmask 523648  }
  0x3e   : > { %252 = vst.msk [vmem:[#allocation2 + $0x11] sm:$0x1] %vm233_vm1, %v5262_v0 }
  0x3f   : > { %334 = vst.msk [vmem:[#allocation2 + $0x39] sm:$0xff] %vm224_vm0, %v301_v4  ;;  %v626_v4 = vld [vmem:[#allocation2 + $0x2] sm:$0xff] }
  0x40   : > { %v5452_v7 = vld [vmem:[#allocation2 + $0x31] sm:$0xff]  ;;  %269 = vst.msk [vmem:[#allocation2 + $0x1a9] sm:$0x1] %vm233_vm1, %v5262_v0  ;;  %vm2609_vm1 = vcmask 392448  }
  0x41   : > { %505 = vrot.lane.b32.xlu2 %v5452_v7, %s5263_s30  ;;  %332 = vst.msk [vmem:[#allocation2 + $0x21] sm:$0xff] %vm224_vm0, %v299_v5  ;;  %v5572_v56 = vld [vmem:[#allocation2 + $0x30] sm:$0xff] }
  0x42   : > { %v5461_v10 = vld [vmem:[#allocation2 + $0x19] sm:$0xff]  ;;  %335 = vst.msk [vmem:[#allocation2 + $0x49] sm:$0xff] %vm224_vm0, %v302_v6 }
  0x43   : > { %501 = vrot.lane.b32.xlu1 %v5461_v10, %s5263_s30  ;;  %v434_v12 = vld [vmem:[#allocation2 + $0x9] sm:$0xff]  ;;  %337 = vst.msk [vmem:[#allocation2 + $0x61] sm:$0xff] %vm224_vm0, %v304_v8  ;;  %v819_v3 = vld [vmem:[#allocation2 + $0x18] sm:$0xff] }
  0x44   : > { %499 = vrot.lane.b32.xlu0 %v434_v12, %s5263_s30  ;;  %336 = vst.msk [vmem:[#allocation2 + $0x51] sm:$0xff] %vm224_vm0, %v303_v9 }
  0x45   : > { %338 = vst.msk [vmem:[#allocation2 + $0x69] sm:$0xff] %vm224_vm0, %v305_v11  ;;  %v627_v8 = vld [vmem:[#allocation2 + $0xa] sm:$0xff] }
  0x46   : > { %v5474_v16 = vld [vmem:[#allocation2 + $0x39] sm:$0xff]  ;;  %340 = vst.msk [vmem:[#allocation2 + $0x81] sm:$0xff] %vm224_vm0, %v307_v13  ;;  %v370_v13 = vld [vmem:[#allocation2 + $0x8] sm:$0xff] }
  0x47   : > { %339 = vst.msk [vmem:[#allocation2 + $0x79] sm:$0xff] %vm224_vm0, %v306_v14  ;;  %v5579_v60 = vld [vmem:[#allocation2 + $0x38] sm:$0xff] }
  0x48   : > { %v5480_v19 = vld [vmem:[#allocation2 + $0x21] sm:$0xff]  ;;  %341 = vst.msk [vmem:[#allocation2 + $0x91] sm:$0xff] %vm224_vm0, %v308_v15  ;;  %v5603_v15 = vld [vmem:[#allocation2 + $0x32] sm:$0xff] }
  0x49   : > { %507 = vrot.lane.b32.xlu2 %v5474_v16, %s5263_s30  ;;  %v5486_v21 = vld [vmem:[#allocation2 + $0x49] sm:$0xff]  ;;  %343 = vst.msk [vmem:[#allocation2 + $0xa9] sm:$0xff] %vm224_vm0, %v310_v17  ;;  %v820_v9 = vld [vmem:[#allocation2 + $0x20] sm:$0xff] }
  0x4a   : > { %342 = vst.msk [vmem:[#allocation2 + $0x99] sm:$0xff] %vm224_vm0, %v309_v18  ;;  %v5502_v27 = vld [vmem:[#allocation2 + $0x61] sm:$0xff] }
  0x4b   : > { %503 = vrot.lane.b32.xlu1 %v5480_v19, %s5263_s30  ;;  %344 = vst.msk [vmem:[#allocation2 + $0xb1] sm:$0xff] %vm224_vm0, %v311_v20  ;;  %v5507_v29 = vld [vmem:[#allocation2 + $0x51] sm:$0xff]  ;;  %v5585_v1 = vld [vmem:[#allocation2 + $0x60] sm:$0xff] }
  0x4c   : > { %509 = vrot.lane.b32.xlu0 %v5486_v21, %s5263_s30  ;;  %346 = vst.msk [vmem:[#allocation2 + $0xc9] sm:$0xff] %vm224_vm0, %v313_v22  ;;  %v5512_v30 = vld [vmem:[#allocation2 + $0x69] sm:$0xff]  ;;  %v628_v14 = vld [vmem:[#allocation2 + $0x1a] sm:$0xff] }
  0x4d   : > { %345 = vst.msk [vmem:[#allocation2 + $0xc1] sm:$0xff] %vm224_vm0, %v312_v23  ;;  %v5525_v34 = vld [vmem:[#allocation2 + $0x81] sm:$0xff]  ;;  %v5613_v20 = vld [vmem:[#allocation2 + $0x4a] sm:$0xff] }
  0x4e   : > { %347 = vst.msk [vmem:[#allocation2 + $0xd9] sm:$0xff] %vm224_vm0, %v314_v24  ;;  %v5527_v35 = vld [vmem:[#allocation2 + $0x79] sm:$0xff]  ;;  %v629_v12 = vld [vmem:[#allocation2 + $0x22] sm:$0xff] }
  0x4f   : > { %349 = vst.msk [vmem:[#allocation2 + $0xf1] sm:$0xff] %vm224_vm0, %v316_v25  ;;  %v5531_v36 = vld [vmem:[#allocation2 + $0x91] sm:$0xff]  ;;  %v5596_v11 = vld [vmem:[#allocation2 + $0x80] sm:$0xff]  ;;  %v5615_v22 = vld [vmem:[#allocation2 + $0x48] sm:$0xff] }
  0x50   : > { %348 = vst.msk [vmem:[#allocation2 + $0xe1] sm:$0xff] %vm224_vm0, %v315_v26  ;;  %v5543_v40 = vld [vmem:[#allocation2 + $0xa9] sm:$0xff]  ;;  %v5619_v23 = vld [vmem:[#allocation2 + $0x3a] sm:$0xff]  ;;  %v5623_v24 = vld [vmem:[#allocation2 + $0x52] sm:$0xff] }
  0x51   : > { %513 = vrot.lane.b32.xlu2 %v5502_v27, %s5263_s30  ;;  %350 = vst.msk [vmem:[#allocation2 + $0xf9] sm:$0xff] %vm224_vm0, %v317_v28  ;;  %v5545_v41 = vld [vmem:[#allocation2 + $0x99] sm:$0xff]  ;;  %v5606_v18 = vld [vmem:[#allocation2 + $0xa8] sm:$0xff]  ;;  %v5632_v28 = vld [vmem:[#allocation2 + $0x50] sm:$0xff] }
  0x52   : > { %352 = vst.msk [vmem:[#allocation2 + $0x111] sm:$0xff] %vm224_vm0, %v319_v31  ;;  %v5549_v42 = vld [vmem:[#allocation2 + $0xb1] sm:$0xff] }
  0x53   : > { %511 = vrot.lane.b32.xlu1 %v5507_v29, %s5263_s30  ;;  %351 = vst.msk [vmem:[#allocation2 + $0x109] sm:$0xff] %vm224_vm0, %v318_v32  ;;  %v450_v46 = vld [vmem:[#allocation2 + $0xc9] sm:$0xff] }
  0x54   : > { %515 = vrot.lane.b32.xlu0 %v5512_v30, %s5263_s30  ;;  %353 = vst.msk [vmem:[#allocation2 + $0x121] sm:$0xff] %vm224_vm0, %v320_v33  ;;  %v449_v47 = vld [vmem:[#allocation2 + $0xc1] sm:$0xff]  ;;  %v5636_v31 = vld [vmem:[#allocation2 + $0x6a] sm:$0xff] }
  0x55   : > { %355 = vst.msk [vmem:[#allocation2 + $0x139] sm:$0xff] %vm224_vm0, %v322_v37  ;;  %v451_v48 = vld [vmem:[#allocation2 + $0xd9] sm:$0xff]  ;;  %v5627_v26 = vld [vmem:[#allocation2 + $0xc8] sm:$0xff] }
  0x56   : > { %354 = vst.msk [vmem:[#allocation2 + $0x129] sm:$0xff] %vm224_vm0, %v321_v38  ;;  %v453_v50 = vld [vmem:[#allocation2 + $0xf1] sm:$0xff]  ;;  %v5640_v32 = vld [vmem:[#allocation2 + $0x68] sm:$0xff] }
  0x57   : > { %356 = vst.msk [vmem:[#allocation2 + $0x141] sm:$0xff] %vm224_vm0, %v323_v39  ;;  %v452_v51 = vld [vmem:[#allocation2 + $0xe1] sm:$0xff]  ;;  %v389_v38 = vld [vmem:[#allocation2 + $0xf0] sm:$0xff]  ;;  %v5652_v39 = vld [vmem:[#allocation2 + $0x78] sm:$0xff] }
  0x58   : > { %358 = vst.msk [vmem:[#allocation2 + $0x159] sm:$0xff] %vm224_vm0, %v325_v43  ;;  %v454_v52 = vld [vmem:[#allocation2 + $0xf9] sm:$0xff]  ;;  %v5644_v33 = vld [vmem:[#allocation2 + $0x62] sm:$0xff]  ;;  %v5657_v43 = vld [vmem:[#allocation2 + $0x90] sm:$0xff] }
  0x59   : > { %519 = vrot.lane.b32.xlu2 %v5525_v34, %s5263_s30  ;;  %357 = vst.msk [vmem:[#allocation2 + $0x151] sm:$0xff] %vm224_vm0, %v324_v44  ;;  %v456_v53 = vld [vmem:[#allocation2 + $0x111] sm:$0xff] }
  0x5a   : > { %359 = vst.msk [vmem:[#allocation2 + $0x169] sm:$0xff] %vm224_vm0, %v326_v45  ;;  %v455_v54 = vld [vmem:[#allocation2 + $0x109] sm:$0xff] }
  0x5b   : > { %517 = vrot.lane.b32.xlu1 %v5527_v35, %s5263_s30  ;;  %360 = vst.msk [vmem:[#allocation2 + $0x171] sm:$0xff] %vm224_vm0, %v327_v49  ;;  %v457_v55 = vld [vmem:[#allocation2 + $0x121] sm:$0xff]  ;;  %v392_v45 = vld [vmem:[#allocation2 + $0x110] sm:$0xff] }
  0x5c   : > { %521 = vrot.lane.b32.xlu0 %v5531_v36, %s5263_s30  ;;  %405 = vst.msk [vmem:[#allocation3 + $0x20] sm:$0xff] %vm224_vm0, %v5572_v56  ;;  %v459_v57 = vld [vmem:[#allocation2 + $0x139] sm:$0xff]  ;;  %v5671_v49 = vld [vmem:[#allocation2 + $0xb0] sm:$0xff] }
  0x5d   : > { %v458_v58 = vld [vmem:[#allocation2 + $0x129] sm:$0xff]  ;;  %406 = vst.msk [vmem:[#allocation3 + $0x28] sm:$0xff] %vm224_vm0, %v5579_v60 }
  0x5e   : > { %v460_v59 = vld [vmem:[#allocation2 + $0x141] sm:$0xff]  ;;  %409 = vst.msk [vmem:[#allocation3 + $0x40] sm:$0xff] %vm224_vm0, %v5585_v1 }
  0x5f   : > { %v462_v61 = vld [vmem:[#allocation2 + $0x159] sm:$0xff]  ;;  %401 = vst.msk [vmem:[#allocation3] sm:$0xff] %vm224_vm0, %v369_v2 }
  0x60   : > { %v461_v62 = vld [vmem:[#allocation2 + $0x151] sm:$0xff]  ;;  %403 = vst.msk [vmem:[#allocation3 + $0x10] sm:$0xff] %vm224_vm0, %v819_v3 }
  0x61   : > { %525 = vrot.lane.b32.xlu2 %v5543_v40, %s5263_s30  ;;  %v463_v63 = vld [vmem:[#allocation2 + $0x169] sm:$0xff]  ;;  %404 = vst.msk [vmem:[#allocation3 + $0x18] sm:$0xff] %vm224_vm0, %v820_v9 }
  0x62   : > { %v464_v6 = vld [vmem:[#allocation2 + $0x171] sm:$0xff]  ;;  %412 = vst.msk [vmem:[#allocation3 + $0x58] sm:$0xff] %vm224_vm0, %v5596_v11 }
  0x63   : > { %523 = vrot.lane.b32.xlu1 %v5545_v41, %s5263_s30  ;;  %402 = vst.msk [vmem:[#allocation3 + $0x8] sm:$0xff] %vm224_vm0, %v370_v13  ;;  %v399_v13 = vld [vmem:[#allocation2 + $0x168] sm:$0xff] }
  0x64   : > { %527 = vrot.lane.b32.xlu0 %v5549_v42, %s5263_s30  ;;  %415 = vst.msk [vmem:[#allocation3 + $0x70] sm:$0xff] %vm224_vm0, %v5606_v18 }
  0x65   : > { %407 = vst.msk [vmem:[#allocation3 + $0x30] sm:$0xff] %vm224_vm0, %v5615_v22 }
  0x66   : > { %418 = vst.msk [vmem:[#allocation3 + $0x88] sm:$0xff] %vm224_vm0, %v5627_v26 }
  0x67   : > { %408 = vst.msk [vmem:[#allocation3 + $0x38] sm:$0xff] %vm224_vm0, %v5632_v28 }
  0x68   : > { %410 = vst.msk [vmem:[#allocation3 + $0x48] sm:$0xff] %vm224_vm0, %v5640_v32 }
  0x69   : > { %531 = vrot.lane.b32.xlu2 %v450_v46, %s5263_s30  ;;  %421 = vst.msk [vmem:[#allocation3 + $0xa0] sm:$0xff] %vm224_vm0, %v389_v38 }
  0x6a   : > { %411 = vst.msk [vmem:[#allocation3 + $0x50] sm:$0xff] %vm224_vm0, %v5652_v39 }
  0x6b   : > { %529 = vrot.lane.b32.xlu1 %v449_v47, %s5263_s30  ;;  %413 = vst.msk [vmem:[#allocation3 + $0x60] sm:$0xff] %vm224_vm0, %v5657_v43  ;;  %v5668_v47 = vld [vmem:[#allocation2 + $0x98] sm:$0xff] }
  0x6c   : > { %533 = vrot.lane.b32.xlu0 %v451_v48, %s5263_s30  ;;  %424 = vst.msk [vmem:[#allocation3 + $0xb8] sm:$0xff] %vm224_vm0, %v392_v45 }
  0x6d   : > { %414 = vst.msk [vmem:[#allocation3 + $0x68] sm:$0xff] %vm224_vm0, %v5668_v47 }
  0x6e   : > { %416 = vst.msk [vmem:[#allocation3 + $0x78] sm:$0xff] %vm224_vm0, %v5671_v49 }
  0x6f   : > { %431 = vst.msk [vmem:[#allocation3 + $0xf0] sm:$0xff] %vm224_vm0, %v399_v13 }
  0x70   : > { %271 = vst.msk [vmem:[#allocation4] sm:$0xff] %vm270_vm13, %v5262_v0 }
  0x71   : > { %537 = vrot.lane.b32.xlu2 %v453_v50, %s5263_s30  ;;  %275 = vst.msk [vmem:[#allocation4 + $0x90] sm:$0xff] %vm270_vm13, %v5262_v0 }
  0x72   : > { %273 = vst.msk [vmem:[#allocation4 + $0x8] sm:$0x3] %vm272_vm14, %v5262_v0 }
  0x73   : > { %535 = vrot.lane.b32.xlu1 %v452_v51, %s5263_s30  ;;  %v5684_v51 = vld [vmem:[#allocation2 + $0xc0] sm:$0xff]  ;;  %276 = vst.msk [vmem:[#allocation4 + $0x98] sm:$0x3] %vm272_vm14, %v5262_v0 }
  0x74   : > { %539 = vrot.lane.b32.xlu0 %v454_v52, %s5263_s30  ;;  %417 = vst.msk [vmem:[#allocation3 + $0x80] sm:$0xff] %vm224_vm0, %v5684_v51 }
  0x75   : > { %278 = vst.msk [vmem:[#allocation4] sm:$0x1] %vm277_vm15, %v5262_v0 }
  0x76   : > { %279 = vst.msk [vmem:[#allocation4 + $0x10] sm:$0x1] %vm277_vm15, %v5262_v0 }
  0x77   : > { %280 = vst.msk [vmem:[#allocation4 + $0x20] sm:$0x1] %vm277_vm15, %v5262_v0 }
  0x78   : > { %281 = vst.msk [vmem:[#allocation4 + $0x30] sm:$0x1] %vm277_vm15, %v5262_v0 }
  0x79   : > { %543 = vrot.lane.b32.xlu2 %v456_v53, %s5263_s30  ;;  %v5687_v53 = vld [vmem:[#allocation2 + $0xd8] sm:$0xff]  ;;  %282 = vst.msk [vmem:[#allocation4 + $0x40] sm:$0x1] %vm277_vm15, %v5262_v0 }
  0x7a   : > { %419 = vst.msk [vmem:[#allocation3 + $0x90] sm:$0xff] %vm224_vm0, %v5687_v53 }
  0x7b   : > { %541 = vrot.lane.b32.xlu1 %v455_v54, %s5263_s30  ;;  %283 = vst.msk [vmem:[#allocation4 + $0x50] sm:$0x1] %vm277_vm15, %v5262_v0 }
  0x7c   : > { %545 = vrot.lane.b32.xlu0 %v457_v55, %s5263_s30  ;;  %v398_v55 = vld [vmem:[#allocation2 + $0x158] sm:$0xff]  ;;  %284 = vst.msk [vmem:[#allocation4 + $0x60] sm:$0x1] %vm277_vm15, %v5262_v0 }
  0x7d   : > { %430 = vst.msk [vmem:[#allocation3 + $0xe8] sm:$0xff] %vm224_vm0, %v398_v55 }
  0x7e   : > { %285 = vst.msk [vmem:[#allocation4 + $0x70] sm:$0x1] %vm277_vm15, %v5262_v0 }
  0x7f   : > { %286 = vst.msk [vmem:[#allocation4 + $0x80] sm:$0x1] %vm277_vm15, %v5262_v0 }
  0x80   : > { %287 = vst.msk [vmem:[#allocation4 + $0x90] sm:$0x1] %vm277_vm15, %v5262_v0 }
  0x81   : > { %549 = vrot.lane.b32.xlu2 %v459_v57, %s5263_s30  ;;  %289 = vst.msk [vmem:[#allocation4 + $0x19] sm:$0x1] %vm277_vm15, %v5262_v0 }
  0x82   : > { %290 = vst.msk [vmem:[#allocation4 + $0x29] sm:$0x1] %vm277_vm15, %v5262_v0 }
  0x83   : > { %547 = vrot.lane.b32.xlu1 %v458_v58, %s5263_s30  ;;  %v5702_v58 = vld [vmem:[#allocation2 + $0xe0] sm:$0xff]  ;;  %291 = vst.msk [vmem:[#allocation4 + $0x39] sm:$0x1] %vm277_vm15, %v5262_v0 }
  0x84   : > { %551 = vrot.lane.b32.xlu0 %v460_v59, %s5263_s30  ;;  %420 = vst.msk [vmem:[#allocation3 + $0x98] sm:$0xff] %vm224_vm0, %v5702_v58 }
  0x85   : > { %292 = vst.msk [vmem:[#allocation4 + $0x49] sm:$0x1] %vm277_vm15, %v5262_v0 }
  0x86   : > { %293 = vst.msk [vmem:[#allocation4 + $0x59] sm:$0x1] %vm277_vm15, %v5262_v0 }
  0x87   : > { %294 = vst.msk [vmem:[#allocation4 + $0x69] sm:$0x1] %vm277_vm15, %v5262_v0 }
  0x88   : > { %295 = vst.msk [vmem:[#allocation4 + $0x79] sm:$0x1] %vm277_vm15, %v5262_v0 }
  0x89   : > { %555 = vrot.lane.b32.xlu2 %v462_v61, %s5263_s30  ;;  %v5705_v61 = vld [vmem:[#allocation2 + $0xf8] sm:$0xff]  ;;  %296 = vst.msk [vmem:[#allocation4 + $0x89] sm:$0x1] %vm277_vm15, %v5262_v0 }
  0x8a   : > { %422 = vst.msk [vmem:[#allocation3 + $0xa8] sm:$0xff] %vm224_vm0, %v5705_v61 }
  0x8b   : > { %553 = vrot.lane.b32.xlu1 %v461_v62, %s5263_s30  ;;  %288 = vst.msk [vmem:[#allocation4 + $0x9] sm:$0x1] %vm277_vm15, %v5262_v0 }
  0x8c   : > { %557 = vrot.lane.b32.xlu0 %v463_v63, %s5263_s30  ;;  %v391_v63 = vld [vmem:[#allocation2 + $0x108] sm:$0xff]  ;;  %297 = vst.msk [vmem:[#allocation4 + $0x99] sm:$0x1] %vm277_vm15, %v5262_v0 }
  0x8d   : > { %423 = vst.msk [vmem:[#allocation3 + $0xb0] sm:$0xff] %vm224_vm0, %v391_v63 }
  0x8f   : > { %v498_v5 = vpop.permute.xlu0 %497 }
  0x90   : > { %594 = vst.msk [vmem:[#allocation3] sm:$0xff] %vm593_vm3, %v498_v5 }
  0x91   : > { %690 = vrot.lane.b32.xlu2 %v626_v4, %s5264_s11  ;;  %v393_v4 = vld [vmem:[#allocation2 + $0x120] sm:$0xff] }
  0x92   : > { %425 = vst.msk [vmem:[#allocation3 + $0xc0] sm:$0xff] %vm224_vm0, %v393_v4  ;;  %v1791_v4 = vld [vmem:[#allocation2 + $0x7a] sm:$0xff] }
  0x93   : > { %559 = vrot.lane.b32.xlu1 %v464_v6, %s5263_s30  ;;  %s5276_s30 = smov 112  }
  0x94   : > { %692 = vrot.lane.b32.xlu0 %v627_v8, %s5264_s11 }
  0x99   : > { %696 = vrot.lane.b32.xlu2 %v629_v12, %s5264_s11 }
  0x9b   : > { %694 = vrot.lane.b32.xlu1 %v628_v14, %s5264_s11  ;;  %v506_v17 = vpop.permute.xlu2 %505 }
  0x9c   : > { %698 = vrot.lane.b32.xlu0 %v5603_v15, %s5264_s11  ;;  %598 = vst.msk [vmem:[#allocation3 + $0x20] sm:$0xff] %vm593_vm3, %v506_v17 }
  0xa1   : > { %702 = vrot.lane.b32.xlu2 %v5613_v20, %s5264_s11 }
  0xa3   : > { %700 = vrot.lane.b32.xlu1 %v5619_v23, %s5264_s11  ;;  %v508_v25 = vpop.permute.xlu2 %507 }
  0xa4   : > { %704 = vrot.lane.b32.xlu0 %v5623_v24, %s5264_s11  ;;  %599 = vst.msk [vmem:[#allocation3 + $0x28] sm:$0xff] %vm593_vm3, %v508_v25 }
  0xa9   : > { %708 = vrot.lane.b32.xlu2 %v5636_v31, %s5264_s11 }
  0xab   : > { %706 = vrot.lane.b32.xlu1 %v5644_v33, %s5264_s11  ;;  %v514_v37 = vpop.permute.xlu2 %513 }
  0xac   : > { %602 = vst.msk [vmem:[#allocation3 + $0x40] sm:$0xff] %vm593_vm3, %v514_v37  ;;  %883 = vrot.lane.b32.xlu0 %v819_v3, %s5265_s12 }
  0xb1   : > { %1076 = vrot.lane.b32.xlu2 %v5461_v10, %s5266_s13 }
  0xb3   : > { %885 = vrot.lane.b32.xlu1 %v820_v9, %s5265_s12  ;;  %v520_v44 = vpop.permute.xlu2 %519  ;;  %v396_v9 = vld [vmem:[#allocation2 + $0x140] sm:$0xff] }
  0xb4   : > { %605 = vst.msk [vmem:[#allocation3 + $0x58] sm:$0xff] %vm593_vm3, %v520_v44  ;;  %1078 = vrot.lane.b32.xlu0 %v5480_v19, %s5266_s13  ;;  %v395_v19 = vld [vmem:[#allocation2 + $0x138] sm:$0xff] }
  0xb5   : > { %v502_v46 = vpop.permute.xlu1 %501  ;;  %427 = vst.msk [vmem:[#allocation3 + $0xd0] sm:$0xff] %vm224_vm0, %v395_v19 }
  0xb6   : > { %596 = vst.msk [vmem:[#allocation3 + $0x10] sm:$0xff] %vm593_vm3, %v502_v46  ;;  %v500_v48 = vpop.permute.xlu0 %499 }
  0xb7   : > { %595 = vst.msk [vmem:[#allocation3 + $0x8] sm:$0xff] %vm593_vm3, %v500_v48 }
  0xb8   : > { %428 = vst.msk [vmem:[#allocation3 + $0xd8] sm:$0xff] %vm224_vm0, %v396_v9 }
  0xb9   : > { %1271 = vrot.lane.b32.xlu2 %v629_v12, %s5267_s14 }
  0xbb   : > { %1269 = vrot.lane.b32.xlu1 %v628_v14, %s5267_s14  ;;  %v526_v10 = vpop.permute.xlu2 %525 }
  0xbc   : > { %608 = vst.msk [vmem:[#allocation3 + $0x70] sm:$0xff] %vm593_vm3, %v526_v10  ;;  %1463 = vrot.lane.b32.xlu0 %v5572_v56, %s5268_s15 }
  0xbd   : > { %v504_v50 = vpop.permute.xlu1 %503 }
  0xbe   : > { %597 = vst.msk [vmem:[#allocation3 + $0x18] sm:$0xff] %vm593_vm3, %v504_v50  ;;  %v510_v52 = vpop.permute.xlu0 %509 }
  0xbf   : > { %600 = vst.msk [vmem:[#allocation3 + $0x30] sm:$0xff] %vm593_vm3, %v510_v52 }
  0xc1   : > { %1656 = vrot.lane.b32.xlu2 %v5452_v7, %s5269_s16 }
  0xc3   : > { %1465 = vrot.lane.b32.xlu1 %v5579_v60, %s5268_s15  ;;  %v532_v54 = vpop.permute.xlu2 %531 }
  0xc4   : > { %611 = vst.msk [vmem:[#allocation3 + $0x88] sm:$0xff] %vm593_vm3, %v532_v54  ;;  %1658 = vrot.lane.b32.xlu0 %v5474_v16, %s5269_s16  ;;  %v367_v54 = vld [vmem:[%s7622_s1 + $0x10] sm:$0x3] }
  0xc5   : > { %v512_v57 = vpop.permute.xlu1 %511  ;;  %v2038_v55 = vunpack.c.l.b16 %v367_v54 }
  0xc6   : > { %601 = vst.msk [vmem:[#allocation3 + $0x38] sm:$0xff] %vm593_vm3, %v512_v57  ;;  %v516_v59 = vpop.permute.xlu0 %515 }
  0xc7   : > { %603 = vst.msk [vmem:[#allocation3 + $0x48] sm:$0xff] %vm593_vm3, %v516_v59 }
  0xc9   : > { %1851 = vrot.lane.b32.xlu2 %v5619_v23, %s5270_s17 }
  0xcb   : > { %1849 = vrot.lane.b32.xlu1 %v5603_v15, %s5270_s17  ;;  %v538_v62 = vpop.permute.xlu2 %537 }
  0xcc   : > { %614 = vst.msk [vmem:[#allocation3 + $0xa0] sm:$0xff] %vm593_vm3, %v538_v62  ;;  %887 = vrot.lane.b32.xlu0 %v5572_v56, %s5265_s12  ;;  %v394_v56 = vld [vmem:[#allocation2 + $0x128] sm:$0xff]  ;;  %v5087_v62 = vld [vmem:[%s7622_s1] sm:$0xff] }
  0xcd   : > { %v518_v2 = vpop.permute.xlu1 %517  ;;  %426 = vst.msk [vmem:[#allocation3 + $0xc8] sm:$0xff] %vm224_vm0, %v394_v56 }
  0xce   : > { %604 = vst.msk [vmem:[#allocation3 + $0x50] sm:$0xff] %vm593_vm3, %v518_v2  ;;  %v522_v3 = vpop.permute.xlu0 %521 }
  0xcf   : > { %606 = vst.msk [vmem:[#allocation3 + $0x60] sm:$0xff] %vm593_vm3, %v522_v3  ;;  %v1792_v3 = vld [vmem:[#allocation2 + $0x82] sm:$0xff] }
  0xd1   : > { %1080 = vrot.lane.b32.xlu2 %v5452_v7, %s5266_s13 }
  0xd3   : > { %889 = vrot.lane.b32.xlu1 %v5579_v60, %s5265_s12  ;;  %v544_v5 = vpop.permute.xlu2 %543 }
  0xd4   : > { %617 = vst.msk [vmem:[#allocation3 + $0xb8] sm:$0xff] %vm593_vm3, %v544_v5  ;;  %1082 = vrot.lane.b32.xlu0 %v5474_v16, %s5266_s13  ;;  %v397_v16 = vld [vmem:[#allocation2 + $0x150] sm:$0xff] }
  0xd5   : > { %v524_v6 = vpop.permute.xlu1 %523  ;;  %429 = vst.msk [vmem:[#allocation3 + $0xe0] sm:$0xff] %vm224_vm0, %v397_v16 }
  0xd6   : > { %607 = vst.msk [vmem:[#allocation3 + $0x68] sm:$0xff] %vm593_vm3, %v524_v6  ;;  %v528_v8 = vpop.permute.xlu0 %527 }
  0xd7   : > { %609 = vst.msk [vmem:[#allocation3 + $0x78] sm:$0xff] %vm593_vm3, %v528_v8 }
  0xd9   : > { %1275 = vrot.lane.b32.xlu2 %v5619_v23, %s5267_s14 }
  0xdb   : > { %1273 = vrot.lane.b32.xlu1 %v5603_v15, %s5267_s14  ;;  %v550_v7 = vpop.permute.xlu2 %549  ;;  %v400_v15 = vld [vmem:[#allocation2 + $0x170] sm:$0xff] }
  0xdc   : > { %620 = vst.msk [vmem:[#allocation3 + $0xd0] sm:$0xff] %vm593_vm3, %v550_v7  ;;  %1467 = vrot.lane.b32.xlu0 %v5615_v22, %s5268_s15 }
  0xdd   : > { %v530_v60 = vpop.permute.xlu1 %529  ;;  %432 = vst.msk [vmem:[#allocation3 + $0xf8] sm:$0xff] %vm224_vm0, %v400_v15  ;;  %v1794_v15 = vld [vmem:[#allocation2 + $0x9a] sm:$0xff] }
  0xde   : > { %610 = vst.msk [vmem:[#allocation3 + $0x80] sm:$0xff] %vm593_vm3, %v530_v60  ;;  %v534_v12 = vpop.permute.xlu0 %533 }
  0xdf   : > { %612 = vst.msk [vmem:[#allocation3 + $0x90] sm:$0xff] %vm593_vm3, %v534_v12 }
  0xe1   : > { %1660 = vrot.lane.b32.xlu2 %v5486_v21, %s5269_s16 }
  0xe3   : > { %1469 = vrot.lane.b32.xlu1 %v5632_v28, %s5268_s15  ;;  %v556_v14 = vpop.permute.xlu2 %555 }
  0xe4   : > { %623 = vst.msk [vmem:[#allocation3 + $0xe8] sm:$0xff] %vm593_vm3, %v556_v14  ;;  %1662 = vrot.lane.b32.xlu0 %v5507_v29, %s5269_s16 }
  0xe5   : > { %v536_v17 = vpop.permute.xlu1 %535 }
  0xe6   : > { %613 = vst.msk [vmem:[#allocation3 + $0x98] sm:$0xff] %vm593_vm3, %v536_v17  ;;  %v540_v23 = vpop.permute.xlu0 %539  ;;  %v1793_v17 = vld [vmem:[#allocation2 + $0x92] sm:$0xff] }
  0xe7   : > { %615 = vst.msk [vmem:[#allocation3 + $0xa8] sm:$0xff] %vm593_vm3, %v540_v23 }
  0xe9   : > { %1855 = vrot.lane.b32.xlu2 %v5623_v24, %s5270_s17 }
  0xeb   : > { %1853 = vrot.lane.b32.xlu1 %v5613_v20, %s5270_s17  ;;  %v691_v25 = vpop.permute.xlu2 %690 }
  0xec   : > { %787 = vst.msk [vmem:[#allocation3] sm:$0xff] %vm786_vm4, %v691_v25  ;;  %891 = vrot.lane.b32.xlu0 %v5615_v22, %s5265_s12 }
  0xed   : > { %v542_v37 = vpop.permute.xlu1 %541 }
  0xee   : > { %616 = vst.msk [vmem:[#allocation3 + $0xb0] sm:$0xff] %vm593_vm3, %v542_v37  ;;  %v546_v38 = vpop.permute.xlu0 %545 }
  0xef   : > { %618 = vst.msk [vmem:[#allocation3 + $0xc0] sm:$0xff] %vm593_vm3, %v546_v38 }
  0xf1   : > { %1084 = vrot.lane.b32.xlu2 %v5486_v21, %s5266_s13 }
  0xf3   : > { %893 = vrot.lane.b32.xlu1 %v5632_v28, %s5265_s12  ;;  %v697_v44 = vpop.permute.xlu2 %696 }
  0xf4   : > { %790 = vst.msk [vmem:[#allocation3 + $0x18] sm:$0xff] %vm786_vm4, %v697_v44  ;;  %1086 = vrot.lane.b32.xlu0 %v5507_v29, %s5266_s13 }
  0xf5   : > { %v548_v45 = vpop.permute.xlu1 %547 }
  0xf6   : > { %619 = vst.msk [vmem:[#allocation3 + $0xc8] sm:$0xff] %vm593_vm3, %v548_v45  ;;  %v552_v22 = vpop.permute.xlu0 %551 }
  0xf7   : > { %621 = vst.msk [vmem:[#allocation3 + $0xd8] sm:$0xff] %vm593_vm3, %v552_v22 }
  0xf9   : > { %1279 = vrot.lane.b32.xlu2 %v5623_v24, %s5267_s14 }
  0xfb   : > { %1277 = vrot.lane.b32.xlu1 %v5613_v20, %s5267_s14  ;;  %v703_v21 = vpop.permute.xlu2 %702 }
  0xfc   : > { %793 = vst.msk [vmem:[#allocation3 + $0x30] sm:$0xff] %vm786_vm4, %v703_v21  ;;  %1471 = vrot.lane.b32.xlu0 %v5585_v1, %s5268_s15 }
  0xfd   : > { %v554_v28 = vpop.permute.xlu1 %553 }
  0xfe   : > { %622 = vst.msk [vmem:[#allocation3 + $0xe0] sm:$0xff] %vm593_vm3, %v554_v28  ;;  %v558_v29 = vpop.permute.xlu0 %557 }
  0xff   : > { %624 = vst.msk [vmem:[#allocation3 + $0xf0] sm:$0xff] %vm593_vm3, %v558_v29 }
 0x101   : > { %1664 = vrot.lane.b32.xlu2 %v5502_v27, %s5269_s16 }
 0x103   : > { %1473 = vrot.lane.b32.xlu1 %v5640_v32, %s5268_s15  ;;  %v709_v24 = vpop.permute.xlu2 %708 }
 0x104   : > { %796 = vst.msk [vmem:[#allocation3 + $0x48] sm:$0xff] %vm786_vm4, %v709_v24  ;;  %1666 = vrot.lane.b32.xlu0 %v5512_v30, %s5269_s16 }
 0x105   : > { %v560_v20 = vpop.permute.xlu1 %559 }
 0x106   : > { %625 = vst.msk [vmem:[#allocation3 + $0xf8] sm:$0xff] %vm593_vm3, %v560_v20  ;;  %v693_v46 = vpop.permute.xlu0 %692  ;;  %v5900_v20 = vld [vmem:[#allocation2 + $0xaa] sm:$0xff]  ;;  %vm2707_vm3 = vcmask 654848  }
 0x107   : > { %788 = vst.msk [vmem:[#allocation3 + $0x8] sm:$0xff] %vm786_vm4, %v693_v46 }
 0x109   : > { %1859 = vrot.lane.b32.xlu2 %v5636_v31, %s5270_s17 }
 0x10b   : > { %1857 = vrot.lane.b32.xlu1 %v5644_v33, %s5270_s17  ;;  %v1077_v48 = vpop.permute.xlu2 %1076 }
 0x10c   : > { %895 = vrot.lane.b32.xlu0 %v5585_v1, %s5265_s12 }
 0x10d   : > { %v695_v10 = vpop.permute.xlu1 %694 }
 0x10e   : > { %789 = vst.msk [vmem:[#allocation3 + $0x10] sm:$0xff] %vm786_vm4, %v695_v10  ;;  %v699_v19 = vpop.permute.xlu0 %698 }
 0x10f   : > { %791 = vst.msk [vmem:[#allocation3 + $0x20] sm:$0xff] %vm786_vm4, %v699_v19  ;;  %v1796_v19 = vld [vmem:[#allocation2 + $0xb2] sm:$0xff] }
 0x111   : > { %1088 = vrot.lane.b32.xlu2 %v5502_v27, %s5266_s13  ;;  %v2041_v27 = vpack.c.b16 %v2038_v55, %v2038_v55 }
 0x113   : > { %897 = vrot.lane.b32.xlu1 %v5640_v32, %s5265_s12  ;;  %v1272_v50 = vpop.permute.xlu2 %1271 }
 0x114   : > { %1090 = vrot.lane.b32.xlu0 %v5512_v30, %s5266_s13  ;;  %v2095_v30 = vsel %vm2093_vm5, %v2041_v27, 0  ;;  %vm2806_vm5 = vcmask 917248  }
 0x115   : > { %v701_v52 = vpop.permute.xlu1 %700  ;;  %2102 = vmatpush.bf16.msra.mxu0 %v2095_v30  ;;  %5126 = vmatpush.bf16.msra.mxu3 %v2095_v30 }
 0x116   : > { %792 = vst.msk [vmem:[#allocation3 + $0x28] sm:$0xff] %vm786_vm4, %v701_v52  ;;  %v705_v1 = vpop.permute.xlu0 %704 }
 0x117   : > { %794 = vst.msk [vmem:[#allocation3 + $0x38] sm:$0xff] %vm786_vm4, %v705_v1 }
 0x119   : > { %1283 = vrot.lane.b32.xlu2 %v5636_v31, %s5267_s14  ;;  %v5088_v31 = vld [vmem:[%s7622_s1 + $0x8] sm:$0xff] }
 0x11a   : > { %2103 = vmatpush.bf16.msra.mxu0 %v5088_v31  ;;  %5127 = vmatpush.bf16.msra.mxu3 %v5088_v31 }
 0x11b   : > { %1281 = vrot.lane.b32.xlu1 %v5644_v33, %s5267_s14  ;;  %v1657_v32 = vpop.permute.xlu2 %1656 }
 0x11c   : > { %1475 = vrot.lane.b32.xlu0 %v5652_v39, %s5268_s15 }
 0x11d   : > { %v707_v57 = vpop.permute.xlu1 %706 }
 0x11e   : > { %795 = vst.msk [vmem:[#allocation3 + $0x40] sm:$0xff] %vm786_vm4, %v707_v57  ;;  %v884_v59 = vpop.permute.xlu0 %883  ;;  %2104 = vmatpush.bf16.msra.mxu0 %v5087_v62  ;;  %5128 = vmatpush.bf16.msra.mxu3 %v5087_v62  ;;  %v5939_v62 = vld [vmem:[#allocation2 + $0xc2] sm:$0xff] }
 0x11f   : > { %980 = vst.msk [vmem:[#allocation3] sm:$0xff] %vm979_vm6, %v884_v59 }
 0x120   : > { %1173 = vst.msk [vmem:[#allocation3] sm:$0xff] %vm1172_vm7, %v1077_v48 }
 0x121   : > { %1668 = vrot.lane.b32.xlu2 %v5527_v35, %s5269_s16 }
 0x123   : > { %1477 = vrot.lane.b32.xlu1 %v5596_v11, %s5268_s15  ;;  %v1852_v33 = vpop.permute.xlu2 %1851 }
 0x124   : > { %1670 = vrot.lane.b32.xlu0 %v5525_v34, %s5269_s16 }
 0x125   : > { %v886_v63 = vpop.permute.xlu1 %885 }
 0x126   : > { %981 = vst.msk [vmem:[#allocation3 + $0x8] sm:$0xff] %vm979_vm6, %v886_v63  ;;  %v1079_v2 = vpop.permute.xlu0 %1078  ;;  %v1605_v63 = vld [vmem:[#allocation2 + $0xc9] sm:$0xff] }
 0x127   : > { %1174 = vst.msk [vmem:[#allocation3 + $0x8] sm:$0xff] %vm1172_vm7, %v1079_v2  ;;  %v5945_v2 = vld [vmem:[#allocation2 + $0xca] sm:$0xff] }
 0x128   : > { %1367 = vst.msk [vmem:[#allocation3 + $0x8] sm:$0xff] %vm1365_vm8, %v1272_v50 }
 0x129   : > { %1863 = vrot.lane.b32.xlu2 %v1792_v3, %s5270_s17 }
 0x12b   : > { %1861 = vrot.lane.b32.xlu1 %v1791_v4, %s5270_s17  ;;  %v1081_v5 = vpop.permute.xlu2 %1080 }
 0x12c   : > { %899 = vrot.lane.b32.xlu0 %v5652_v39, %s5265_s12 }
 0x12d   : > { %v1270_v56 = vpop.permute.xlu1 %1269 }
 0x12e   : > { %1366 = vst.msk [vmem:[#allocation3] sm:$0xff] %vm1365_vm8, %v1270_v56  ;;  %v1464_v6 = vpop.permute.xlu0 %1463 }
 0x12f   : > { %1560 = vst.msk [vmem:[#allocation3] sm:$0xff] %vm1559_vm9, %v1464_v6 }
 0x130   : > { %1753 = vst.msk [vmem:[#allocation3] sm:$0xff] %vm1752_vm10, %v1657_v32 }
 0x131   : > { %1092 = vrot.lane.b32.xlu2 %v5527_v35, %s5266_s13 }
 0x133   : > { %901 = vrot.lane.b32.xlu1 %v5596_v11, %s5265_s12  ;;  %v1276_v8 = vpop.permute.xlu2 %1275 }
 0x134   : > { %1094 = vrot.lane.b32.xlu0 %v5525_v34, %s5266_s13 }
 0x135   : > { %v1466_v39 = vpop.permute.xlu1 %1465 }
 0x136   : > { %1561 = vst.msk [vmem:[#allocation3 + $0x8] sm:$0xff] %vm1559_vm9, %v1466_v39  ;;  %v1659_v9 = vpop.permute.xlu0 %1658 }
 0x137   : > { %1754 = vst.msk [vmem:[#allocation3 + $0x8] sm:$0xff] %vm1752_vm10, %v1659_v9 }
 0x138   : > { %1947 = vst.msk [vmem:[#allocation3 + $0x8] sm:$0xff] %vm1945_vm11, %v1852_v33 }
 0x139   : > { %1287 = vrot.lane.b32.xlu2 %v1792_v3, %s5267_s14 }
 0x13b   : > { %1285 = vrot.lane.b32.xlu1 %v1791_v4, %s5267_s14  ;;  %v1661_v35 = vpop.permute.xlu2 %1660 }
 0x13c   : > { %1479 = vrot.lane.b32.xlu0 %v5657_v43, %s5268_s15 }
 0x13d   : > { %v1850_v11 = vpop.permute.xlu1 %1849 }
 0x13e   : > { %1946 = vst.msk [vmem:[#allocation3] sm:$0xff] %vm1945_vm11, %v1850_v11  ;;  %v888_v34 = vpop.permute.xlu0 %887 }
 0x13f   : > { %982 = vst.msk [vmem:[#allocation3 + $0x10] sm:$0xff] %vm979_vm6, %v888_v34  ;;  %v1979_v16 = vld [vmem:[#allocation3 + $0x8] sm:$0xff] }
 0x140   : > { %1175 = vst.msk [vmem:[#allocation3 + $0x10] sm:$0xff] %vm1172_vm7, %v1081_v5 }
 0x141   : > { %1672 = vrot.lane.b32.xlu2 %v5531_v36, %s5269_s16 }
 0x143   : > { %1481 = vrot.lane.b32.xlu1 %v5668_v47, %s5268_s15  ;;  %v1856_v7 = vpop.permute.xlu2 %1855 }
 0x144   : > { %1674 = vrot.lane.b32.xlu0 %v5545_v41, %s5269_s16 }
 0x145   : > { %v890_v60 = vpop.permute.xlu1 %889  ;;  %v1978_v12 = vld [vmem:[#allocation3] sm:$0xff] }
 0x146   : > { %983 = vst.msk [vmem:[#allocation3 + $0x18] sm:$0xff] %vm979_vm6, %v890_v60  ;;  %v1083_v13 = vpop.permute.xlu0 %1082  ;;  %v2010_v14 = vpack.c.bf16 %v1979_v16, %v1978_v12  ;;  %v1606_v12 = vld [vmem:[#allocation2 + $0xd9] sm:$0xff] }
 0x147   : > { %1176 = vst.msk [vmem:[#allocation3 + $0x18] sm:$0xff] %vm1172_vm7, %v1083_v13  ;;  %v1607_v13 = vld [vmem:[#allocation2 + $0xe1] sm:$0xff] }
 0x148   : > { %1369 = vst.msk [vmem:[#allocation3 + $0x18] sm:$0xff] %vm1365_vm8, %v1276_v8  ;;  %4851 = vmatmul.msk.bf16.vlgmr.msra.gmra.mxu0 %vm2044_vm12, %v2010_v14 }
 0x149   : > { %1867 = vrot.lane.b32.xlu2 %v1794_v15, %s5270_s17 }
 0x14b   : > { %1865 = vrot.lane.b32.xlu1 %v1793_v17, %s5270_s17  ;;  %v1085_v23 = vpop.permute.xlu2 %1084 }
 0x14c   : > { %710 = vrot.lane.b32.xlu0 %v1791_v4, %s5264_s11 }
 0x14d   : > { %v1274_v25 = vpop.permute.xlu1 %1273 }
 0x14e   : > { %1368 = vst.msk [vmem:[#allocation3 + $0x10] sm:$0xff] %vm1365_vm8, %v1274_v25  ;;  %v1468_v37 = vpop.permute.xlu0 %1467  ;;  %v6001_v25 = vld [vmem:[#allocation2 + $0xda] sm:$0xff] }
 0x14f   : > { %1562 = vst.msk [vmem:[#allocation3 + $0x10] sm:$0xff] %vm1559_vm9, %v1468_v37 }
 0x150   : > { %1755 = vst.msk [vmem:[#allocation3 + $0x10] sm:$0xff] %vm1752_vm10, %v1661_v35 }
 0x151   : > { %903 = vrot.lane.b32.xlu2 %v5657_v43, %s5265_s12 }
 0x153   : > { %712 = vrot.lane.b32.xlu1 %v1792_v3, %s5264_s11  ;;  %v1280_v38 = vpop.permute.xlu2 %1279 }
 0x154   : > { %905 = vrot.lane.b32.xlu0 %v5668_v47, %s5265_s12 }
 0x155   : > { %v1470_v44 = vpop.permute.xlu1 %1469 }
 0x156   : > { %1563 = vst.msk [vmem:[#allocation3 + $0x18] sm:$0xff] %vm1559_vm9, %v1470_v44  ;;  %v1663_v45 = vpop.permute.xlu0 %1662 }
 0x157   : > { %1756 = vst.msk [vmem:[#allocation3 + $0x18] sm:$0xff] %vm1752_vm10, %v1663_v45  ;;  %v6031_v45 = vld [vmem:[%s7623_s2] ss:$0 sm:$0xff] }
 0x158   : > { %1949 = vst.msk [vmem:[#allocation3 + $0x18] sm:$0xff] %vm1945_vm11, %v1856_v7  ;;  %v5271_v7 = vmov -inf  }
 0x159   : > { %1098 = vrot.lane.b32.xlu2 %v5545_v41, %s5266_s13  ;;  %2186 = vst.msk [vmem:[#allocation6] sm:$0xff] %vm270_vm13, %v5271_v7 }
 0x15a   : > { %2187 = vst.msk [vmem:[#allocation6 + $0x8] sm:$0xff] %vm270_vm13, %v5271_v7 }
 0x15b   : > { %1096 = vrot.lane.b32.xlu1 %v5531_v36, %s5266_s13  ;;  %v1665_v43 = vpop.permute.xlu2 %1664  ;;  %2188 = vst.msk [vmem:[#allocation6 + $0x10] sm:$0x3] %vm272_vm14, %v5271_v7 }
 0x15c   : > { %1289 = vrot.lane.b32.xlu0 %v1793_v17, %s5267_s14  ;;  %2193 = vst.msk [vmem:[#allocation6] sm:$0x1] %vm277_vm15, %v5271_v7 }
 0x15d   : > { %v1854_v22 = vpop.permute.xlu1 %1853  ;;  %2194 = vst.msk [vmem:[#allocation6 + $0x18] sm:$0x1] %vm277_vm15, %v5271_v7 }
 0x15e   : > { %1948 = vst.msk [vmem:[#allocation3 + $0x10] sm:$0xff] %vm1945_vm11, %v1854_v22  ;;  %v892_v47 = vpop.permute.xlu0 %891 }
 0x15f   : > { %984 = vst.msk [vmem:[#allocation3 + $0x20] sm:$0xff] %vm979_vm6, %v892_v47  ;;  %v1981_v21 = vld [vmem:[#allocation3 + $0x18] sm:$0xff] }
 0x160   : > { %1177 = vst.msk [vmem:[#allocation3 + $0x20] sm:$0xff] %vm1172_vm7, %v1085_v23  ;;  %v5997_v23 = vld [vmem:[#allocation2 + $0xe2] sm:$0xff] }
 0x161   : > { %1483 = vrot.lane.b32.xlu2 %v5606_v18, %s5268_s15  ;;  %2195 = vst.msk [vmem:[#allocation6 + $0x30] sm:$0x1] %vm277_vm15, %v5271_v7 }
 0x162   : > { %2196 = vst.msk [vmem:[#allocation6 + $0x48] sm:$0x1] %vm277_vm15, %v5271_v7 }
 0x163   : > { %1291 = vrot.lane.b32.xlu1 %v1794_v15, %s5267_s14  ;;  %v1860_v41 = vpop.permute.xlu2 %1859  ;;  %2197 = vst.msk [vmem:[#allocation6 + $0x60] sm:$0x1] %vm277_vm15, %v5271_v7 }
 0x164   : > { %1485 = vrot.lane.b32.xlu0 %v5671_v49, %s5268_s15  ;;  %2198 = vst.msk [vmem:[#allocation6 + $0x78] sm:$0x1] %vm277_vm15, %v5271_v7 }
 0x165   : > { %v894_v36 = vpop.permute.xlu1 %893  ;;  %v1980_v28 = vld [vmem:[#allocation3 + $0x10] sm:$0xff]  ;;  %2199 = vst.msk [vmem:[#allocation6 + $0x90] sm:$0x1] %vm277_vm15, %v5271_v7 }
 0x166   : > { %985 = vst.msk [vmem:[#allocation3 + $0x28] sm:$0xff] %vm979_vm6, %v894_v36  ;;  %v1087_v29 = vpop.permute.xlu0 %1086  ;;  %v2011_v24 = vpack.c.bf16 %v1981_v21, %v1980_v28 }
 0x167   : > { %1178 = vst.msk [vmem:[#allocation3 + $0x28] sm:$0xff] %vm1172_vm7, %v1087_v29 }
 0x168   : > { %1371 = vst.msk [vmem:[#allocation3 + $0x28] sm:$0xff] %vm1365_vm8, %v1280_v38  ;;  %4852 = vmatmul.msk.bf16.gmra.mxu0 %vm2044_vm12, %v2011_v24 }
 0x169   : > { %1678 = vrot.lane.b32.xlu2 %v5549_v42, %s5269_s16  ;;  %2200 = vst.msk [vmem:[#allocation6 + $0xa8] sm:$0x1] %vm277_vm15, %v5271_v7 }
 0x16a   : > { %2201 = vst.msk [vmem:[#allocation6 + $0xc0] sm:$0x1] %vm277_vm15, %v5271_v7 }
 0x16b   : > { %1676 = vrot.lane.b32.xlu1 %v5543_v40, %s5269_s16  ;;  %v1089_v46 = vpop.permute.xlu2 %1088  ;;  %2202 = vst.msk [vmem:[#allocation6 + $0xd8] sm:$0x1] %vm277_vm15, %v5271_v7 }
 0x16c   : > { %1869 = vrot.lane.b32.xlu0 %v5900_v20, %s5270_s17  ;;  %2203 = vst.msk [vmem:[#allocation6 + $0xf0] sm:$0x1] %vm277_vm15, %v5271_v7 }
 0x16d   : > { %v1278_v48 = vpop.permute.xlu1 %1277  ;;  %2204 = vst.msk [vmem:[#allocation6 + $0x108] sm:$0x1] %vm277_vm15, %v5271_v7 }
 0x16e   : > { %1370 = vst.msk [vmem:[#allocation3 + $0x20] sm:$0xff] %vm1365_vm8, %v1278_v48  ;;  %v1472_v10 = vpop.permute.xlu0 %1471 }
 0x16f   : > { %1564 = vst.msk [vmem:[#allocation3 + $0x20] sm:$0xff] %vm1559_vm9, %v1472_v10 }
 0x170   : > { %1757 = vst.msk [vmem:[#allocation3 + $0x20] sm:$0xff] %vm1752_vm10, %v1665_v43 }
 0x171   : > { %714 = vrot.lane.b32.xlu2 %v1793_v17, %s5264_s11  ;;  %2205 = vst.msk [vmem:[#allocation6 + $0x120] sm:$0x1] %vm277_vm15, %v5271_v7 }
 0x172   : > { %2206 = vst.msk [vmem:[#allocation6 + $0x138] sm:$0x1] %vm277_vm15, %v5271_v7 }
 0x173   : > { %1871 = vrot.lane.b32.xlu1 %v1796_v19, %s5270_s17  ;;  %v1284_v50 = vpop.permute.xlu2 %1283  ;;  %2207 = vst.msk [vmem:[#allocation6 + $0x150] sm:$0x1] %vm277_vm15, %v5271_v7 }
 0x174   : > { %716 = vrot.lane.b32.xlu0 %v1794_v15, %s5264_s11  ;;  %2208 = vst.msk [vmem:[#allocation6 + $0x168] sm:$0x1] %vm277_vm15, %v5271_v7 }
 0x175   : > { %v1474_v52 = vpop.permute.xlu1 %1473  ;;  %2209 = vst.msk [vmem:[#allocation6 + $0x180] sm:$0x1] %vm277_vm15, %v5271_v7  ;;  %v6172_v7 = vld [vmem:[#allocation2 + $0x112] sm:$0xff] }
 0x176   : > { %1565 = vst.msk [vmem:[#allocation3 + $0x28] sm:$0xff] %vm1559_vm9, %v1474_v52  ;;  %v1667_v1 = vpop.permute.xlu0 %1666  ;;  %v6103_v52 = vld [vmem:[#allocation2 + $0xf2] sm:$0xff] }
 0x177   : > { %1758 = vst.msk [vmem:[#allocation3 + $0x28] sm:$0xff] %vm1752_vm10, %v1667_v1  ;;  %v1609_v1 = vld [vmem:[#allocation2 + $0xf9] sm:$0xff] }
 0x178   : > { %1951 = vst.msk [vmem:[#allocation3 + $0x28] sm:$0xff] %vm1945_vm11, %v1860_v41 }
 0x179   : > { %909 = vrot.lane.b32.xlu2 %v5671_v49, %s5265_s12 }
 0x17b   : > { %907 = vrot.lane.b32.xlu1 %v5606_v18, %s5265_s12  ;;  %v1669_v54 = vpop.permute.xlu2 %1668 }
 0x17c   : > { %1100 = vrot.lane.b32.xlu0 %v5543_v40, %s5266_s13 }
 0x17d   : > { %v1858_v55 = vpop.permute.xlu1 %1857 }
 0x17e   : > { %1950 = vst.msk [vmem:[#allocation3 + $0x20] sm:$0xff] %vm1945_vm11, %v1858_v55  ;;  %v896_v27 = vpop.permute.xlu0 %895 }
 0x17f   : > { %986 = vst.msk [vmem:[#allocation3 + $0x30] sm:$0xff] %vm979_vm6, %v896_v27  ;;  %v1983_v18 = vld [vmem:[#allocation3 + $0x28] sm:$0xff] }
 0x180   : > { %1179 = vst.msk [vmem:[#allocation3 + $0x30] sm:$0xff] %vm1172_vm7, %v1089_v46  ;;  %v6123_v27 = vld [vmem:[#allocation2 + $0xfa] sm:$0xff] }
 0x181   : > { %1293 = vrot.lane.b32.xlu2 %v5900_v20, %s5267_s14 }
 0x183   : > { %1102 = vrot.lane.b32.xlu1 %v5549_v42, %s5266_s13  ;;  %v1864_v49 = vpop.permute.xlu2 %1863  ;;  %v1604_v42 = vld [vmem:[#allocation2 + $0xc1] sm:$0xff] }
 0x184   : > { %1295 = vrot.lane.b32.xlu0 %v1796_v19, %s5267_s14 }
 0x185   : > { %v898_v32 = vpop.permute.xlu1 %897  ;;  %v1982_v40 = vld [vmem:[#allocation3 + $0x20] sm:$0xff] }
 0x186   : > { %987 = vst.msk [vmem:[#allocation3 + $0x38] sm:$0xff] %vm979_vm6, %v898_v32  ;;  %v1091_v30 = vpop.permute.xlu0 %1090  ;;  %v2012_v57 = vpack.c.bf16 %v1983_v18, %v1982_v40 }
 0x187   : > { %1180 = vst.msk [vmem:[#allocation3 + $0x38] sm:$0xff] %vm1172_vm7, %v1091_v30  ;;  %v838_v30 = vld [vmem:[#allocation2 + $0xf8] sm:$0xff] }
 0x188   : > { %1373 = vst.msk [vmem:[#allocation3 + $0x38] sm:$0xff] %vm1365_vm8, %v1284_v50  ;;  %4853 = vmatmul.msk.bf16.gmra.mxu0 %vm2044_vm12, %v2012_v57  ;;  %v1608_v50 = vld [vmem:[#allocation2 + $0xf1] sm:$0xff] }
 0x189   : > { %1489 = vrot.lane.b32.xlu2 %v5627_v26, %s5268_s15 }
 0x18b   : > { %1487 = vrot.lane.b32.xlu1 %v5684_v51, %s5268_s15  ;;  %v1093_v59 = vpop.permute.xlu2 %1092 }
 0x18c   : > { %1680 = vrot.lane.b32.xlu0 %v1604_v42, %s5269_s16 }
 0x18d   : > { %v1282_v31 = vpop.permute.xlu1 %1281 }
 0x18e   : > { %1372 = vst.msk [vmem:[#allocation3 + $0x30] sm:$0xff] %vm1365_vm8, %v1282_v31  ;;  %v1476_v33 = vpop.permute.xlu0 %1475 }
 0x18f   : > { %1566 = vst.msk [vmem:[#allocation3 + $0x30] sm:$0xff] %vm1559_vm9, %v1476_v33  ;;  %v2262_v33 = vld [vmem:[#allocation6] ss:$2 sm:$0xff] }
 0x190   : > { %1759 = vst.msk [vmem:[#allocation3 + $0x30] sm:$0xff] %vm1752_vm10, %v1669_v54 }
 0x191   : > { %1873 = vrot.lane.b32.xlu2 %v5939_v62, %s5270_s17 }
 0x193   : > { %1682 = vrot.lane.b32.xlu1 %v1605_v63, %s5269_s16  ;;  %v1288_v3 = vpop.permute.xlu2 %1287 }
 0x194   : > { %1875 = vrot.lane.b32.xlu0 %v5945_v2, %s5270_s17 }
 0x195   : > { %v1478_v4 = vpop.permute.xlu1 %1477 }
 0x196   : > { %1567 = vst.msk [vmem:[#allocation3 + $0x38] sm:$0xff] %vm1559_vm9, %v1478_v4  ;;  %v1671_v5 = vpop.permute.xlu0 %1670  ;;  %v6154_v4 = vld [vmem:[#allocation2 + $0x109] sm:$0xff] }
 0x197   : > { %1760 = vst.msk [vmem:[#allocation3 + $0x38] sm:$0xff] %vm1752_vm10, %v1671_v5 }
 0x198   : > { %1953 = vst.msk [vmem:[#allocation3 + $0x38] sm:$0xff] %vm1945_vm11, %v1864_v49 }
 0x199   : > { %720 = vrot.lane.b32.xlu2 %v1796_v19, %s5264_s11 }
 0x19b   : > { %718 = vrot.lane.b32.xlu1 %v5900_v20, %s5264_s11  ;;  %v1673_v56 = vpop.permute.xlu2 %1672 }
 0x19c   : > { %911 = vrot.lane.b32.xlu0 %v5684_v51, %s5265_s12 }
 0x19d   : > { %v1862_v6 = vpop.permute.xlu1 %1861 }
 0x19e   : > { %1952 = vst.msk [vmem:[#allocation3 + $0x30] sm:$0xff] %vm1945_vm11, %v1862_v6  ;;  %v900_v8 = vpop.permute.xlu0 %899 }
 0x19f   : > { %988 = vst.msk [vmem:[#allocation3 + $0x40] sm:$0xff] %vm979_vm6, %v900_v8  ;;  %v1985_v9 = vld [vmem:[#allocation3 + $0x38] sm:$0xff] }
 0x1a0   : > { %1181 = vst.msk [vmem:[#allocation3 + $0x40] sm:$0xff] %vm1172_vm7, %v1093_v59 }
 0x1a1   : > { %1104 = vrot.lane.b32.xlu2 %v1604_v42, %s5266_s13 }
 0x1a3   : > { %913 = vrot.lane.b32.xlu1 %v5627_v26, %s5265_s12  ;;  %v1868_v39 = vpop.permute.xlu2 %1867 }
 0x1a4   : > { %1106 = vrot.lane.b32.xlu0 %v1605_v63, %s5266_s13 }
 0x1a5   : > { %v902_v35 = vpop.permute.xlu1 %901  ;;  %v1984_v51 = vld [vmem:[#allocation3 + $0x30] sm:$0xff] }
 0x1a6   : > { %989 = vst.msk [vmem:[#allocation3 + $0x48] sm:$0xff] %vm979_vm6, %v902_v35  ;;  %v1095_v11 = vpop.permute.xlu0 %1094  ;;  %v2013_v34 = vpack.c.bf16 %v1985_v9, %v1984_v51  ;;  %v1418_v9 = vld [vmem:[#allocation2 + $0x110] sm:$0xff] }
 0x1a7   : > { %1182 = vst.msk [vmem:[#allocation3 + $0x48] sm:$0xff] %vm1172_vm7, %v1095_v11 }
 0x1a8   : > { %1375 = vst.msk [vmem:[#allocation3 + $0x48] sm:$0xff] %vm1365_vm8, %v1288_v3  ;;  %4854 = vmatmul.msk.bf16.gmra.mxu0 %vm2044_vm12, %v2013_v34  ;;  %v1417_v3 = vld [vmem:[#allocation2 + $0x108] sm:$0xff] }
 0x1a9   : > { %1299 = vrot.lane.b32.xlu2 %v5945_v2, %s5267_s14 }
 0x1ab   : > { %1297 = vrot.lane.b32.xlu1 %v5939_v62, %s5267_s14  ;;  %v904_v26 = vpop.permute.xlu2 %903 }
 0x1ac   : > { %1491 = vrot.lane.b32.xlu0 %v5687_v53, %s5268_s15 }
 0x1ad   : > { %v1286_v16 = vpop.permute.xlu1 %1285 }
 0x1ae   : > { %1374 = vst.msk [vmem:[#allocation3 + $0x40] sm:$0xff] %vm1365_vm8, %v1286_v16  ;;  %v1480_v60 = vpop.permute.xlu0 %1479 }
 0x1af   : > { %1568 = vst.msk [vmem:[#allocation3 + $0x40] sm:$0xff] %vm1559_vm9, %v1480_v60 }
 0x1b0   : > { %1761 = vst.msk [vmem:[#allocation3 + $0x40] sm:$0xff] %vm1752_vm10, %v1673_v56  ;;  %v2302_v56 = vld [vmem:[#allocation6 + $0x2] ss:$2 sm:$0xff] }
 0x1b1   : > { %1684 = vrot.lane.b32.xlu2 %v1606_v12, %s5269_s16 }
 0x1b3   : > { %1493 = vrot.lane.b32.xlu1 %v5702_v58, %s5268_s15  ;;  %v1099_v14 = vpop.permute.xlu2 %1098 }
 0x1b4   : > { %1686 = vrot.lane.b32.xlu0 %v1607_v13, %s5269_s16 }
 0x1b5   : > { %v1482_v15 = vpop.permute.xlu1 %1481 }
 0x1b6   : > { %1569 = vst.msk [vmem:[#allocation3 + $0x48] sm:$0xff] %vm1559_vm9, %v1482_v15  ;;  %v1675_v17 = vpop.permute.xlu0 %1674 }
 0x1b7   : > { %1762 = vst.msk [vmem:[#allocation3 + $0x48] sm:$0xff] %vm1752_vm10, %v1675_v17 }
 0x1b8   : > { %1955 = vst.msk [vmem:[#allocation3 + $0x48] sm:$0xff] %vm1945_vm11, %v1868_v39 }
 0x1b9   : > { %1879 = vrot.lane.b32.xlu2 %v5997_v23, %s5270_s17 }
 0x1bb   : > { %1877 = vrot.lane.b32.xlu1 %v6001_v25, %s5270_s17  ;;  %v6011_v37 = vpop.permute.xlu2 %1483 }
 0x1bc   : > { %722 = vrot.lane.b32.xlu0 %v5939_v62, %s5264_s11  ;;  %v2278_v62 = vld [vmem:[#allocation6 + $0x1] ss:$2 sm:$0xff] }
 0x1bd   : > { %v1866_v38 = vpop.permute.xlu1 %1865  ;;  %v2293_v5 = vmax.f32 %v2262_v33, %v2278_v62  ;;  %v6246_v33 = vld [vmem:[#allocation2 + $0x121] sm:$0xff] }
 0x1be   : > { %1954 = vst.msk [vmem:[#allocation3 + $0x40] sm:$0xff] %vm1945_vm11, %v1866_v38  ;;  %v711_v44 = vpop.permute.xlu0 %710 }
 0x1bf   : > { %797 = vst.msk [vmem:[#allocation3 + $0x50] sm:$0xff] %vm786_vm4, %v711_v44  ;;  %v1987_v22 = vld [vmem:[#allocation3 + $0x48] sm:$0xff]  ;;  %v2317_v39 = vmax.f32 %v2293_v5, %v2302_v56 }
 0x1c0   : > { %990 = vst.msk [vmem:[#allocation3 + $0x50] sm:$0xff] %vm979_vm6, %v904_v26  ;;  %v1611_v26 = vld [vmem:[#allocation2 + $0x111] sm:$0xff] }
 0x1c1   : > { %915 = vrot.lane.b32.xlu2 %v5687_v53, %s5265_s12 }
 0x1c3   : > { %724 = vrot.lane.b32.xlu1 %v5945_v2, %s5264_s11  ;;  %v6037_v43 = vpop.permute.xlu2 %1678 }
 0x1c4   : > { %917 = vrot.lane.b32.xlu0 %v5702_v58, %s5265_s12 }
 0x1c5   : > { %v2106_v53 = vpop.f32.mrf.mxu0  ;;  %v713_v47 = vpop.permute.xlu1 %712  ;;  %v1986_v41 = vld [vmem:[#allocation3 + $0x40] sm:$0xff] }
 0x1c6   : > { %v2107_v21 = vadd.f32 %v6031_v45, %v2106_v53  ;;  %798 = vst.msk [vmem:[#allocation3 + $0x58] sm:$0xff] %vm786_vm4, %v713_v47  ;;  %v906_v36 = vpop.permute.xlu0 %905  ;;  %v2014_v28 = vpack.c.bf16 %v1987_v22, %v1986_v41 }
 0x1c7   : > { %991 = vst.msk [vmem:[#allocation3 + $0x58] sm:$0xff] %vm979_vm6, %v906_v36 }
 0x1c8   : > { %2230 = vst.msk [vmem:[#allocation6 + $0x19] sm:$0xff] %vm270_vm13, %v2107_v21  ;;  %4855 = vmatmul.msk.bf16.gmra.mxu0 %vm2044_vm12, %v2014_v28 }
 0x1c9   : > { %1184 = vst.msk [vmem:[#allocation3 + $0x58] sm:$0xff] %vm1172_vm7, %v1099_v14  ;;  %1110 = vrot.lane.b32.xlu2 %v1607_v13, %s5266_s13 }
 0x1cb   : > { %1108 = vrot.lane.b32.xlu1 %v1606_v12, %s5266_s13  ;;  %v715_v58 = vpop.permute.xlu2 %714 }
 0x1cc   : > { %799 = vst.msk [vmem:[#allocation3 + $0x60] sm:$0xff] %vm786_vm4, %v715_v58  ;;  %1301 = vrot.lane.b32.xlu0 %v6001_v25, %s5267_s14 }
 0x1cd   : > { %v2108_v29 = vpop.f32.mrf.mxu0  ;;  %v1097_v20 = vpop.permute.xlu1 %1096 }
 0x1ce   : > { %v2109_v24 = vadd.f32 %v6031_v45, %v2108_v29  ;;  %v1290_v46 = vpop.permute.xlu0 %1289  ;;  %1183 = vst.msk [vmem:[#allocation3 + $0x50] sm:$0xff] %vm1172_vm7, %v1097_v20 }
 0x1cf   : > { %1376 = vst.msk [vmem:[#allocation3 + $0x50] sm:$0xff] %vm1365_vm8, %v1290_v46 }
 0x1d0   : > { %2231 = vst.msk [vmem:[#allocation6 + $0x21] sm:$0xff] %vm270_vm13, %v2109_v24 }
 0x1d1   : > { %1570 = vst.msk [vmem:[#allocation3 + $0x50] sm:$0xff] %vm1559_vm9, %v6011_v37 }
 0x1d3   : > { %1303 = vrot.lane.b32.xlu1 %v5997_v23, %s5267_s14  ;;  %v6094_v48 = vpop.permute.xlu2 %909 }
 0x1d4   : > { %1497 = vrot.lane.b32.xlu0 %v5705_v61, %s5268_s15  ;;  %v1415_v61 = vld [vmem:[#allocation2 + $0xf0] sm:$0xff] }
 0x1d5   : > { %v1292_v10 = vpop.permute.xlu1 %1291  ;;  %1495 = vrot.lane.b32.xlu2 %v1415_v61, %s5268_s15 }
 0x1d6   : > { %v1486_v19 = vpop.permute.xlu0 %1485  ;;  %1377 = vst.msk [vmem:[#allocation3 + $0x58] sm:$0xff] %vm1365_vm8, %v1292_v10 }
 0x1d7   : > { %1571 = vst.msk [vmem:[#allocation3 + $0x58] sm:$0xff] %vm1559_vm9, %v1486_v19  ;;  %v2325_v35 = vld [vmem:[#allocation6 + $0x18] ss:$2 sm:$0xff]  ;;  %v2349_v13 = vld [vmem:[#allocation6 + $0x19] ss:$2 sm:$0xff] }
 0x1d8   : > { %1764 = vst.msk [vmem:[#allocation3 + $0x58] sm:$0xff] %vm1752_vm10, %v6037_v43  ;;  %v2340_v16 = vmax.f32 %v2317_v39, %v2325_v35  ;;  %v2373_v44 = vld [vmem:[#allocation6 + $0x1a] ss:$2 sm:$0xff] }
 0x1d9   : > { %v6263_v35 = vld [vmem:[#allocation2 + $0x12a] sm:$0xff] }
 0x1da   : > { %v2364_v17 = vmax.f32 %v2340_v16, %v2349_v13  ;;  %v6271_v16 = vld [vmem:[#allocation2 + $0x158] sm:$0xff] }
 0x1db   : > { %1688 = vrot.lane.b32.xlu1 %v1608_v50, %s5269_s16  ;;  %v6118_v54 = vpop.permute.xlu2 %1293 }
 0x1dc   : > { %1881 = vrot.lane.b32.xlu0 %v6103_v52, %s5270_s17  ;;  %v2388_v43 = vmax.f32 %v2364_v17, %v2373_v44  ;;  %v6278_v17 = vld [vmem:[#allocation2 + $0x150] sm:$0xff] }
 0x1dd   : > { %v1677_v55 = vpop.permute.xlu1 %1676  ;;  %1690 = vrot.lane.b32.xlu2 %v1609_v1, %s5269_s16 }
 0x1de   : > { %v1870_v49 = vpop.permute.xlu0 %1869  ;;  %1763 = vst.msk [vmem:[#allocation3 + $0x50] sm:$0xff] %vm1752_vm10, %v1677_v55 }
 0x1df   : > { %1956 = vst.msk [vmem:[#allocation3 + $0x50] sm:$0xff] %vm1945_vm11, %v1870_v49 }
 0x1e3   : > { %1883 = vrot.lane.b32.xlu1 %v6123_v27, %s5270_s17  ;;  %v6131_v18 = vpop.permute.xlu2 %1489 }
 0x1e4   : > { %728 = vrot.lane.b32.xlu0 %v5997_v23, %s5264_s11 }
 0x1e5   : > { %v1872_v32 = vpop.permute.xlu1 %1871  ;;  %726 = vrot.lane.b32.xlu2 %v6001_v25, %s5264_s11  ;;  %v2111_v57 = vpop.f32.mrf.mxu0  ;;  %v6183_v25 = vld [vmem:[#allocation2 + $0x10a] sm:$0xff] }
 0x1e6   : > { %v717_v40 = vpop.permute.xlu0 %716  ;;  %v2112_v6 = vadd.f32 %v6031_v45, %v2111_v57  ;;  %1957 = vst.msk [vmem:[#allocation3 + $0x58] sm:$0xff] %vm1945_vm11, %v1872_v32  ;;  %v1988_v14 = vld [vmem:[#allocation3 + $0x50] sm:$0xff]  ;;  %v6235_v32 = vld [vmem:[#allocation2 + $0x128] sm:$0xff] }
 0x1e7   : > { %800 = vst.msk [vmem:[#allocation3 + $0x68] sm:$0xff] %vm786_vm4, %v717_v40  ;;  %v6237_v40 = vld [vmem:[#allocation2 + $0x129] sm:$0xff] }
 0x1e8   : > { %2232 = vst.msk [vmem:[#allocation6 + $0x31] sm:$0xff] %vm270_vm13, %v2112_v6 }
 0x1e9   : > { %993 = vst.msk [vmem:[#allocation3 + $0x68] sm:$0xff] %vm979_vm6, %v6094_v48 }
 0x1eb   : > { %919 = vrot.lane.b32.xlu1 %v1415_v61, %s5265_s12  ;;  %v6137_v42 = vpop.permute.xlu2 %1873 }
 0x1ec   : > { %1112 = vrot.lane.b32.xlu0 %v1608_v50, %s5266_s13 }
 0x1ed   : > { %v908_v59 = vpop.permute.xlu1 %907  ;;  %921 = vrot.lane.b32.xlu2 %v838_v30, %s5265_s12  ;;  %v2113_v0 = vpop.f32.mrf.mxu0  ;;  %v1989_v15 = vld [vmem:[#allocation3 + $0x58] sm:$0xff] }
 0x1ee   : > { %v1101_v31 = vpop.permute.xlu0 %1100  ;;  %v2114_v51 = vadd.f32 %v6031_v45, %v2113_v0  ;;  %992 = vst.msk [vmem:[#allocation3 + $0x60] sm:$0xff] %vm979_vm6, %v908_v59  ;;  %v2015_v23 = vpack.c.bf16 %v1989_v15, %v1988_v14 }
 0x1ef   : > { %1185 = vst.msk [vmem:[#allocation3 + $0x60] sm:$0xff] %vm1172_vm7, %v1101_v31 }
 0x1f0   : > { %2233 = vst.msk [vmem:[#allocation6 + $0x39] sm:$0xff] %vm270_vm13, %v2114_v51  ;;  %4856 = vmatmul.msk.bf16.gmra.mxu0 %vm2044_vm12, %v2015_v23 }
 0x1f1   : > { %1378 = vst.msk [vmem:[#allocation3 + $0x60] sm:$0xff] %vm1365_vm8, %v6118_v54  ;;  %v6219_v54 = vld [vmem:[#allocation2 + $0x120] sm:$0xff] }
 0x1f3   : > { %1114 = vrot.lane.b32.xlu1 %v1609_v1, %s5266_s13  ;;  %v721_v63 = vpop.permute.xlu2 %720 }
 0x1f4   : > { %1307 = vrot.lane.b32.xlu0 %v6123_v27, %s5267_s14  ;;  %802 = vst.msk [vmem:[#allocation3 + $0x78] sm:$0xff] %vm786_vm4, %v721_v63 }
 0x1f5   : > { %v1103_v2 = vpop.permute.xlu1 %1102  ;;  %1305 = vrot.lane.b32.xlu2 %v6103_v52, %s5267_s14 }
 0x1f6   : > { %v1296_v8 = vpop.permute.xlu0 %1295  ;;  %1186 = vst.msk [vmem:[#allocation3 + $0x68] sm:$0xff] %vm1172_vm7, %v1103_v2 }
 0x1f7   : > { %1379 = vst.msk [vmem:[#allocation3 + $0x68] sm:$0xff] %vm1365_vm8, %v1296_v8  ;;  %v2397_v22 = vld [vmem:[#allocation6 + $0x30] ss:$2 sm:$0xff]  ;;  %v2421_v36 = vld [vmem:[#allocation6 + $0x31] ss:$2 sm:$0xff] }
 0x1f8   : > { %1573 = vst.msk [vmem:[#allocation3 + $0x68] sm:$0xff] %vm1559_vm9, %v6131_v18  ;;  %v2412_v47 = vmax.f32 %v2388_v43, %v2397_v22  ;;  %v2445_v58 = vld [vmem:[#allocation6 + $0x32] ss:$2 sm:$0xff]  ;;  %v2280_v31 = vld [vmem:[#allocation6 + $0x31] ss:$2 sm:$0xff] }
 0x1f9   : > { %v2264_v59 = vld [vmem:[#allocation6 + $0x30] ss:$2 sm:$0xff] }
 0x1fa   : > { %v2436_v28 = vmax.f32 %v2412_v47, %v2421_v36  ;;  %v2294_v62 = vmax.f32 %v2264_v59, %v2280_v31  ;;  %v2304_v0 = vld [vmem:[#allocation6 + $0x32] ss:$2 sm:$0xff]  ;;  %v6284_v47 = vld [vmem:[#allocation2 + $0x151] sm:$0xff] }
 0x1fb   : > { %1499 = vrot.lane.b32.xlu1 %v1417_v3, %s5268_s15  ;;  %v1105_v11 = vpop.permute.xlu2 %1104 }
 0x1fc   : > { %1692 = vrot.lane.b32.xlu0 %v6154_v4, %s5269_s16  ;;  %v6202_v24 = vmax.f32 %v2436_v28, %v2445_v58  ;;  %v2318_v8 = vmax.f32 %v2294_v62, %v2304_v0 }
 0x1fd   : > { %v1488_v34 = vpop.permute.xlu1 %1487  ;;  %1501 = vrot.lane.b32.xlu2 %v1418_v9, %s5268_s15 }
 0x1fe   : > { %v1681_v12 = vpop.permute.xlu0 %1680  ;;  %1572 = vst.msk [vmem:[#allocation3 + $0x60] sm:$0xff] %vm1559_vm9, %v1488_v34  ;;  %v2468_v61 = vmax.f32 %v6202_v24, 0.0 }
 0x1ff   : > { %1765 = vst.msk [vmem:[#allocation3 + $0x60] sm:$0xff] %vm1752_vm10, %v1681_v12 }
 0x200   : > { %1958 = vst.msk [vmem:[#allocation3 + $0x60] sm:$0xff] %vm1945_vm11, %v6137_v42 }
 0x201   : > { %2477 = vst.msk [vmem:[#allocation4 + $0x11] sm:$0xff] %vm270_vm13, %v2468_v61  ;;  %v6302_v61 = vld [vmem:[#allocation2 + $0x15a] sm:$0xff] }
 0x203   : > { %1694 = vrot.lane.b32.xlu1 %v1611_v26, %s5269_s16  ;;  %v1300_v37 = vpop.permute.xlu2 %1299 }
 0x204   : > { %1887 = vrot.lane.b32.xlu0 %v6172_v7, %s5270_s17 }
 0x205   : > { %v2116_v60 = vpop.f32.mrf.mxu0  ;;  %v1683_v38 = vpop.permute.xlu1 %1682  ;;  %1885 = vrot.lane.b32.xlu2 %v6183_v25, %s5270_s17 }
 0x206   : > { %v1876_v53 = vpop.permute.xlu0 %1875  ;;  %v2117_v41 = vadd.f32 %v6031_v45, %v2116_v60  ;;  %1766 = vst.msk [vmem:[#allocation3 + $0x68] sm:$0xff] %vm1752_vm10, %v1683_v38 }
 0x207   : > { %1959 = vst.msk [vmem:[#allocation3 + $0x68] sm:$0xff] %vm1945_vm11, %v1876_v53  ;;  %v1990_v10 = vld [vmem:[#allocation3 + $0x60] sm:$0xff] }
 0x208   : > { %2234 = vst.msk [vmem:[#allocation6 + $0x49] sm:$0xff] %vm270_vm13, %v2117_v41 }
 0x20b   : > { %730 = vrot.lane.b32.xlu1 %v6103_v52, %s5264_s11  ;;  %v1685_v20 = vpop.permute.xlu2 %1684 }
 0x20c   : > { %923 = vrot.lane.b32.xlu0 %v1417_v3, %s5265_s12  ;;  %v6252_v3 = vld [vmem:[#allocation2 + $0x122] sm:$0xff] }
 0x20d   : > { %v2118_v21 = vpop.f32.mrf.mxu0  ;;  %v719_v46 = vpop.permute.xlu1 %718  ;;  %732 = vrot.lane.b32.xlu2 %v6123_v27, %s5264_s11  ;;  %v6228_v27 = vld [vmem:[#allocation4 + $0x10] sm:$0xff] }
 0x20e   : > { %v2119_v29 = vadd.f32 %v6031_v45, %v2118_v21  ;;  %801 = vst.msk [vmem:[#allocation3 + $0x70] sm:$0xff] %vm786_vm4, %v719_v46  ;;  %v912_v48 = vpop.permute.xlu0 %911  ;;  %v1991_v19 = vld [vmem:[#allocation3 + $0x68] sm:$0xff] }
 0x20f   : > { %994 = vst.msk [vmem:[#allocation3 + $0x70] sm:$0xff] %vm979_vm6, %v912_v48  ;;  %v2016_v1 = vpack.c.bf16 %v1991_v19, %v1990_v10  ;;  %v6313_v19 = vld [vmem:[#allocation2 + $0x152] sm:$0xff] }
 0x210   : > { %2235 = vst.msk [vmem:[#allocation6 + $0x51] sm:$0xff] %vm270_vm13, %v2119_v29  ;;  %v6296_v29 = vld [vmem:[#allocation2 + $0x159] sm:$0xff] }
 0x211   : > { %1187 = vst.msk [vmem:[#allocation3 + $0x70] sm:$0xff] %vm1172_vm7, %v1105_v11  ;;  %4857 = vmatmul.msk.bf16.gmra.mxu0 %vm2044_vm12, %v2016_v1  ;;  %v6318_v1 = vld [vmem:[#allocation2 + $0x168] sm:$0xff] }
 0x212   : > { %2513 = vst.msk [vmem:[#allocation5 + $0x10] sm:$0xff] %vm270_vm13, %v6228_v27 }
 0x213   : > { %925 = vrot.lane.b32.xlu1 %v1418_v9, %s5265_s12  ;;  %v1880_v50 = vpop.permute.xlu2 %1879 }
 0x214   : > { %1118 = vrot.lane.b32.xlu0 %v1611_v26, %s5266_s13  ;;  %v6269_v26 = vld [vmem:[#allocation2 + $0x142] sm:$0xff] }
 0x215   : > { %v914_v52 = vpop.permute.xlu1 %913  ;;  %1116 = vrot.lane.b32.xlu2 %v6154_v4, %s5266_s13  ;;  %v6254_v4 = vld [vmem:[#allocation2 + $0x13a] sm:$0xff] }
 0x216   : > { %995 = vst.msk [vmem:[#allocation3 + $0x78] sm:$0xff] %vm979_vm6, %v914_v52  ;;  %v1107_v55 = vpop.permute.xlu0 %1106 }
 0x217   : > { %1188 = vst.msk [vmem:[#allocation3 + $0x78] sm:$0xff] %vm1172_vm7, %v1107_v55  ;;  %v2327_v56 = vld [vmem:[#allocation6 + $0x48] ss:$2 sm:$0xff]  ;;  %v2351_v51 = vld [vmem:[#allocation6 + $0x49] ss:$2 sm:$0xff] }
 0x218   : > { %1381 = vst.msk [vmem:[#allocation3 + $0x78] sm:$0xff] %vm1365_vm8, %v1300_v37  ;;  %v2341_v9 = vmax.f32 %v2318_v8, %v2327_v56  ;;  %v2375_v13 = vld [vmem:[#allocation6 + $0x4a] ss:$2 sm:$0xff]  ;;  %v6359_v56 = vld [vmem:[#allocation2 + $0x172] sm:$0xff] }
 0x21a   : > { %v2365_v34 = vmax.f32 %v2341_v9, %v2351_v51  ;;  %v6373_v51 = vld [vmem:[#allocation2 + $0x138] sm:$0xff] }
 0x21b   : > { %1309 = vrot.lane.b32.xlu1 %v6183_v25, %s5267_s14  ;;  %v916_v49 = vpop.permute.xlu2 %915 }
 0x21c   : > { %1503 = vrot.lane.b32.xlu0 %v6219_v54, %s5268_s15  ;;  %v2389_v14 = vmax.f32 %v2365_v34, %v2375_v13 }
 0x21d   : > { %v1298_v18 = vpop.permute.xlu1 %1297  ;;  %1311 = vrot.lane.b32.xlu2 %v6172_v7, %s5267_s14 }
 0x21e   : > { %1380 = vst.msk [vmem:[#allocation3 + $0x70] sm:$0xff] %vm1365_vm8, %v1298_v18  ;;  %v1492_v42 = vpop.permute.xlu0 %1491 }
 0x21f   : > { %1574 = vst.msk [vmem:[#allocation3 + $0x70] sm:$0xff] %vm1559_vm9, %v1492_v42 }
 0x220   : > { %1767 = vst.msk [vmem:[#allocation3 + $0x70] sm:$0xff] %vm1752_vm10, %v1685_v20 }
 0x223   : > { %1505 = vrot.lane.b32.xlu1 %v6235_v32, %s5268_s15  ;;  %v1111_v2 = vpop.permute.xlu2 %1110 }
 0x224   : > { %1698 = vrot.lane.b32.xlu0 %v6237_v40, %s5269_s16 }
 0x225   : > { %v2121_v30 = vpop.f32.mrf.mxu0  ;;  %v1494_v63 = vpop.permute.xlu1 %1493  ;;  %1696 = vrot.lane.b32.xlu2 %v6246_v33, %s5269_s16 }
 0x226   : > { %v2122_v57 = vadd.f32 %v6031_v45, %v2121_v30  ;;  %1575 = vst.msk [vmem:[#allocation3 + $0x78] sm:$0xff] %vm1559_vm9, %v1494_v63  ;;  %v1687_v39 = vpop.permute.xlu0 %1686 }
 0x227   : > { %1768 = vst.msk [vmem:[#allocation3 + $0x78] sm:$0xff] %vm1752_vm10, %v1687_v39  ;;  %v6368_v39 = vld [vmem:[#allocation2 + $0x16a] sm:$0xff] }
 0x228   : > { %2236 = vst.msk [vmem:[#allocation6 + $0x61] sm:$0xff] %vm270_vm13, %v2122_v57 }
 0x229   : > { %1961 = vst.msk [vmem:[#allocation3 + $0x78] sm:$0xff] %vm1945_vm11, %v1880_v50 }
 0x22b   : > { %1889 = vrot.lane.b32.xlu1 %v6252_v3, %s5270_s17 }
 0x22c   : > { %742 = vrot.lane.b32.xlu0 %v6254_v4, %s5264_s11 }
 0x22d   : > { %v2123_v5 = vpop.f32.mrf.mxu0  ;;  %v1878_v11 = vpop.permute.xlu1 %1877  ;;  %1891 = vrot.lane.b32.xlu2 %v6263_v35, %s5270_s17 }
 0x22e   : > { %v2124_v6 = vadd.f32 %v6031_v45, %v2123_v5  ;;  %1960 = vst.msk [vmem:[#allocation3 + $0x70] sm:$0xff] %vm1945_vm11, %v1878_v11  ;;  %v723_v12 = vpop.permute.xlu0 %722  ;;  %v6375_v11 = vld [vmem:[#allocation2 + $0x139] sm:$0xff] }
 0x22f   : > { %v1496_v60 = vpop.permute.xlu2 %1495  ;;  %803 = vst.msk [vmem:[#allocation3 + $0x80] sm:$0xff] %vm786_vm4, %v723_v12  ;;  %v6384_v12 = vld [vmem:[#allocation2 + $0x140] sm:$0xff] }
 0x230   : > { %2237 = vst.msk [vmem:[#allocation6 + $0x69] sm:$0xff] %vm270_vm13, %v2124_v6  ;;  %v1993_v23 = vld [vmem:[#allocation3 + $0x78] sm:$0xff] }
 0x231   : > { %996 = vst.msk [vmem:[#allocation3 + $0x80] sm:$0xff] %vm979_vm6, %v916_v49 }
 0x233   : > { %744 = vrot.lane.b32.xlu1 %v6269_v26, %s5264_s11 }
 0x234   : > { %937 = vrot.lane.b32.xlu0 %v6271_v16, %s5265_s12 }
 0x235   : > { %v725_v44 = vpop.permute.xlu1 %724  ;;  %v1992_v43 = vld [vmem:[#allocation3 + $0x70] sm:$0xff]  ;;  %935 = vrot.lane.b32.xlu2 %v6278_v17, %s5265_s12 }
 0x236   : > { %804 = vst.msk [vmem:[#allocation3 + $0x88] sm:$0xff] %vm786_vm4, %v725_v44  ;;  %v2017_v53 = vpack.c.bf16 %v1993_v23, %v1992_v43  ;;  %v918_v28 = vpop.permute.xlu0 %917 }
 0x237   : > { %v2399_v15 = vld [vmem:[#allocation6 + $0x60] ss:$2 sm:$0xff]  ;;  %v2423_v38 = vld [vmem:[#allocation6 + $0x61] ss:$2 sm:$0xff]  ;;  %v1691_v36 = vpop.permute.xlu2 %1690  ;;  %997 = vst.msk [vmem:[#allocation3 + $0x88] sm:$0xff] %vm979_vm6, %v918_v28 }
 0x238   : > { %v2413_v37 = vmax.f32 %v2389_v14, %v2399_v15  ;;  %v2447_v41 = vld [vmem:[#allocation6 + $0x62] ss:$2 sm:$0xff]  ;;  %4858 = vmatmul.msk.bf16.gmra.mxu0 %vm2044_vm12, %v2017_v53  ;;  %1190 = vst.msk [vmem:[#allocation3 + $0x88] sm:$0xff] %vm1172_vm7, %v1111_v2  ;;  %v6389_v14 = vld [vmem:[#allocation2 + $0x141] sm:$0xff] }
 0x239   : > { %v2266_v28 = vld [vmem:[#allocation6 + $0x60] ss:$2 sm:$0xff] }
 0x23a   : > { %v2437_v22 = vmax.f32 %v2413_v37, %v2423_v38 }
 0x23b   : > { %1128 = vrot.lane.b32.xlu1 %v6284_v47, %s5266_s13 }
 0x23c   : > { %v6286_v21 = vmax.f32 %v2437_v22, %v2447_v41  ;;  %734 = vrot.lane.b32.xlu0 %v6183_v25, %s5264_s11  ;;  %v5097_v22 = vld [vmem:[%s7624_s3 + $0x40] sm:$0xff] }
 0x23d   : > { %v1109_v20 = vpop.permute.xlu1 %1108  ;;  %1130 = vrot.lane.b32.xlu2 %v6296_v29, %s5266_s13  ;;  %3007 = vmatpush.bf16.msra.mxu2 %v5097_v22 }
 0x23e   : > { %v2469_v58 = vmax.f32 %v6286_v21, 0.0  ;;  %1189 = vst.msk [vmem:[#allocation3 + $0x80] sm:$0xff] %vm1172_vm7, %v1109_v20  ;;  %v1302_v10 = vpop.permute.xlu0 %1301 }
 0x23f   : > { %v727_v25 = vpop.permute.xlu2 %726  ;;  %1382 = vst.msk [vmem:[#allocation3 + $0x80] sm:$0xff] %vm1365_vm8, %v1302_v10 }
 0x240   : > { %2478 = vst.msk [vmem:[#allocation4 + $0x21] sm:$0xff] %vm270_vm13, %v2469_v58  ;;  %v2282_v58 = vld [vmem:[#allocation6 + $0x61] ss:$2 sm:$0xff] }
 0x241   : > { %805 = vst.msk [vmem:[#allocation3 + $0x90] sm:$0xff] %vm786_vm4, %v727_v25  ;;  %v2295_v10 = vmax.f32 %v2266_v28, %v2282_v58 }
 0x242   : > { %1576 = vst.msk [vmem:[#allocation3 + $0x80] sm:$0xff] %vm1559_vm9, %v1496_v60 }
 0x243   : > { %736 = vrot.lane.b32.xlu1 %v6172_v7, %s5264_s11 }
 0x244   : > { %1323 = vrot.lane.b32.xlu0 %v6302_v61, %s5267_s14 }
 0x245   : > { %v2126_v46 = vpop.f32.mrf.mxu0  ;;  %v1304_v50 = vpop.permute.xlu1 %1303  ;;  %1321 = vrot.lane.b32.xlu2 %v6313_v19, %s5267_s14 }
 0x246   : > { %v2127_v48 = vadd.f32 %v6031_v45, %v2126_v46  ;;  %1383 = vst.msk [vmem:[#allocation3 + $0x88] sm:$0xff] %vm1365_vm8, %v1304_v50  ;;  %v1498_v49 = vpop.permute.xlu0 %1497 }
 0x247   : > { %v922_v55 = vpop.permute.xlu2 %921  ;;  %1577 = vst.msk [vmem:[#allocation3 + $0x88] sm:$0xff] %vm1559_vm9, %v1498_v49  ;;  %v6328_v18 = vld [vmem:[#allocation4 + $0x22] sm:$0xff] }
 0x248   : > { %2238 = vst.msk [vmem:[#allocation6 + $0x79] sm:$0xff] %vm270_vm13, %v2127_v48  ;;  %v6330_v30 = vld [vmem:[#allocation4 + $0x20] sm:$0xff] }
 0x249   : > { %1770 = vst.msk [vmem:[#allocation3 + $0x88] sm:$0xff] %vm1752_vm10, %v1691_v36 }
 0x24a   : > { %2872 = vst.msk [vmem:[#allocation5 + $0x8] sm:$0xff] %vm270_vm13, %v6328_v18 }
 0x24b   : > { %927 = vrot.lane.b32.xlu1 %v6219_v54, %s5265_s12  ;;  %2514 = vst.msk [vmem:[#allocation5 + $0x20] sm:$0xff] %vm270_vm13, %v6330_v30  ;;  %v6339_v54 = vld [vmem:[#allocation2 + $0x170] sm:$0xff] }
 0x24c   : > { %1515 = vrot.lane.b32.xlu0 %v6318_v1, %s5268_s15 }
 0x24d   : > { %v2128_v52 = vpop.f32.mrf.mxu0  ;;  %v1689_v57 = vpop.permute.xlu1 %1688  ;;  %929 = vrot.lane.b32.xlu2 %v6235_v32, %s5265_s12  ;;  %v6349_v32 = vld [vmem:[#allocation2 + $0x169] sm:$0xff] }
 0x24e   : > { %v2129_v7 = vadd.f32 %v6031_v45, %v2128_v52  ;;  %1769 = vst.msk [vmem:[#allocation3 + $0x80] sm:$0xff] %vm1752_vm10, %v1689_v57  ;;  %v1882_v59 = vpop.permute.xlu0 %1881 }
 0x24f   : > { %v1306_v42 = vpop.permute.xlu2 %1305  ;;  %1962 = vst.msk [vmem:[#allocation3 + $0x80] sm:$0xff] %vm1945_vm11, %v1882_v59 }
 0x250   : > { %2239 = vst.msk [vmem:[#allocation6 + $0x81] sm:$0xff] %vm270_vm13, %v2129_v7 }
 0x253   : > { %1517 = vrot.lane.b32.xlu1 %v6339_v54, %s5268_s15 }
 0x254   : > { %1122 = vrot.lane.b32.xlu0 %v6237_v40, %s5266_s13  ;;  %v1619_v40 = vld [vmem:[#allocation2 + $0x171] sm:$0xff] }
 0x255   : > { %v1884_v31 = vpop.permute.xlu1 %1883  ;;  %1120 = vrot.lane.b32.xlu2 %v6246_v33, %s5266_s13 }
 0x256   : > { %1963 = vst.msk [vmem:[#allocation3 + $0x88] sm:$0xff] %vm1945_vm11, %v1884_v31  ;;  %v729_v63 = vpop.permute.xlu0 %728  ;;  %v1994_v5 = vld [vmem:[#allocation3 + $0x80] sm:$0xff] }
 0x257   : > { %v1502_v62 = vpop.permute.xlu2 %1501  ;;  %806 = vst.msk [vmem:[#allocation3 + $0x98] sm:$0xff] %vm786_vm4, %v729_v63  ;;  %v2329_v7 = vld [vmem:[#allocation6 + $0x78] ss:$2 sm:$0xff]  ;;  %v2353_v59 = vld [vmem:[#allocation6 + $0x79] ss:$2 sm:$0xff]  ;;  %v329_v63 = vld [vmem:[%s5426_s10 + $0xf8] sm:$0xff] }
 0x258   : > { %999 = vst.msk [vmem:[#allocation3 + $0x98] sm:$0xff] %vm979_vm6, %v922_v55 }
 0x259   : > { %362 = vst.msk [vmem:[#allocation2 + $0x189] sm:$0xff] %vm224_vm0, %v329_v63 }
 0x25b   : > { %1708 = vrot.lane.b32.xlu1 %v6349_v32, %s5269_s16 }
 0x25c   : > { %1313 = vrot.lane.b32.xlu0 %v6252_v3, %s5267_s14 }
 0x25d   : > { %v920_v2 = vpop.permute.xlu1 %919  ;;  %v1995_v33 = vld [vmem:[#allocation3 + $0x88] sm:$0xff]  ;;  %1710 = vrot.lane.b32.xlu2 %v1619_v40, %s5269_s16 }
 0x25e   : > { %998 = vst.msk [vmem:[#allocation3 + $0x90] sm:$0xff] %vm979_vm6, %v920_v2  ;;  %v2018_v0 = vpack.c.bf16 %v1995_v33, %v1994_v5  ;;  %v1113_v8 = vpop.permute.xlu0 %1112 }
 0x25f   : > { %v1886_v6 = vpop.permute.xlu2 %1885  ;;  %1191 = vst.msk [vmem:[#allocation3 + $0x90] sm:$0xff] %vm1172_vm7, %v1113_v8 }
 0x260   : > { %4859 = vmatmul.msk.bf16.gmra.mxu0 %vm2044_vm12, %v2018_v0  ;;  %1384 = vst.msk [vmem:[#allocation3 + $0x90] sm:$0xff] %vm1365_vm8, %v1306_v42 }
 0x263   : > { %1315 = vrot.lane.b32.xlu1 %v6263_v35, %s5267_s14 }
 0x264   : > { %1903 = vrot.lane.b32.xlu0 %v6359_v56, %s5270_s17 }
 0x265   : > { %v1115_v9 = vpop.permute.xlu1 %1114  ;;  %1901 = vrot.lane.b32.xlu2 %v6368_v39, %s5270_s17 }
 0x266   : > { %1192 = vst.msk [vmem:[#allocation3 + $0x98] sm:$0xff] %vm1172_vm7, %v1115_v9  ;;  %v1308_v60 = vpop.permute.xlu0 %1307 }
 0x267   : > { %v733_v34 = vpop.permute.xlu2 %732  ;;  %1385 = vst.msk [vmem:[#allocation3 + $0x98] sm:$0xff] %vm1365_vm8, %v1308_v60 }
 0x268   : > { %808 = vst.msk [vmem:[#allocation3 + $0xa8] sm:$0xff] %vm786_vm4, %v733_v34 }
 0x269   : > { %1579 = vst.msk [vmem:[#allocation3 + $0x98] sm:$0xff] %vm1559_vm9, %v1502_v62  ;;  %v328_v62 = vld [vmem:[%s5426_s10 + $0xf0] sm:$0xff] }
 0x26a   : > { %361 = vst.msk [vmem:[#allocation2 + $0x181] sm:$0xff] %vm224_vm0, %v328_v62  ;;  %vm2560_vm0 = vcmask 261248  }
 0x26b   : > { %1507 = vrot.lane.b32.xlu1 %v6373_v51, %s5268_s15 }
 0x26c   : > { %1700 = vrot.lane.b32.xlu0 %v6375_v11, %s5269_s16 }
 0x26d   : > { %v1500_v13 = vpop.permute.xlu1 %1499  ;;  %1509 = vrot.lane.b32.xlu2 %v6384_v12, %s5268_s15  ;;  %v2131_v36 = vpop.f32.mrf.mxu0 }
 0x26e   : > { %1578 = vst.msk [vmem:[#allocation3 + $0x90] sm:$0xff] %vm1559_vm9, %v1500_v13  ;;  %v1693_v23 = vpop.permute.xlu0 %1692  ;;  %v2132_v20 = vadd.f32 %v6031_v45, %v2131_v36 }
 0x26f   : > { %v1117_v15 = vpop.permute.xlu2 %1116  ;;  %1771 = vst.msk [vmem:[#allocation3 + $0x90] sm:$0xff] %vm1752_vm10, %v1693_v23 }
 0x270   : > { %1964 = vst.msk [vmem:[#allocation3 + $0x90] sm:$0xff] %vm1945_vm11, %v1886_v6 }
 0x271   : > { %2240 = vst.msk [vmem:[#allocation6 + $0x91] sm:$0xff] %vm270_vm13, %v2132_v20  ;;  %v6456_v23 = vld [vmem:[#allocation2 + $0x188] sm:$0xff] }
 0x273   : > { %1702 = vrot.lane.b32.xlu1 %v6389_v14, %s5269_s16 }
 0x274   : > { %1895 = vrot.lane.b32.xlu0 %v6269_v26, %s5270_s17 }
 0x275   : > { %v1695_v37 = vpop.permute.xlu1 %1694  ;;  %1893 = vrot.lane.b32.xlu2 %v6254_v4, %s5270_s17  ;;  %v2133_v49 = vpop.f32.mrf.mxu0 }
 0x276   : > { %1772 = vst.msk [vmem:[#allocation3 + $0x98] sm:$0xff] %vm1752_vm10, %v1695_v37  ;;  %v1888_v44 = vpop.permute.xlu0 %1887  ;;  %v2134_v57 = vadd.f32 %v6031_v45, %v2133_v49 }
 0x277   : > { %v1312_v38 = vpop.permute.xlu2 %1311  ;;  %1965 = vst.msk [vmem:[#allocation3 + $0x98] sm:$0xff] %vm1945_vm11, %v1888_v44  ;;  %v1996_v41 = vld [vmem:[#allocation3 + $0x90] sm:$0xff] }
 0x278   : > { %2241 = vst.msk [vmem:[#allocation6 + $0x99] sm:$0xff] %vm270_vm13, %v2134_v57  ;;  %v6514_v57 = vld [vmem:[%s7623_s2] ss:$0 sm:$0xff] }
 0x27b   : > { %746 = vrot.lane.b32.xlu1 %v6313_v19, %s5264_s11 }
 0x27c   : > { %939 = vrot.lane.b32.xlu0 %v6318_v1, %s5265_s12  ;;  %v2306_v1 = vld [vmem:[#allocation6 + $0x62] ss:$2 sm:$0xff] }
 0x27d   : > { %748 = vrot.lane.b32.xlu2 %v6302_v61, %s5264_s11  ;;  %v731_v43 = vpop.permute.xlu1 %730  ;;  %v2319_v55 = vmax.f32 %v2295_v10, %v2306_v1  ;;  %v2881_v10 = vld [vmem:[#allocation5 + $0x8] sm:$0xff] }
 0x27e   : > { %807 = vst.msk [vmem:[#allocation3 + $0xa0] sm:$0xff] %vm786_vm4, %v731_v43  ;;  %v924_v46 = vpop.permute.xlu0 %923  ;;  %v1997_v48 = vld [vmem:[#allocation3 + $0x98] sm:$0xff] }
 0x27f   : > { %v1697_v53 = vpop.permute.xlu2 %1696  ;;  %1000 = vst.msk [vmem:[#allocation3 + $0xa0] sm:$0xff] %vm979_vm6, %v924_v46  ;;  %v2019_v25 = vpack.c.bf16 %v1997_v48, %v1996_v41  ;;  %v2342_v42 = vmax.f32 %v2319_v55, %v2329_v7  ;;  %v2401_v5 = vld [vmem:[#allocation6 + $0x90] ss:$2 sm:$0xff]  ;;  %v2425_v9 = vld [vmem:[#allocation6 + $0x91] ss:$2 sm:$0xff] }
 0x280   : > { %1193 = vst.msk [vmem:[#allocation3 + $0xa0] sm:$0xff] %vm1172_vm7, %v1117_v15  ;;  %v2449_v13 = vld [vmem:[#allocation6 + $0x92] ss:$2 sm:$0xff] }
 0x281   : > { %4860 = vmatmul.msk.bf16.gmra.mxu0 %vm2044_vm12, %v2019_v25  ;;  %v2366_v31 = vmax.f32 %v2342_v42, %v2353_v59  ;;  %v6465_v43 = vld [vmem:[#allocation2 + $0x189] sm:$0xff]  ;;  %v6473_v41 = vld [vmem:[#allocation2 + $0x181] sm:$0xff] }
 0x282   : > { %v6485_v46 = vld [vmem:[#allocation2 + $0x182] sm:$0xff]  ;;  %v6499_v7 = vld [vmem:[#allocation2 + $0x18a] sm:$0xff] }
 0x283   : > { %941 = vrot.lane.b32.xlu1 %v6339_v54, %s5265_s12  ;;  %v2268_v42 = vld [vmem:[#allocation6 + $0x90] ss:$2 sm:$0xff] }
 0x284   : > { %1134 = vrot.lane.b32.xlu0 %v1619_v40, %s5266_s13  ;;  %v2377_v40 = vld [vmem:[#allocation6 + $0x7a] ss:$2 sm:$0xff] }
 0x285   : > { %1132 = vrot.lane.b32.xlu2 %v6349_v32, %s5266_s13  ;;  %v926_v50 = vpop.permute.xlu1 %925  ;;  %v2390_v2 = vmax.f32 %v2366_v31, %v2377_v40  ;;  %v2308_v31 = vld [vmem:[#allocation6 + $0x92] ss:$2 sm:$0xff] }
 0x286   : > { %1001 = vst.msk [vmem:[#allocation3 + $0xa8] sm:$0xff] %vm979_vm6, %v926_v50  ;;  %v1119_v54 = vpop.permute.xlu0 %1118 }
 0x287   : > { %v1892_v52 = vpop.permute.xlu2 %1891  ;;  %1194 = vst.msk [vmem:[#allocation3 + $0xa8] sm:$0xff] %vm1172_vm7, %v1119_v54  ;;  %v2414_v0 = vmax.f32 %v2390_v2, %v2401_v5 }
 0x288   : > { %1387 = vst.msk [vmem:[#allocation3 + $0xa8] sm:$0xff] %vm1365_vm8, %v1312_v38 }
 0x289   : > { %v2438_v34 = vmax.f32 %v2414_v0, %v2425_v9 }
 0x28b   : > { %738 = vrot.lane.b32.xlu1 %v6252_v3, %s5264_s11 }
 0x28c   : > { %1325 = vrot.lane.b32.xlu0 %v6368_v39, %s5267_s14 }
 0x28d   : > { %740 = vrot.lane.b32.xlu2 %v6263_v35, %s5264_s11  ;;  %v1310_v3 = vpop.permute.xlu1 %1309 }
 0x28e   : > { %1386 = vst.msk [vmem:[#allocation3 + $0xa0] sm:$0xff] %vm1365_vm8, %v1310_v3  ;;  %v1504_v35 = vpop.permute.xlu0 %1503  ;;  %v2136_v33 = vpop.f32.mrf.mxu0  ;;  %v2284_v3 = vld [vmem:[#allocation6 + $0x91] ss:$2 sm:$0xff] }
 0x28f   : > { %v936_v32 = vpop.permute.xlu2 %935  ;;  %1580 = vst.msk [vmem:[#allocation3 + $0xa0] sm:$0xff] %vm1559_vm9, %v1504_v35  ;;  %v2137_v6 = vadd.f32 %v6031_v45, %v2136_v33 }
 0x290   : > { %1773 = vst.msk [vmem:[#allocation3 + $0xa0] sm:$0xff] %vm1752_vm10, %v1697_v53 }
 0x291   : > { %2242 = vst.msk [vmem:[#allocation6 + $0xa9] sm:$0xff] %vm270_vm13, %v2137_v6 }
 0x293   : > { %1327 = vrot.lane.b32.xlu1 %v6359_v56, %s5267_s14 }
 0x294   : > { %933 = vrot.lane.b32.xlu0 %v6384_v12, %s5265_s12  ;;  %v6447_v12 = vld [vmem:[#allocation2 + $0x180] sm:$0xff] }
 0x295   : > { %931 = vrot.lane.b32.xlu2 %v6373_v51, %s5265_s12  ;;  %v1506_v8 = vpop.permute.xlu1 %1505  ;;  %v6454_v51 = vmax.f32 %v2438_v34, %v2449_v13 }
 0x296   : > { %1581 = vst.msk [vmem:[#allocation3 + $0xa8] sm:$0xff] %vm1559_vm9, %v1506_v8  ;;  %v1699_v15 = vpop.permute.xlu0 %1698  ;;  %v2138_v38 = vpop.f32.mrf.mxu0 }
 0x297   : > { %v1131_v60 = vpop.permute.xlu2 %1130  ;;  %v2470_v37 = vmax.f32 %v6454_v51, 0.0  ;;  %1774 = vst.msk [vmem:[#allocation3 + $0xa8] sm:$0xff] %vm1752_vm10, %v1699_v15  ;;  %v2139_v44 = vadd.f32 %v6031_v45, %v2138_v38 }
 0x298   : > { %1967 = vst.msk [vmem:[#allocation3 + $0xa8] sm:$0xff] %vm1945_vm11, %v1892_v52 }
 0x299   : > { %2479 = vst.msk [vmem:[#allocation4 + $0x31] sm:$0xff] %vm270_vm13, %v2470_v37 }
 0x29a   : > { %2243 = vst.msk [vmem:[#allocation6 + $0xb1] sm:$0xff] %vm270_vm13, %v2139_v44  ;;  %v1429_v44 = vld [vmem:[#allocation2 + $0x198] sm:$0xff] }
 0x29b   : > { %1519 = vrot.lane.b32.xlu1 %v6447_v12, %s5268_s15 }
 0x29c   : > { %1124 = vrot.lane.b32.xlu0 %v6375_v11, %s5266_s13 }
 0x29d   : > { %1521 = vrot.lane.b32.xlu2 %v6456_v23, %s5268_s15  ;;  %v1890_v11 = vpop.permute.xlu1 %1889 }
 0x29e   : > { %1966 = vst.msk [vmem:[#allocation3 + $0xa0] sm:$0xff] %vm1945_vm11, %v1890_v11  ;;  %v743_v53 = vpop.permute.xlu0 %742  ;;  %v1622_v11 = vld [vmem:[#allocation2 + $0x199] sm:$0xff] }
 0x29f   : > { %v1322_v22 = vpop.permute.xlu2 %1321  ;;  %813 = vst.msk [vmem:[#allocation3 + $0xd0] sm:$0xff] %vm786_vm4, %v743_v53  ;;  %v1999_v45 = vld [vmem:[#allocation3 + $0xa8] sm:$0xff]  ;;  %v1430_v53 = vld [vmem:[#allocation2 + $0x1a0] sm:$0xff] }
 0x2a0   : > { %v6476_v36 = vld [vmem:[#allocation4 + $0x32] sm:$0xff]  ;;  %1006 = vst.msk [vmem:[#allocation3 + $0xd0] sm:$0xff] %vm979_vm6, %v936_v32 }
 0x2a1   : > { %2873 = vst.msk [vmem:[#allocation5 + $0x18] sm:$0xff] %vm270_vm13, %v6476_v36  ;;  %v6483_v58 = vld [vmem:[#allocation4 + $0x30] sm:$0xff] }
 0x2a2   : > { %2515 = vst.msk [vmem:[#allocation5 + $0x30] sm:$0xff] %vm270_vm13, %v6483_v58  ;;  %v2331_v32 = vld [vmem:[#allocation6 + $0xa8] ss:$2 sm:$0xff] }
 0x2a3   : > { %1126 = vrot.lane.b32.xlu1 %v6389_v14, %s5266_s13  ;;  %v2379_v0 = vld [vmem:[#allocation6 + $0xaa] ss:$2 sm:$0xff] }
 0x2a4   : > { %1714 = vrot.lane.b32.xlu0 %v6465_v43, %s5269_s16 }
 0x2a5   : > { %1712 = vrot.lane.b32.xlu2 %v6473_v41, %s5269_s16  ;;  %v745_v14 = vpop.permute.xlu1 %744  ;;  %v1998_v28 = vld [vmem:[#allocation3 + $0xa0] sm:$0xff] }
 0x2a6   : > { %v2020_v20 = vpack.c.bf16 %v1999_v45, %v1998_v28  ;;  %814 = vst.msk [vmem:[#allocation3 + $0xd8] sm:$0xff] %vm786_vm4, %v745_v14  ;;  %v938_v25 = vpop.permute.xlu0 %937 }
 0x2a7   : > { %v930_v48 = vpop.permute.xlu2 %929  ;;  %1007 = vst.msk [vmem:[#allocation3 + $0xd8] sm:$0xff] %vm979_vm6, %v938_v25 }
 0x2a8   : > { %4861 = vmatmul.msk.bf16.gmra.mxu0 %vm2044_vm12, %v2020_v20  ;;  %v2883_v50 = vld [vmem:[#allocation5 + $0x18] sm:$0xff]  ;;  %1200 = vst.msk [vmem:[#allocation3 + $0xd8] sm:$0xff] %vm1172_vm7, %v1131_v60 }
 0x2a9   : > { %v2897_v52 = vpack.c.bf16 %v2883_v50, %v2881_v10 }
 0x2ab   : > { %1317 = vrot.lane.b32.xlu1 %v6254_v4, %s5267_s14  ;;  %4903 = vmatmul.msk.bf16.vlgmr.msra.gmra.mxu2 %vm270_vm13, %v2897_v52 }
 0x2ac   : > { %1905 = vrot.lane.b32.xlu0 %v6485_v46, %s5270_s17 }
 0x2ad   : > { %1319 = vrot.lane.b32.xlu2 %v6269_v26, %s5267_s14  ;;  %v1129_v1 = vpop.permute.xlu1 %1128 }
 0x2ae   : > { %1199 = vst.msk [vmem:[#allocation3 + $0xd0] sm:$0xff] %vm1172_vm7, %v1129_v1  ;;  %v735_v55 = vpop.permute.xlu0 %734  ;;  %v1815_v1 = vld [vmem:[#allocation2 + $0x19a] sm:$0xff] }
 0x2af   : > { %v1121_v4 = vpop.permute.xlu2 %1120  ;;  %1392 = vst.msk [vmem:[#allocation3 + $0xd0] sm:$0xff] %vm1365_vm8, %v1322_v22 }
 0x2b0   : > { %809 = vst.msk [vmem:[#allocation3 + $0xb0] sm:$0xff] %vm786_vm4, %v735_v55 }
 0x2b3   : > { %1907 = vrot.lane.b32.xlu1 %v6499_v7, %s5270_s17 }
 0x2b4   : > { %1513 = vrot.lane.b32.xlu0 %v6271_v16, %s5268_s15 }
 0x2b5   : > { %v2141_v26 = vpop.f32.mrf.mxu0  ;;  %1511 = vrot.lane.b32.xlu2 %v6278_v17, %s5268_s15  ;;  %v737_v49 = vpop.permute.xlu1 %736  ;;  %v2296_v17 = vmax.f32 %v2268_v42, %v2284_v3 }
 0x2b6   : > { %v2142_v54 = vadd.f32 %v6514_v57, %v2141_v26  ;;  %810 = vst.msk [vmem:[#allocation3 + $0xb8] sm:$0xff] %vm786_vm4, %v737_v49  ;;  %v1324_v59 = vpop.permute.xlu0 %1323  ;;  %v6585_v49 = vld [vmem:[#allocation4 + $0x1] sm:$0xff] }
 0x2b7   : > { %v1711_v16 = vpop.permute.xlu2 %1710  ;;  %1003 = vst.msk [vmem:[#allocation3 + $0xb8] sm:$0xff] %vm979_vm6, %v930_v48  ;;  %v2320_v63 = vmax.f32 %v2296_v17, %v2308_v31  ;;  %v1816_v48 = vld [vmem:[#allocation2 + $0x1a2] sm:$0xff] }
 0x2b8   : > { %2244 = vst.msk [vmem:[#allocation6 + $0xc1] sm:$0xff] %vm270_vm13, %v2142_v54  ;;  %v6588_v54 = vld [vmem:[#allocation4 + $0x2] sm:$0xff]  ;;  %v2570_v31 = vld [vmem:[#allocation4 + $0x12] sm:$0xff] }
 0x2b9   : > { %1393 = vst.msk [vmem:[#allocation3 + $0xd8] sm:$0xff] %vm1365_vm8, %v1324_v59 }
 0x2bb   : > { %1704 = vrot.lane.b32.xlu1 %v6284_v47, %s5269_s16  ;;  %v2343_v47 = vmax.f32 %v2320_v63, %v2331_v32 }
 0x2bc   : > { %1897 = vrot.lane.b32.xlu0 %v6313_v19, %s5270_s17  ;;  %v2355_v19 = vld [vmem:[#allocation6 + $0xa9] ss:$2 sm:$0xff] }
 0x2bd   : > { %v2143_v62 = vpop.f32.mrf.mxu0  ;;  %1706 = vrot.lane.b32.xlu2 %v6296_v29, %s5269_s16  ;;  %v928_v40 = vpop.permute.xlu1 %927  ;;  %v2367_v29 = vmax.f32 %v2343_v47, %v2355_v19  ;;  %v2668_v19 = vld [vmem:[#allocation4 + $0x21] sm:$0xff] }
 0x2be   : > { %v2144_v35 = vadd.f32 %v6514_v57, %v2143_v62  ;;  %1002 = vst.msk [vmem:[#allocation3 + $0xb0] sm:$0xff] %vm979_vm6, %v928_v40  ;;  %v1516_v5 = vpop.permute.xlu0 %1515 }
 0x2bf   : > { %v1902_v2 = vpop.permute.xlu2 %1901  ;;  %1195 = vst.msk [vmem:[#allocation3 + $0xb0] sm:$0xff] %vm1172_vm7, %v1121_v4  ;;  %v2391_v6 = vmax.f32 %v2367_v29, %v2379_v0 }
 0x2c0   : > { %2245 = vst.msk [vmem:[#allocation6 + $0xc9] sm:$0xff] %vm270_vm13, %v2144_v35 }
 0x2c1   : > { %1586 = vst.msk [vmem:[#allocation3 + $0xd0] sm:$0xff] %vm1559_vm9, %v1516_v5 }
 0x2c3   : > { %1899 = vrot.lane.b32.xlu1 %v6302_v61, %s5270_s17 }
 0x2c4   : > { %752 = vrot.lane.b32.xlu0 %v6359_v56, %s5264_s11 }
 0x2c5   : > { %750 = vrot.lane.b32.xlu2 %v6368_v39, %s5264_s11  ;;  %v1518_v33 = vpop.permute.xlu1 %1517 }
 0x2c6   : > { %1587 = vst.msk [vmem:[#allocation3 + $0xd8] sm:$0xff] %vm1559_vm9, %v1518_v33  ;;  %v1123_v34 = vpop.permute.xlu0 %1122 }
 0x2c7   : > { %v1510_v8 = vpop.permute.xlu2 %1509  ;;  %v2403_v9 = vld [vmem:[#allocation6 + $0xc0] ss:$2 sm:$0xff]  ;;  %1780 = vst.msk [vmem:[#allocation3 + $0xd8] sm:$0xff] %vm1752_vm10, %v1711_v16  ;;  %v2427_v56 = vld [vmem:[#allocation6 + $0xc1] ss:$2 sm:$0xff]  ;;  %v2521_v16 = vld [vmem:[#allocation4 + $0x11] sm:$0xff] }
 0x2c8   : > { %v2415_v61 = vmax.f32 %v2391_v6, %v2403_v9  ;;  %1196 = vst.msk [vmem:[#allocation3 + $0xb8] sm:$0xff] %vm1172_vm7, %v1123_v34  ;;  %v2451_v39 = vld [vmem:[#allocation6 + $0xc2] ss:$2 sm:$0xff]  ;;  %v2286_v6 = vld [vmem:[#allocation6 + $0xc1] ss:$2 sm:$0xff] }
 0x2c9   : > { %v2270_v0 = vld [vmem:[#allocation6 + $0xc0] ss:$2 sm:$0xff] }
 0x2ca   : > { %v2439_v60 = vmax.f32 %v2415_v61, %v2427_v56  ;;  %v2297_v61 = vmax.f32 %v2270_v0, %v2286_v6  ;;  %v2310_v34 = vld [vmem:[#allocation6 + $0xc2] ss:$2 sm:$0xff] }
 0x2cb   : > { %943 = vrot.lane.b32.xlu1 %v6447_v12, %s5265_s12  ;;  %v6688_v6 = vld [vmem:[#allocation4] sm:$0xff] }
 0x2cc   : > { %1136 = vrot.lane.b32.xlu0 %v6473_v41, %s5266_s13  ;;  %v6545_v13 = vmax.f32 %v2439_v60, %v2451_v39  ;;  %v2321_v39 = vmax.f32 %v2297_v61, %v2310_v34  ;;  %2512 = vst.msk [vmem:[#allocation5] sm:$0xff] %vm270_vm13, %v6688_v6 }
 0x2cd   : > { %945 = vrot.lane.b32.xlu2 %v6456_v23, %s5265_s12  ;;  %v1709_v15 = vpop.permute.xlu1 %1708  ;;  %s5272_s12 = smov 48  }
 0x2ce   : > { %1779 = vst.msk [vmem:[#allocation3 + $0xd0] sm:$0xff] %vm1752_vm10, %v1709_v15  ;;  %v2471_v37 = vmax.f32 %v6545_v13, 0.0  ;;  %v1314_v38 = vpop.permute.xlu0 %1313 }
 0x2cf   : > { %v1894_v12 = vpop.permute.xlu2 %1893  ;;  %1972 = vst.msk [vmem:[#allocation3 + $0xd0] sm:$0xff] %vm1945_vm11, %v1902_v2 }
 0x2d0   : > { %1388 = vst.msk [vmem:[#allocation3 + $0xb0] sm:$0xff] %vm1365_vm8, %v1314_v38  ;;  %v2816_v38 = vld [vmem:[#allocation4 + $0x31] sm:$0xff] }
 0x2d1   : > { %2480 = vst.msk [vmem:[#allocation4 + $0x41] sm:$0xff] %vm270_vm13, %v2471_v37 }
 0x2d3   : > { %1138 = vrot.lane.b32.xlu1 %v6465_v43, %s5266_s13 }
 0x2d4   : > { %1331 = vrot.lane.b32.xlu0 %v6499_v7, %s5267_s14 }
 0x2d5   : > { %1329 = vrot.lane.b32.xlu2 %v6485_v46, %s5267_s14  ;;  %v1316_v23 = vpop.permute.xlu1 %1315  ;;  %v1623_v46 = vld [vmem:[#allocation2 + $0x1a1] sm:$0xff]  ;;  %s5273_s14 = smov 64  }
 0x2d6   : > { %1389 = vst.msk [vmem:[#allocation3 + $0xb8] sm:$0xff] %vm1365_vm8, %v1316_v23  ;;  %v1904_v43 = vpop.permute.xlu0 %1903  ;;  %v2004_v10 = vld [vmem:[#allocation3 + $0xd0] sm:$0xff] }
 0x2d7   : > { %v749_v22 = vpop.permute.xlu2 %748  ;;  %1583 = vst.msk [vmem:[#allocation3 + $0xb8] sm:$0xff] %vm1559_vm9, %v1510_v8 }
 0x2d8   : > { %816 = vst.msk [vmem:[#allocation3 + $0xe8] sm:$0xff] %vm786_vm4, %v749_v22  ;;  %v6566_v41 = vld [vmem:[#allocation4 + $0x40] sm:$0xff] }
 0x2d9   : > { %1973 = vst.msk [vmem:[#allocation3 + $0xd8] sm:$0xff] %vm1945_vm11, %v1904_v43  ;;  %v6568_v45 = vld [vmem:[#allocation4 + $0x42] sm:$0xff] }
 0x2da   : > { %2874 = vst.msk [vmem:[#allocation5 + $0x28] sm:$0xff] %vm270_vm13, %v6568_v45 }
 0x2db   : > { %1523 = vrot.lane.b32.xlu1 %v1429_v44, %s5268_s15  ;;  %2516 = vst.msk [vmem:[#allocation5 + $0x40] sm:$0xff] %vm270_vm13, %v6566_v41 }
 0x2dc   : > { %1716 = vrot.lane.b32.xlu0 %v1622_v11, %s5269_s16 }
 0x2dd   : > { %v2146_v14 = vpop.f32.mrf.mxu0  ;;  %1525 = vrot.lane.b32.xlu2 %v1430_v53, %s5268_s15  ;;  %v1508_v28 = vpop.permute.xlu1 %1507  ;;  %s5274_s15 = smov 80  }
 0x2de   : > { %v2147_v20 = vadd.f32 %v6514_v57, %v2146_v14  ;;  %1582 = vst.msk [vmem:[#allocation3 + $0xb0] sm:$0xff] %vm1559_vm9, %v1508_v28  ;;  %v1701_v50 = vpop.permute.xlu0 %1700 }
 0x2df   : > { %v1133_v25 = vpop.permute.xlu2 %1132  ;;  %1775 = vst.msk [vmem:[#allocation3 + $0xb0] sm:$0xff] %vm1752_vm10, %v1701_v50 }
 0x2e0   : > { %2246 = vst.msk [vmem:[#allocation6 + $0xd9] sm:$0xff] %vm270_vm13, %v2147_v20  ;;  %v2005_v52 = vld [vmem:[#allocation3 + $0xd8] sm:$0xff] }
 0x2e1   : > { %v2023_v7 = vpack.c.bf16 %v2005_v52, %v2004_v10  ;;  %1968 = vst.msk [vmem:[#allocation3 + $0xb0] sm:$0xff] %vm1945_vm11, %v1894_v12 }
 0x2e3   : > { %1718 = vrot.lane.b32.xlu1 %v1623_v46, %s5269_s16  ;;  %4864 = vmatmul.msk.bf16.vlgmr.msra.gmra.mxu3 %vm2044_vm12, %v2023_v7  ;;  %s5275_s16 = smov 96  }
 0x2e4   : > { %1911 = vrot.lane.b32.xlu0 %v1816_v48, %s5270_s17 }
 0x2e5   : > { %v2148_v4 = vpop.f32.mrf.mxu0  ;;  %1909 = vrot.lane.b32.xlu2 %v1815_v1, %s5270_s17  ;;  %v1703_v55 = vpop.permute.xlu1 %1702 }
 0x2e6   : > { %v2149_v26 = vadd.f32 %v6514_v57, %v2148_v4  ;;  %1776 = vst.msk [vmem:[#allocation3 + $0xb8] sm:$0xff] %vm1752_vm10, %v1703_v55  ;;  %v1896_v3 = vpop.permute.xlu0 %1895 }
 0x2e7   : > { %v741_v42 = vpop.permute.xlu2 %740  ;;  %1969 = vst.msk [vmem:[#allocation3 + $0xb8] sm:$0xff] %vm1945_vm11, %v1896_v3 }
 0x2e8   : > { %2247 = vst.msk [vmem:[#allocation6 + $0xe1] sm:$0xff] %vm270_vm13, %v2149_v26  ;;  %v2000_v32 = vld [vmem:[#allocation3 + $0xb0] sm:$0xff] }
 0x2e9   : > { %812 = vst.msk [vmem:[#allocation3 + $0xc8] sm:$0xff] %vm786_vm4, %v741_v42 }
 0x2eb   : > { %2536 = vrot.lane.b32.xlu1 %v6585_v49, %s5266_s13 }
 0x2ec   : > { %2585 = vrot.lane.b32.xlu0 %v6588_v54, %s5270_s17 }
 0x2ed   : > { %2538 = vrot.lane.b32.xlu2 %v2521_v16, %s5266_s13  ;;  %v747_v17 = vpop.permute.xlu1 %746 }
 0x2ee   : > { %815 = vst.msk [vmem:[#allocation3 + $0xe0] sm:$0xff] %vm786_vm4, %v747_v17  ;;  %v940_v62 = vpop.permute.xlu0 %939  ;;  %v2001_v63 = vld [vmem:[#allocation3 + $0xb8] sm:$0xff] }
 0x2ef   : > { %v932_v59 = vpop.permute.xlu2 %931  ;;  %1008 = vst.msk [vmem:[#allocation3 + $0xe0] sm:$0xff] %vm979_vm6, %v940_v62  ;;  %v2021_v40 = vpack.c.bf16 %v2001_v63, %v2000_v32  ;;  %v2333_v60 = vld [vmem:[#allocation6 + $0xd8] ss:$2 sm:$0xff]  ;;  %v2357_v44 = vld [vmem:[#allocation6 + $0xd9] ss:$2 sm:$0xff] }
 0x2f0   : > { %1201 = vst.msk [vmem:[#allocation3 + $0xe0] sm:$0xff] %vm1172_vm7, %v1133_v25  ;;  %v2344_v37 = vmax.f32 %v2321_v39, %v2333_v60  ;;  %v2381_v53 = vld [vmem:[#allocation6 + $0xda] ss:$2 sm:$0xff] }
 0x2f1   : > { %4862 = vmatmul.msk.bf16.gmra.mxu0 %vm2044_vm12, %v2021_v40 }
 0x2f2   : > { %v2368_v22 = vmax.f32 %v2344_v37, %v2357_v44 }
 0x2f3   : > { %2587 = vrot.lane.b32.xlu1 %v2570_v31, %s5270_s17 }
 0x2f4   : > { %2636 = vrot.lane.b32.xlu0 %v6330_v30, %s5272_s12  ;;  %v2392_v14 = vmax.f32 %v2368_v22, %v2381_v53 }
 0x2f5   : > { %2634 = vrot.lane.b32.xlu2 %v6228_v27, %s5272_s12  ;;  %v942_v35 = vpop.permute.xlu1 %941 }
 0x2f6   : > { %1009 = vst.msk [vmem:[#allocation3 + $0xe8] sm:$0xff] %vm979_vm6, %v942_v35  ;;  %v1135_v2 = vpop.permute.xlu0 %1134 }
 0x2f7   : > { %v1522_v47 = vpop.permute.xlu2 %1521  ;;  %1202 = vst.msk [vmem:[#allocation3 + $0xe8] sm:$0xff] %vm1172_vm7, %v1135_v2  ;;  %v2885_v2 = vld [vmem:[#allocation5 + $0x28] sm:$0xff] }
 0x2fb   : > { %2683 = vrot.lane.b32.xlu1 %v2521_v16, %s5273_s14 }
 0x2fc   : > { %2732 = vrot.lane.b32.xlu0 %v2570_v31, %s5274_s15 }
 0x2fd   : > { %2685 = vrot.lane.b32.xlu2 %v2668_v19, %s5273_s14  ;;  %v739_v5 = vpop.permute.xlu1 %738 }
 0x2fe   : > { %811 = vst.msk [vmem:[#allocation3 + $0xc0] sm:$0xff] %vm786_vm4, %v739_v5  ;;  %v1326_v29 = vpop.permute.xlu0 %1325  ;;  %v2151_v33 = vpop.f32.mrf.mxu0 }
 0x2ff   : > { %v1713_v27 = vpop.permute.xlu2 %1712  ;;  %1004 = vst.msk [vmem:[#allocation3 + $0xc0] sm:$0xff] %vm979_vm6, %v932_v59  ;;  %v2152_v8 = vadd.f32 %v6514_v57, %v2151_v33 }
 0x300   : > { %1394 = vst.msk [vmem:[#allocation3 + $0xe0] sm:$0xff] %vm1365_vm8, %v1326_v29 }
 0x301   : > { %2248 = vst.msk [vmem:[#allocation6 + $0xf1] sm:$0xff] %vm270_vm13, %v2152_v8 }
 0x303   : > { %2734 = vrot.lane.b32.xlu1 %v6328_v18, %s5274_s15 }
 0x304   : > { %2784 = vrot.lane.b32.xlu0 %v6483_v58, %s5275_s16 }
 0x305   : > { %2782 = vrot.lane.b32.xlu2 %v6330_v30, %s5275_s16  ;;  %v1328_v9 = vpop.permute.xlu1 %1327 }
 0x306   : > { %1395 = vst.msk [vmem:[#allocation3 + $0xe8] sm:$0xff] %vm1365_vm8, %v1328_v9  ;;  %v934_v15 = vpop.permute.xlu0 %933  ;;  %v2153_v12 = vpop.f32.mrf.mxu0 }
 0x307   : > { %v1320_v56 = vpop.permute.xlu2 %1319  ;;  %1589 = vst.msk [vmem:[#allocation3 + $0xe8] sm:$0xff] %vm1559_vm9, %v1522_v47  ;;  %v2154_v30 = vadd.f32 %v6514_v57, %v2153_v12  ;;  %v5096_v12 = vld [vmem:[%s7624_s3 + $0x38] sm:$0xff] }
 0x308   : > { %1005 = vst.msk [vmem:[#allocation3 + $0xc8] sm:$0xff] %vm979_vm6, %v934_v15  ;;  %2971 = vmatpush.bf16.msra.mxu1 %v5096_v12 }
 0x309   : > { %2249 = vst.msk [vmem:[#allocation6 + $0xf9] sm:$0xff] %vm270_vm13, %v2154_v30 }
 0x30b   : > { %2831 = vrot.lane.b32.xlu1 %v2668_v19, %s5276_s30 }
 0x30c   : > { %2540 = vrot.lane.b32.xlu0 %v2668_v19, %s5266_s13 }
 0x30d   : > { %2833 = vrot.lane.b32.xlu2 %v2816_v38, %s5276_s30  ;;  %v1520_v23 = vpop.permute.xlu1 %1519 }
 0x30e   : > { %1588 = vst.msk [vmem:[#allocation3 + $0xe0] sm:$0xff] %vm1559_vm9, %v1520_v23  ;;  %v1125_v43 = vpop.permute.xlu0 %1124 }
 0x30f   : > { %v1512_v11 = vpop.permute.xlu2 %1511  ;;  %1781 = vst.msk [vmem:[#allocation3 + $0xe0] sm:$0xff] %vm1752_vm10, %v1713_v27 }
 0x310   : > { %1197 = vst.msk [vmem:[#allocation3 + $0xc0] sm:$0xff] %vm1172_vm7, %v1125_v43  ;;  %v2405_v28 = vld [vmem:[#allocation6 + $0xf0] ss:$2 sm:$0xff]  ;;  %v2429_v48 = vld [vmem:[#allocation6 + $0xf1] ss:$2 sm:$0xff]  ;;  %v5095_v43 = vld [vmem:[%s7624_s3 + $0x30] sm:$0xff] }
 0x311   : > { %v2416_v46 = vmax.f32 %v2392_v14, %v2405_v28  ;;  %v2453_v50 = vld [vmem:[#allocation6 + $0xf2] ss:$2 sm:$0xff]  ;;  %2972 = vmatpush.bf16.msra.mxu1 %v5095_v43 }
 0x312   : > { %v5094_v14 = vld [vmem:[%s7624_s3 + $0x28] sm:$0xff] }
 0x313   : > { %2542 = vrot.lane.b32.xlu1 %v2816_v38, %s5266_s13  ;;  %v2440_v10 = vmax.f32 %v2416_v46, %v2429_v48 }
 0x314   : > { %2591 = vrot.lane.b32.xlu0 %v6476_v36, %s5270_s17 }
 0x315   : > { %2589 = vrot.lane.b32.xlu2 %v6328_v18, %s5270_s17  ;;  %v1127_v20 = vpop.permute.xlu1 %1126  ;;  %v6644_v52 = vmax.f32 %v2440_v10, %v2453_v50  ;;  %2973 = vmatpush.bf16.msra.mxu1 %v5094_v14 }
 0x316   : > { %1198 = vst.msk [vmem:[#allocation3 + $0xc8] sm:$0xff] %vm1172_vm7, %v1127_v20  ;;  %v1715_v1 = vpop.permute.xlu0 %1714 }
 0x317   : > { %v1707_v25 = vpop.permute.xlu2 %1706  ;;  %1391 = vst.msk [vmem:[#allocation3 + $0xc8] sm:$0xff] %vm1365_vm8, %v1320_v56  ;;  %v2472_v7 = vmax.f32 %v6644_v52, 0.0 }
 0x318   : > { %1782 = vst.msk [vmem:[#allocation3 + $0xe8] sm:$0xff] %vm1752_vm10, %v1715_v1 }
 0x319   : > { %2481 = vst.msk [vmem:[#allocation4 + $0x51] sm:$0xff] %vm270_vm13, %v2472_v7 }
 0x31b   : > { %2638 = vrot.lane.b32.xlu1 %v6483_v58, %s5272_s12  ;;  %v2670_v58 = vld [vmem:[#allocation4 + $0x41] sm:$0xff] }
 0x31c   : > { %2687 = vrot.lane.b32.xlu0 %v2816_v38, %s5273_s14 }
 0x31d   : > { %2640 = vrot.lane.b32.xlu2 %v6566_v41, %s5272_s12  ;;  %v1318_v18 = vpop.permute.xlu1 %1317 }
 0x31e   : > { %1390 = vst.msk [vmem:[#allocation3 + $0xc0] sm:$0xff] %vm1365_vm8, %v1318_v18  ;;  %v1906_v55 = vpop.permute.xlu0 %1905 }
 0x31f   : > { %v751_v4 = vpop.permute.xlu2 %750  ;;  %1584 = vst.msk [vmem:[#allocation3 + $0xc0] sm:$0xff] %vm1559_vm9, %v1512_v11 }
 0x320   : > { %817 = vst.msk [vmem:[#allocation3 + $0xf0] sm:$0xff] %vm786_vm4, %v751_v4  ;;  %v2769_v17 = vld [vmem:[#allocation4 + $0x50] sm:$0xff]  ;;  %v5092_v4 = vld [vmem:[%s7624_s3 + $0x18] sm:$0xff] }
 0x321   : > { %1974 = vst.msk [vmem:[#allocation3 + $0xe0] sm:$0xff] %vm1945_vm11, %v1906_v55  ;;  %v6665_v59 = vld [vmem:[#allocation4 + $0x52] sm:$0xff] }
 0x322   : > { %2875 = vst.msk [vmem:[#allocation5 + $0x38] sm:$0xff] %vm270_vm13, %v6665_v59  ;;  %v2818_v47 = vld [vmem:[#allocation4 + $0x51] sm:$0xff] }
 0x323   : > { %2689 = vrot.lane.b32.xlu1 %v2670_v58, %s5273_s14  ;;  %2517 = vst.msk [vmem:[#allocation5 + $0x50] sm:$0xff] %vm270_vm13, %v2769_v17 }
 0x324   : > { %2738 = vrot.lane.b32.xlu0 %v6568_v45, %s5274_s15 }
 0x325   : > { %2736 = vrot.lane.b32.xlu2 %v6476_v36, %s5274_s15  ;;  %v1908_v26 = vpop.permute.xlu1 %1907  ;;  %v2156_v42 = vpop.f32.mrf.mxu0 }
 0x326   : > { %1975 = vst.msk [vmem:[#allocation3 + $0xe8] sm:$0xff] %vm1945_vm11, %v1908_v26  ;;  %v2157_v3 = vadd.f32 %v6514_v57, %v2156_v42  ;;  %v1514_v36 = vpop.permute.xlu0 %1513 }
 0x327   : > { %v946_v16 = vpop.permute.xlu2 %945  ;;  %1585 = vst.msk [vmem:[#allocation3 + $0xc8] sm:$0xff] %vm1559_vm9, %v1514_v36 }
 0x328   : > { %2250 = vst.msk [vmem:[#allocation6 + $0x109] sm:$0xff] %vm270_vm13, %v2157_v3  ;;  %v5090_v3 = vld [vmem:[%s7624_s3 + $0x8] sm:$0xff] }
 0x329   : > { %1778 = vst.msk [vmem:[#allocation3 + $0xc8] sm:$0xff] %vm1752_vm10, %v1707_v25  ;;  %v2887_v19 = vld [vmem:[#allocation5 + $0x38] sm:$0xff]  ;;  %v5093_v25 = vld [vmem:[%s7624_s3 + $0x20] sm:$0xff] }
 0x32a   : > { %v2899_v5 = vpack.c.bf16 %v2887_v19, %v2885_v2  ;;  %2974 = vmatpush.bf16.msra.mxu1 %v5093_v25 }
 0x32b   : > { %2786 = vrot.lane.b32.xlu1 %v6566_v41, %s5275_s16  ;;  %v2006_v41 = vld [vmem:[#allocation3 + $0xe0] sm:$0xff] }
 0x32c   : > { %2835 = vrot.lane.b32.xlu0 %v2670_v58, %s5276_s30  ;;  %4904 = vmatmul.msk.bf16.gmra.mxu2 %vm270_vm13, %v2899_v5 }
 0x32d   : > { %2788 = vrot.lane.b32.xlu2 %v2769_v17, %s5275_s16  ;;  %v1705_v31 = vpop.permute.xlu1 %1704  ;;  %v2158_v32 = vpop.f32.mrf.mxu0  ;;  %v2007_v62 = vld [vmem:[#allocation3 + $0xe8] sm:$0xff] }
 0x32e   : > { %1777 = vst.msk [vmem:[#allocation3 + $0xc0] sm:$0xff] %vm1752_vm10, %v1705_v31  ;;  %v2159_v63 = vadd.f32 %v6514_v57, %v2158_v32  ;;  %v2024_v40 = vpack.c.bf16 %v2007_v62, %v2006_v41  ;;  %v1898_v27 = vpop.permute.xlu0 %1897  ;;  %2975 = vmatpush.bf16.msra.mxu1 %v5092_v4  ;;  %v2272_v31 = vld [vmem:[#allocation6 + $0xf0] ss:$2 sm:$0xff]  ;;  %v2288_v32 = vld [vmem:[#allocation6 + $0xf1] ss:$2 sm:$0xff] }
 0x32f   : > { %v1330_v35 = vpop.permute.xlu2 %1329  ;;  %1970 = vst.msk [vmem:[#allocation3 + $0xc0] sm:$0xff] %vm1945_vm11, %v1898_v27  ;;  %v5089_v62 = vld [vmem:[%s7624_s3] sm:$0xff] }
 0x330   : > { %2251 = vst.msk [vmem:[#allocation6 + $0x111] sm:$0xff] %vm270_vm13, %v2159_v63  ;;  %4865 = vmatmul.msk.bf16.gmra.mxu3 %vm2044_vm12, %v2024_v40  ;;  %v2298_v40 = vmax.f32 %v2272_v31, %v2288_v32 }
 0x333   : > { %2837 = vrot.lane.b32.xlu1 %v2818_v47, %s5276_s30 }
 0x334   : > { %2546 = vrot.lane.b32.xlu0 %v2818_v47, %s5266_s13 }
 0x335   : > { %2544 = vrot.lane.b32.xlu2 %v2670_v58, %s5266_s13  ;;  %v1900_v29 = vpop.permute.xlu1 %1899  ;;  %v5091_v58 = vld [vmem:[%s7624_s3 + $0x10] sm:$0xff] }
 0x336   : > { %1971 = vst.msk [vmem:[#allocation3 + $0xc8] sm:$0xff] %vm1945_vm11, %v1900_v29  ;;  %v753_v0 = vpop.permute.xlu0 %752  ;;  %v2002_v9 = vld [vmem:[#allocation3 + $0xc0] sm:$0xff]  ;;  %2976 = vmatpush.bf16.msra.mxu1 %v5091_v58 }
 0x337   : > { %v1526_v33 = vpop.permute.xlu2 %1525  ;;  %818 = vst.msk [vmem:[#allocation3 + $0xf8] sm:$0xff] %vm786_vm4, %v753_v0  ;;  %vm2756_vm4 = vcmask 786048   ;;  %v2335_v2 = vld [vmem:[#allocation6 + $0x108] ss:$2 sm:$0xff] }
 0x338   : > { %1011 = vst.msk [vmem:[#allocation3 + $0xf8] sm:$0xff] %vm979_vm6, %v946_v16 }
 0x33a   : > { %2977 = vmatpush.bf16.msra.mxu1 %v5090_v3 }
 0x33b   : > { %2593 = vrot.lane.b32.xlu1 %v6568_v45, %s5270_s17 }
 0x33c   : > { %2642 = vrot.lane.b32.xlu0 %v2769_v17, %s5272_s12 }
 0x33d   : > { %2595 = vrot.lane.b32.xlu2 %v6665_v59, %s5270_s17  ;;  %v944_v8 = vpop.permute.xlu1 %943  ;;  %v2003_v61 = vld [vmem:[#allocation3 + $0xc8] sm:$0xff] }
 0x33e   : > { %1010 = vst.msk [vmem:[#allocation3 + $0xf0] sm:$0xff] %vm979_vm6, %v944_v8  ;;  %v2022_v45 = vpack.c.bf16 %v2003_v61, %v2002_v9  ;;  %v1137_v34 = vpop.permute.xlu0 %1136  ;;  %2978 = vmatpush.bf16.msra.mxu1 %v5089_v62  ;;  %vm2855_vm6 = vcmask 1048448   ;;  %v2359_v8 = vld [vmem:[#allocation6 + $0x109] ss:$2 sm:$0xff] }
 0x33f   : > { %v1910_v56 = vpop.permute.xlu2 %1909  ;;  %1203 = vst.msk [vmem:[#allocation3 + $0xf0] sm:$0xff] %vm1172_vm7, %v1137_v34 }
 0x340   : > { %4863 = vmatmul.msk.bf16.gmra.mxu0 %vm2044_vm12, %v2022_v45  ;;  %1396 = vst.msk [vmem:[#allocation3 + $0xf0] sm:$0xff] %vm1365_vm8, %v1330_v35 }
 0x345   : > { %2691 = vrot.lane.b32.xlu2 %v2818_v47, %s5273_s14  ;;  %v1139_v60 = vpop.permute.xlu1 %1138  ;;  %v2312_v47 = vld [vmem:[#allocation6 + $0xf2] ss:$2 sm:$0xff] }
 0x346   : > { %1204 = vst.msk [vmem:[#allocation3 + $0xf8] sm:$0xff] %vm1172_vm7, %v1139_v60  ;;  %v1332_v15 = vpop.permute.xlu0 %1331  ;;  %v2322_v19 = vmax.f32 %v2298_v40, %v2312_v47 }
 0x347   : > { %v2539_v39 = vpop.permute.xlu2 %2538  ;;  %1397 = vst.msk [vmem:[#allocation3 + $0xf8] sm:$0xff] %vm1365_vm8, %v1332_v15 }
 0x348   : > { %2562 = vst.msk [vmem:[#allocation5 + $0x10] sm:$0xff] %vm2560_vm0, %v2539_v39 }
 0x349   : > { %1591 = vst.msk [vmem:[#allocation3 + $0xf8] sm:$0xff] %vm1559_vm9, %v1526_v33  ;;  %v2345_v33 = vmax.f32 %v2322_v19, %v2335_v2 }
 0x34b   : > { %v2369_v61 = vmax.f32 %v2345_v33, %v2359_v8 }
 0x34d   : > { %v1524_v30 = vpop.permute.xlu1 %1523 }
 0x34e   : > { %1590 = vst.msk [vmem:[#allocation3 + $0xf0] sm:$0xff] %vm1559_vm9, %v1524_v30  ;;  %v1717_v38 = vpop.permute.xlu0 %1716 }
 0x34f   : > { %v2635_v37 = vpop.permute.xlu2 %2634  ;;  %1783 = vst.msk [vmem:[#allocation3 + $0xf0] sm:$0xff] %vm1752_vm10, %v1717_v38 }
 0x350   : > { %1976 = vst.msk [vmem:[#allocation3 + $0xf0] sm:$0xff] %vm1945_vm11, %v1910_v56  ;;  %v2383_v56 = vld [vmem:[#allocation6 + $0x10a] ss:$2 sm:$0xff] }
 0x351   : > { %v2393_v34 = vmax.f32 %v2369_v61, %v2383_v56 }
 0x355   : > { %v1719_v23 = vpop.permute.xlu1 %1718 }
 0x356   : > { %1784 = vst.msk [vmem:[#allocation3 + $0xf8] sm:$0xff] %vm1752_vm10, %v1719_v23  ;;  %v1912_v11 = vpop.permute.xlu0 %1911 }
 0x357   : > { %v2686_v44 = vpop.permute.xlu2 %2685  ;;  %1977 = vst.msk [vmem:[#allocation3 + $0xf8] sm:$0xff] %vm1945_vm11, %v1912_v11  ;;  %v2008_v28 = vld [vmem:[#allocation3 + $0xf0] sm:$0xff] }
 0x35d   : > { %v2537_v22 = vpop.permute.xlu1 %2536 }
 0x35e   : > { %2561 = vst.msk [vmem:[#allocation5] sm:$0xff] %vm2560_vm0, %v2537_v22  ;;  %v2586_v20 = vpop.permute.xlu0 %2585  ;;  %v2009_v46 = vld [vmem:[#allocation3 + $0xf8] sm:$0xff] }
 0x35f   : > { %v2783_v53 = vpop.permute.xlu2 %2782  ;;  %2610 = vst.msk [vmem:[#allocation5] sm:$0xff] %vm2609_vm1, %v2586_v20  ;;  %v2025_v48 = vpack.c.bf16 %v2009_v46, %v2008_v28 }
 0x360   : > { %2659 = vst.msk [vmem:[#allocation5] sm:$0xff] %vm2658_vm2, %v2635_v37 }
 0x361   : > { %4866 = vmatmul.msk.bf16.gmra.mxu3 %vm2044_vm12, %v2025_v48 }
 0x365   : > { %v2588_v10 = vpop.permute.xlu1 %2587 }
 0x366   : > { %2611 = vst.msk [vmem:[#allocation5 + $0x10] sm:$0xff] %vm2609_vm1, %v2588_v10  ;;  %v2171_v1 = vpop.f32.mrf.mxu3  ;;  %v2637_v7 = vpop.permute.xlu0 %2636 }
 0x367   : > { %v2834_v50 = vpop.permute.xlu2 %2833  ;;  %v2172_v18 = vadd.f32 %v6514_v57, %v2171_v1  ;;  %2660 = vst.msk [vmem:[#allocation5 + $0x10] sm:$0xff] %vm2658_vm2, %v2637_v7 }
 0x368   : > { %2709 = vst.msk [vmem:[#allocation5 + $0x10] sm:$0xff] %vm2707_vm3, %v2686_v44 }
 0x369   : > { %2256 = vst.msk [vmem:[#allocation6 + $0x151] sm:$0xff] %vm270_vm13, %v2172_v18 }
 0x36d   : > { %v2684_v55 = vpop.permute.xlu1 %2683 }
 0x36e   : > { %2708 = vst.msk [vmem:[#allocation5] sm:$0xff] %vm2707_vm3, %v2684_v55  ;;  %v2173_v42 = vpop.f32.mrf.mxu3  ;;  %v2161_v17 = vpop.f32.mrf.mxu0 }
 0x36f   : > { %v2590_v26 = vpop.permute.xlu2 %2589  ;;  %v2174_v16 = vadd.f32 %v6514_v57, %v2173_v42  ;;  %v2733_v36 = vpop.permute.xlu0 %2732  ;;  %v2162_v41 = vadd.f32 %v6514_v57, %v2161_v17 }
 0x370   : > { %2757 = vst.msk [vmem:[#allocation5] sm:$0xff] %vm2756_vm4, %v2733_v36 }
 0x371   : > { %2257 = vst.msk [vmem:[#allocation6 + $0x159] sm:$0xff] %vm270_vm13, %v2174_v16 }
 0x372   : > { %2252 = vst.msk [vmem:[#allocation6 + $0x121] sm:$0xff] %vm270_vm13, %v2162_v41 }
 0x373   : > { %2807 = vst.msk [vmem:[#allocation5] sm:$0xff] %vm2806_vm5, %v2783_v53 }
 0x375   : > { %v2735_v63 = vpop.permute.xlu1 %2734 }
 0x376   : > { %2758 = vst.msk [vmem:[#allocation5 + $0x10] sm:$0xff] %vm2756_vm4, %v2735_v63  ;;  %v2163_v5 = vpop.f32.mrf.mxu0 }
 0x377   : > { %v2641_v35 = vpop.permute.xlu2 %2640  ;;  %v2785_v27 = vpop.permute.xlu0 %2784  ;;  %v2164_v29 = vadd.f32 %v6514_v57, %v2163_v5 }
 0x378   : > { %2808 = vst.msk [vmem:[#allocation5 + $0x10] sm:$0xff] %vm2806_vm5, %v2785_v27 }
 0x379   : > { %2253 = vst.msk [vmem:[#allocation6 + $0x129] sm:$0xff] %vm270_vm13, %v2164_v29 }
 0x37a   : > { %2857 = vst.msk [vmem:[#allocation5 + $0x10] sm:$0xff] %vm2855_vm6, %v2834_v50 }
 0x37d   : > { %v2832_v0 = vpop.permute.xlu1 %2831 }
 0x37e   : > { %2856 = vst.msk [vmem:[#allocation5] sm:$0xff] %vm2855_vm6, %v2832_v0 }
 0x37f   : > { %v2737_v9 = vpop.permute.xlu2 %2736  ;;  %v2541_v45 = vpop.permute.xlu0 %2540 }
 0x380   : > { %2563 = vst.msk [vmem:[#allocation5 + $0x20] sm:$0xff] %vm2560_vm0, %v2541_v45  ;;  %v2407_v60 = vld [vmem:[#allocation6 + $0x120] ss:$2 sm:$0xff]  ;;  %v2431_v37 = vld [vmem:[#allocation6 + $0x121] ss:$2 sm:$0xff] }
 0x381   : > { %v2417_v15 = vmax.f32 %v2393_v34, %v2407_v60  ;;  %2612 = vst.msk [vmem:[#allocation5 + $0x20] sm:$0xff] %vm2609_vm1, %v2590_v26  ;;  %v2882_v30 = vld [vmem:[#allocation5 + $0x10] sm:$0xff]  ;;  %v2274_v40 = vld [vmem:[#allocation6 + $0x120] ss:$2 sm:$0xff] }
 0x382   : > { %v2455_v11 = vld [vmem:[#allocation6 + $0x122] ss:$2 sm:$0xff]  ;;  %v2433_v45 = vld [vmem:[#allocation6 + $0x151] ss:$2 sm:$0xff]  ;;  %v2457_v34 = vld [vmem:[#allocation6 + $0x152] ss:$2 sm:$0xff] }
 0x383   : > { %v2441_v44 = vmax.f32 %v2417_v15, %v2431_v37  ;;  %v2314_v2 = vld [vmem:[#allocation6 + $0x122] ss:$2 sm:$0xff] }
 0x384   : > { %v2276_v37 = vld [vmem:[#allocation6 + $0x150] ss:$2 sm:$0xff] }
 0x385   : > { %v2543_v39 = vpop.permute.xlu1 %2542  ;;  %v2880_v12 = vld [vmem:[#allocation5] sm:$0xff]  ;;  %v6760_v22 = vmax.f32 %v2441_v44, %v2455_v11 }
 0x386   : > { %2564 = vst.msk [vmem:[#allocation5 + $0x30] sm:$0xff] %vm2560_vm0, %v2543_v39  ;;  %v2896_v23 = vpack.c.bf16 %v2882_v30, %v2880_v12 }
 0x387   : > { %v2789_v38 = vpop.permute.xlu2 %2788  ;;  %3073 = vst.msk [vmem:[#allocation5] sm:$0xff] %vm270_vm13, %v6688_v6  ;;  %v2592_v43 = vpop.permute.xlu0 %2591  ;;  %v2473_v53 = vmax.f32 %v6760_v22, 0.0 }
 0x388   : > { %2979 = vmatmul.bf16.vlgmr.msra.gmra.mxu1 %v2896_v23  ;;  %2613 = vst.msk [vmem:[#allocation5 + $0x30] sm:$0xff] %vm2609_vm1, %v2592_v43 }
 0x389   : > { %2662 = vst.msk [vmem:[#allocation5 + $0x30] sm:$0xff] %vm2658_vm2, %v2641_v35  ;;  %v2290_v35 = vld [vmem:[#allocation6 + $0x121] ss:$2 sm:$0xff] }
 0x38a   : > { %2482 = vst.msk [vmem:[#allocation4 + $0x61] sm:$0xff] %vm270_vm13, %v2473_v53  ;;  %v2299_v47 = vmax.f32 %v2274_v40, %v2290_v35 }
 0x38c   : > { %v2323_v19 = vmax.f32 %v2299_v47, %v2314_v2 }
 0x38d   : > { %v2639_v14 = vpop.permute.xlu1 %2638 }
 0x38e   : > { %2661 = vst.msk [vmem:[#allocation5 + $0x20] sm:$0xff] %vm2658_vm2, %v2639_v14  ;;  %v2316_v14 = vld [vmem:[#allocation6 + $0x152] ss:$2 sm:$0xff] }
 0x38f   : > { %v2545_v28 = vpop.permute.xlu2 %2544  ;;  %v2688_v6 = vpop.permute.xlu0 %2687 }
 0x390   : > { %2565 = vst.msk [vmem:[#allocation5 + $0x40] sm:$0xff] %vm2560_vm0, %v2545_v28 }
 0x391   : > { %2710 = vst.msk [vmem:[#allocation5 + $0x20] sm:$0xff] %vm2707_vm3, %v2688_v6  ;;  %v2623_v46 = vld [vmem:[#allocation4 + $0x60] sm:$0xff] }
 0x392   : > { %2759 = vst.msk [vmem:[#allocation5 + $0x20] sm:$0xff] %vm2756_vm4, %v2737_v9  ;;  %v6770_v48 = vld [vmem:[#allocation4 + $0x62] sm:$0xff]  ;;  %2644 = vrot.lane.b32.xlu1 %v2623_v46, %s5272_s12  ;;  %v2409_v9 = vld [vmem:[#allocation6 + $0x150] ss:$2 sm:$0xff] }
 0x393   : > { %v6772_v25 = vld [vmem:[#allocation4 + $0x61] sm:$0xff]  ;;  %2742 = vrot.lane.b32.xlu2 %v6770_v48, %s5274_s15  ;;  %2876 = vst.msk [vmem:[#allocation5 + $0x48] sm:$0xff] %vm270_vm13, %v6770_v48 }
 0x394   : > { %2693 = vrot.lane.b32.xlu0 %v6772_v25, %s5273_s14  ;;  %2518 = vst.msk [vmem:[#allocation5 + $0x60] sm:$0xff] %vm270_vm13, %v2623_v46 }
 0x395   : > { %v2690_v20 = vpop.permute.xlu1 %2689 }
 0x396   : > { %2711 = vst.msk [vmem:[#allocation5 + $0x30] sm:$0xff] %vm2707_vm3, %v2690_v20 }
 0x397   : > { %v2739_v10 = vpop.permute.xlu0 %2738  ;;  %v2596_v7 = vpop.permute.xlu2 %2595 }
 0x398   : > { %2760 = vst.msk [vmem:[#allocation5 + $0x30] sm:$0xff] %vm2756_vm4, %v2739_v10 }
 0x399   : > { %2810 = vst.msk [vmem:[#allocation5 + $0x30] sm:$0xff] %vm2806_vm5, %v2789_v38  ;;  %v2292_v38 = vld [vmem:[#allocation6 + $0x151] ss:$2 sm:$0xff] }
 0x39a   : > { %2740 = vrot.lane.b32.xlu1 %v6665_v59, %s5274_s15  ;;  %v2300_v11 = vmax.f32 %v2276_v37, %v2292_v38  ;;  %v2889_v43 = vld [vmem:[#allocation5 + $0x48] sm:$0xff]  ;;  %v5106_v37 = vld [vmem:[%s7624_s3 + $0x88] sm:$0xff] }
 0x39b   : > { %2839 = vrot.lane.b32.xlu2 %v6772_v25, %s5276_s30  ;;  %3560 = vmatpush.bf16.msrb.mxu2 %v5106_v37 }
 0x39c   : > { %2790 = vrot.lane.b32.xlu0 %v2623_v46, %s5275_s16  ;;  %v2324_v20 = vmax.f32 %v2300_v11, %v2316_v14 }
 0x39d   : > { %v2787_v50 = vpop.permute.xlu1 %2786 }
 0x39e   : > { %2809 = vst.msk [vmem:[#allocation5 + $0x20] sm:$0xff] %vm2806_vm5, %v2787_v50 }
 0x39f   : > { %v2836_v1 = vpop.permute.xlu0 %2835  ;;  %v2692_v3 = vpop.permute.xlu2 %2691 }
 0x3a0   : > { %2858 = vst.msk [vmem:[#allocation5 + $0x20] sm:$0xff] %vm2855_vm6, %v2836_v1 }
 0x3a5   : > { %v2838_v18 = vpop.permute.xlu1 %2837 }
 0x3a6   : > { %2859 = vst.msk [vmem:[#allocation5 + $0x30] sm:$0xff] %vm2855_vm6, %v2838_v18 }
 0x3a7   : > { %v2547_v4 = vpop.permute.xlu0 %2546  ;;  %v2884_v55 = vld [vmem:[#allocation5 + $0x20] sm:$0xff] }
 0x3a8   : > { %2566 = vst.msk [vmem:[#allocation5 + $0x50] sm:$0xff] %vm2560_vm0, %v2547_v4 }
 0x3a9   : > { %2615 = vst.msk [vmem:[#allocation5 + $0x50] sm:$0xff] %vm2609_vm1, %v2596_v7  ;;  %v6828_v7 = vld [vmem:[#allocation4 + $0x92] sm:$0xff] }
 0x3aa   : > { %2879 = vst.msk [vmem:[#allocation5 + $0x78] sm:$0xff] %vm270_vm13, %v6828_v7 }
 0x3ad   : > { %v2594_v58 = vpop.permute.xlu1 %2593  ;;  %v2886_v59 = vld [vmem:[#allocation5 + $0x30] sm:$0xff] }
 0x3ae   : > { %2614 = vst.msk [vmem:[#allocation5 + $0x40] sm:$0xff] %vm2609_vm1, %v2594_v58  ;;  %v2898_v26 = vpack.c.bf16 %v2886_v59, %v2884_v55 }
 0x3af   : > { %v2643_v42 = vpop.permute.xlu0 %2642 }
 0x3b0   : > { %2984 = vmatmul.bf16.gmra.mxu1 %v2898_v26  ;;  %2663 = vst.msk [vmem:[#allocation5 + $0x40] sm:$0xff] %vm2658_vm2, %v2643_v42 }
 0x3b1   : > { %2712 = vst.msk [vmem:[#allocation5 + $0x40] sm:$0xff] %vm2707_vm3, %v2692_v3  ;;  %v2895_v26 = vld [vmem:[#allocation5 + $0x78] sm:$0xff] }
 0x3b2   : > { %3432 = vst.msk [vmem:[#allocation5 + $0x78] sm:$0xff] %vm270_vm13, %v6828_v7 }
 0x3b3   : > { %v2176_v16 = vpop.f32.mrf.mxu3 }
 0x3b4   : > { %v2177_v17 = vadd.f32 %v6514_v57, %v2176_v16  ;;  %v6843_v16 = vld [vmem:[%s7625_s4] ss:$0 sm:$0xff] }
 0x3b6   : > { %2258 = vst.msk [vmem:[#allocation6 + $0x169] sm:$0xff] %vm270_vm13, %v2177_v17  ;;  %v3009_v17 = vpop.f32.mrf.mxu2 }
 0x3bb   : > { %v2178_v36 = vpop.f32.mrf.mxu3 }
 0x3bc   : > { %v2179_v31 = vadd.f32 %v6514_v57, %v2178_v36 }
 0x3bd   : > { %v2166_v32 = vpop.f32.mrf.mxu0 }
 0x3be   : > { %2259 = vst.msk [vmem:[#allocation6 + $0x171] sm:$0xff] %vm270_vm13, %v2179_v31  ;;  %v2167_v41 = vadd.f32 %v6514_v57, %v2166_v32 }
 0x3c0   : > { %2254 = vst.msk [vmem:[#allocation6 + $0x139] sm:$0xff] %vm270_vm13, %v2167_v41 }
 0x3c5   : > { %v2168_v62 = vpop.f32.mrf.mxu0  ;;  %v2339_v28 = vld [vmem:[#allocation6 + $0x168] ss:$2 sm:$0xff]  ;;  %v2363_v1 = vld [vmem:[#allocation6 + $0x169] ss:$2 sm:$0xff] }
 0x3c6   : > { %v2169_v63 = vadd.f32 %v6514_v57, %v2168_v62  ;;  %v2347_v10 = vmax.f32 %v2324_v20, %v2339_v28 }
 0x3c8   : > { %2255 = vst.msk [vmem:[#allocation6 + $0x141] sm:$0xff] %vm270_vm13, %v2169_v63  ;;  %v2371_v18 = vmax.f32 %v2347_v10, %v2363_v1 }
 0x3cf   : > { %v2337_v5 = vld [vmem:[#allocation6 + $0x138] ss:$2 sm:$0xff]  ;;  %v2361_v29 = vld [vmem:[#allocation6 + $0x139] ss:$2 sm:$0xff] }
 0x3d0   : > { %v2346_v27 = vmax.f32 %v2323_v19, %v2337_v5  ;;  %v2385_v0 = vld [vmem:[#allocation6 + $0x13a] ss:$2 sm:$0xff] }
 0x3d2   : > { %v2370_v33 = vmax.f32 %v2346_v27, %v2361_v29  ;;  %v3011_v27 = vpop.f32.mrf.mxu2 }
 0x3d4   : > { %v2394_v8 = vmax.f32 %v2370_v33, %v2385_v0 }
 0x3d6   : > { %v2418_v61 = vmax.f32 %v2394_v8, %v2409_v9 }
 0x3d8   : > { %v2442_v56 = vmax.f32 %v2418_v61, %v2433_v45 }
 0x3da   : > { %v6806_v60 = vmax.f32 %v2442_v56, %v2457_v34  ;;  %v6866_v34 = vld [vmem:[#allocation4 + $0x91] sm:$0xff] }
 0x3dc   : > { %v2474_v39 = vmax.f32 %v6806_v60, 0.0 }
 0x3de   : > { %2483 = vst.msk [vmem:[#allocation4 + $0x71] sm:$0xff] %vm270_vm13, %v2474_v39  ;;  %v6868_v39 = vld [vmem:[#allocation4 + $0x90] sm:$0xff] }
 0x3e4   : > { %v2181_v23 = vpop.f32.mrf.mxu3 }
 0x3e5   : > { %v2771_v15 = vld [vmem:[#allocation4 + $0x70] sm:$0xff]  ;;  %v2182_v44 = vadd.f32 %v6514_v57, %v2181_v23 }
 0x3e6   : > { %v2527_v12 = vld [vmem:[#allocation4 + $0x71] sm:$0xff]  ;;  %2792 = vrot.lane.b32.xlu1 %v2771_v15, %s5275_s16  ;;  %2519 = vst.msk [vmem:[#allocation5 + $0x70] sm:$0xff] %vm270_vm13, %v2771_v15 }
 0x3e7   : > { %v6810_v30 = vld [vmem:[#allocation4 + $0x72] sm:$0xff]  ;;  %2550 = vrot.lane.b32.xlu2 %v2527_v12, %s5266_s13  ;;  %2841 = vrot.lane.b32.xlu0 %v2527_v12, %s5276_s30  ;;  %2260 = vst.msk [vmem:[#allocation6 + $0x181] sm:$0xff] %vm270_vm13, %v2182_v44  ;;  %v3014_v44 = vpop.f32.mrf.mxu2 }
 0x3e8   : > { %2877 = vst.msk [vmem:[#allocation5 + $0x58] sm:$0xff] %vm270_vm13, %v6810_v30 }
 0x3ec   : > { %v2183_v46 = vpop.f32.mrf.mxu3 }
 0x3ed   : > { %v2184_v50 = vadd.f32 %v6514_v57, %v2183_v46  ;;  %v2743_v32 = vpop.permute.xlu2 %2742 }
 0x3ee   : > { %2548 = vrot.lane.b32.xlu1 %v6772_v25, %s5266_s13  ;;  %v2387_v25 = vld [vmem:[#allocation6 + $0x16a] ss:$2 sm:$0xff] }
 0x3ef   : > { %v2891_v53 = vld [vmem:[#allocation5 + $0x58] sm:$0xff]  ;;  %2646 = vrot.lane.b32.xlu2 %v2771_v15, %s5272_s12  ;;  %2597 = vrot.lane.b32.xlu0 %v6770_v48, %s5270_s17  ;;  %2261 = vst.msk [vmem:[#allocation6 + $0x189] sm:$0xff] %vm270_vm13, %v2184_v50  ;;  %v2395_v48 = vmax.f32 %v2371_v18, %v2387_v25  ;;  %v3016_v28 = vpop.f32.mrf.mxu2 }
 0x3f0   : > { %v2901_v6 = vpack.c.bf16 %v2891_v53, %v2889_v43 }
 0x3f2   : > { %4905 = vmatmul.msk.bf16.gmra.mxu2 %vm270_vm13, %v2901_v6 }
 0x3f5   : > { %v2840_v8 = vpop.permute.xlu2 %2839 }
 0x3f6   : > { %2599 = vrot.lane.b32.xlu1 %v6810_v30, %s5270_s17  ;;  %v2411_v4 = vld [vmem:[#allocation6 + $0x180] ss:$2 sm:$0xff]  ;;  %v2435_v55 = vld [vmem:[#allocation6 + $0x181] ss:$2 sm:$0xff] }
 0x3f7   : > { %v2419_v58 = vmax.f32 %v2395_v48, %v2411_v4  ;;  %v2459_v57 = vld [vmem:[#allocation6 + $0x182] ss:$2 sm:$0xff] }
 0x3f9   : > { %v2443_v59 = vmax.f32 %v2419_v58, %v2435_v55 }
 0x3fb   : > { %v6837_v42 = vmax.f32 %v2443_v59, %v2459_v57 }
 0x3fd   : > { %v2475_v3 = vmax.f32 %v6837_v42, 0.0 }
 0x3fe   : > { %2695 = vrot.lane.b32.xlu1 %v2527_v12, %s5273_s14 }
 0x3ff   : > { %2484 = vst.msk [vmem:[#allocation4 + $0x81] sm:$0xff] %vm270_vm13, %v2475_v3 }
 0x404   : > { %v2645_v41 = vpop.permute.xlu1 %2644 }
 0x405   : > { %v2980_v36 = vpop.f32.mrf.mxu1  ;;  %2664 = vst.msk [vmem:[#allocation5 + $0x50] sm:$0xff] %vm2658_vm2, %v2645_v41 }
 0x406   : > { %v2981_v31 = vadd.f32 %v6843_v16, %v2980_v36  ;;  %v2694_v63 = vpop.permute.xlu0 %2693  ;;  %v2723_v40 = vld [vmem:[#allocation4 + $0x82] sm:$0xff] }
 0x407   : > { %v2674_v35 = vld [vmem:[#allocation4 + $0x81] sm:$0xff]  ;;  %2713 = vst.msk [vmem:[#allocation5 + $0x50] sm:$0xff] %vm2707_vm3, %v2694_v63  ;;  %2746 = vrot.lane.b32.xlu1 %v2723_v40, %s5274_s15 }
 0x408   : > { %v3010_v62 = vadd.f32 %v3009_v17, %v2981_v31  ;;  %v2625_v47 = vld [vmem:[#allocation4 + $0x80] sm:$0xff]  ;;  %2697 = vrot.lane.b32.xlu2 %v2674_v35, %s5273_s14  ;;  %2762 = vst.msk [vmem:[#allocation5 + $0x50] sm:$0xff] %vm2756_vm4, %v2743_v32 }
 0x409   : > { %2648 = vrot.lane.b32.xlu0 %v2625_v47, %s5272_s12  ;;  %2878 = vst.msk [vmem:[#allocation5 + $0x68] sm:$0xff] %vm270_vm13, %v2723_v40 }
 0x40a   : > { %v3029_v2 = vmax.f32 %v3010_v62, 0.0 }
 0x40c   : > { %3037 = vst.msk [vmem:[#allocation4 + $0x11] sm:$0xff] %vm270_vm13, %v3029_v2  ;;  %v2741_v29 = vpop.permute.xlu1 %2740 }
 0x40d   : > { %v2982_v19 = vpop.f32.mrf.mxu1  ;;  %2761 = vst.msk [vmem:[#allocation5 + $0x40] sm:$0xff] %vm2756_vm4, %v2741_v29 }
 0x40e   : > { %v2983_v5 = vadd.f32 %v6843_v16, %v2982_v19  ;;  %v2791_v0 = vpop.permute.xlu0 %2790 }
 0x40f   : > { %2811 = vst.msk [vmem:[#allocation5 + $0x40] sm:$0xff] %vm2806_vm5, %v2791_v0  ;;  %2843 = vrot.lane.b32.xlu1 %v2674_v35, %s5276_s30 }
 0x410   : > { %v3012_v33 = vadd.f32 %v3011_v27, %v2983_v5  ;;  %2794 = vrot.lane.b32.xlu2 %v2625_v47, %s5275_s16  ;;  %2860 = vst.msk [vmem:[#allocation5 + $0x40] sm:$0xff] %vm2855_vm6, %v2840_v8  ;;  %v2893_v45 = vld [vmem:[#allocation5 + $0x68] sm:$0xff]  ;;  %v5105_v5 = vld [vmem:[%s7624_s3 + $0x80] sm:$0xff]  ;;  %v5103_v8 = vld [vmem:[%s7624_s3 + $0x70] sm:$0xff] }
 0x411   : > { %2744 = vrot.lane.b32.xlu0 %v6810_v30, %s5274_s15  ;;  %v2903_v56 = vpack.c.bf16 %v2895_v26, %v2893_v45  ;;  %3524 = vmatpush.bf16.msrb.mxu3 %v5105_v5 }
 0x412   : > { %v3030_v9 = vmax.f32 %v3012_v33, 0.0  ;;  %v5104_v33 = vld [vmem:[%s7624_s3 + $0x78] sm:$0xff] }
 0x413   : > { %v3177_v61 = vld [vmem:[#allocation4 + $0x10] sm:$0xff]  ;;  %4906 = vmatmul.msk.bf16.gmra.mxu2 %vm270_vm13, %v2903_v56 }
 0x414   : > { %3038 = vst.msk [vmem:[#allocation4 + $0x21] sm:$0xff] %vm270_vm13, %v3030_v9  ;;  %v3082_v15 = vld [vmem:[#allocation4 + $0x11] sm:$0xff] }
 0x415   : > { %3074 = vst.msk [vmem:[#allocation5 + $0x10] sm:$0xff] %vm270_vm13, %v3177_v61  ;;  %v3130_v23 = vld [vmem:[#allocation4 + $0x12] sm:$0xff]  ;;  %3525 = vmatpush.bf16.msrb.mxu3 %v5104_v33 }
 0x417   : > { %3099 = vrot.lane.b32.xlu1 %v3082_v15, %s5266_s13  ;;  %v2888_v58 = vld [vmem:[#allocation5 + $0x40] sm:$0xff] }
 0x418   : > { %2845 = vrot.lane.b32.xlu2 %v6866_v34, %s5276_s30 }
 0x419   : > { %2796 = vrot.lane.b32.xlu0 %v6868_v39, %s5275_s16  ;;  %3526 = vmatpush.bf16.msrb.mxu3 %v5103_v8 }
 0x41b   : > { %v3178_v12 = vld [vmem:[#allocation4 + $0x20] sm:$0xff] }
 0x41c   : > { %v3274_v30 = vld [vmem:[#allocation4 + $0x22] sm:$0xff]  ;;  %3075 = vst.msk [vmem:[#allocation5 + $0x20] sm:$0xff] %vm270_vm13, %v3178_v12 }
 0x41d   : > { %3425 = vst.msk [vmem:[#allocation5 + $0x8] sm:$0xff] %vm270_vm13, %v3274_v30  ;;  %v3226_v38 = vld [vmem:[#allocation4 + $0x21] sm:$0xff] }
 0x41f   : > { %3193 = vrot.lane.b32.xlu1 %v3177_v61, %s5272_s12  ;;  %v5102_v61 = vld [vmem:[%s7624_s3 + $0x68] sm:$0xff] }
 0x420   : > { %3145 = vrot.lane.b32.xlu2 %v6588_v54, %s5270_s17  ;;  %3527 = vmatpush.bf16.msrb.mxu3 %v5102_v61 }
 0x421   : > { %3097 = vrot.lane.b32.xlu0 %v6585_v49, %s5266_s13 }
 0x424   : > { %v3434_v48 = vld [vmem:[#allocation5 + $0x8] sm:$0xff] }
 0x427   : > { %3243 = vrot.lane.b32.xlu1 %v3226_v38, %s5273_s14 }
 0x428   : > { %3195 = vrot.lane.b32.xlu2 %v3178_v12, %s5272_s12 }
 0x429   : > { %3147 = vrot.lane.b32.xlu0 %v3130_v23, %s5270_s17 }
 0x42d   : > { %v2985_v11 = vpop.f32.mrf.mxu1 }
 0x42e   : > { %v2986_v54 = vadd.f32 %v6843_v16, %v2985_v11 }
 0x42f   : > { %3337 = vrot.lane.b32.xlu1 %v3178_v12, %s5275_s16 }
 0x430   : > { %v3015_v43 = vadd.f32 %v3014_v44, %v2986_v54  ;;  %3289 = vrot.lane.b32.xlu2 %v3130_v23, %s5274_s15  ;;  %v5099_v54 = vld [vmem:[%s7624_s3 + $0x50] sm:$0xff] }
 0x431   : > { %3241 = vrot.lane.b32.xlu0 %v3082_v15, %s5273_s14  ;;  %v5101_v15 = vld [vmem:[%s7624_s3 + $0x60] sm:$0xff] }
 0x432   : > { %v3031_v53 = vmax.f32 %v3015_v43, 0.0  ;;  %3528 = vmatpush.bf16.msrb.mxu3 %v5101_v15 }
 0x434   : > { %3039 = vst.msk [vmem:[#allocation4 + $0x31] sm:$0xff] %vm270_vm13, %v3031_v53  ;;  %v5098_v53 = vld [vmem:[%s7624_s3 + $0x48] sm:$0xff] }
 0x435   : > { %v2987_v49 = vpop.f32.mrf.mxu1 }
 0x436   : > { %v2988_v14 = vadd.f32 %v6843_v16, %v2987_v49 }
 0x438   : > { %v3017_v6 = vadd.f32 %v3016_v28, %v2988_v14 }
 0x439   : > { %3291 = vrot.lane.b32.xlu0 %v3274_v30, %s5274_s15 }
 0x43a   : > { %v3032_v20 = vmax.f32 %v3017_v6, 0.0 }
 0x43b   : > { %v3370_v46 = vld [vmem:[#allocation4 + $0x31] sm:$0xff] }
 0x43c   : > { %v3322_v10 = vld [vmem:[#allocation4 + $0x30] sm:$0xff]  ;;  %3040 = vst.msk [vmem:[#allocation4 + $0x41] sm:$0xff] %vm270_vm13, %v3032_v20  ;;  %3387 = vrot.lane.b32.xlu1 %v3370_v46, %s5276_s30 }
 0x43d   : > { %v3418_v50 = vld [vmem:[#allocation4 + $0x32] sm:$0xff]  ;;  %3339 = vrot.lane.b32.xlu2 %v3322_v10, %s5275_s16  ;;  %3076 = vst.msk [vmem:[#allocation5 + $0x30] sm:$0xff] %vm270_vm13, %v3322_v10 }
 0x43e   : > { %3426 = vst.msk [vmem:[#allocation5 + $0x18] sm:$0xff] %vm270_vm13, %v3418_v50 }
 0x441   : > { %v2551_v1 = vpop.permute.xlu2 %2550  ;;  %3385 = vrot.lane.b32.xlu0 %v3226_v38, %s5276_s30 }
 0x442   : > { %2568 = vst.msk [vmem:[#allocation5 + $0x70] sm:$0xff] %vm2560_vm0, %v2551_v1 }
 0x443   : > { %v3180_v18 = vld [vmem:[#allocation4 + $0x40] sm:$0xff] }
 0x444   : > { %v6901_v25 = vld [vmem:[#allocation4 + $0x42] sm:$0xff]  ;;  %3149 = vrot.lane.b32.xlu1 %v3274_v30, %s5270_s17  ;;  %3077 = vst.msk [vmem:[#allocation5 + $0x40] sm:$0xff] %vm270_vm13, %v3180_v18 }
 0x445   : > { %v3436_v4 = vld [vmem:[#allocation5 + $0x18] sm:$0xff]  ;;  %3427 = vst.msk [vmem:[#allocation5 + $0x28] sm:$0xff] %vm270_vm13, %v6901_v25  ;;  %3101 = vrot.lane.b32.xlu2 %v3226_v38, %s5266_s13  ;;  %v6918_v57 = vld [vmem:[#allocation4 + $0x41] sm:$0xff] }
 0x446   : > { %v3450_v55 = vpack.c.bf16 %v3436_v4, %v3434_v48  ;;  %v5100_v30 = vld [vmem:[%s7624_s3 + $0x58] sm:$0xff] }
 0x447   : > { %3529 = vmatpush.bf16.msrb.mxu3 %v5100_v30 }
 0x448   : > { %4961 = vmatmul.msk.bf16.vlgmr.msrb.gmra.mxu2 %vm270_vm13, %v3450_v55 }
 0x449   : > { %3103 = vrot.lane.b32.xlu0 %v3370_v46, %s5266_s13  ;;  %v2647_v3 = vpop.permute.xlu2 %2646 }
 0x44b   : > { %3530 = vmatpush.bf16.msrb.mxu3 %v5099_v54 }
 0x44c   : > { %3199 = vrot.lane.b32.xlu1 %v3180_v18, %s5272_s12  ;;  %v3438_v61 = vld [vmem:[#allocation5 + $0x28] sm:$0xff] }
 0x44d   : > { %3151 = vrot.lane.b32.xlu2 %v3418_v50, %s5270_s17 }
 0x44f   : > { %3531 = vmatpush.bf16.msrb.mxu3 %v5098_v53 }
 0x451   : > { %3197 = vrot.lane.b32.xlu0 %v3322_v10, %s5272_s12 }
 0x454   : > { %3293 = vrot.lane.b32.xlu1 %v3418_v50, %s5274_s15 }
 0x455   : > { %3245 = vrot.lane.b32.xlu2 %v3370_v46, %s5273_s14 }
 0x458   : > { %v2793_v59 = vpop.permute.xlu1 %2792 }
 0x459   : > { %2812 = vst.msk [vmem:[#allocation5 + $0x50] sm:$0xff] %vm2806_vm5, %v2793_v59  ;;  %v2842_v26 = vpop.permute.xlu0 %2841  ;;  %3247 = vrot.lane.b32.xlu0 %v6918_v57, %s5273_s14 }
 0x45a   : > { %2861 = vst.msk [vmem:[#allocation5 + $0x50] sm:$0xff] %vm2855_vm6, %v2842_v26 }
 0x45d   : > { %3295 = vrot.lane.b32.xlu2 %v6901_v25, %s5274_s15 }
 0x460   : > { %v2549_v17 = vpop.permute.xlu1 %2548 }
 0x461   : > { %2567 = vst.msk [vmem:[#allocation5 + $0x60] sm:$0xff] %vm2560_vm0, %v2549_v17  ;;  %v2598_v36 = vpop.permute.xlu0 %2597  ;;  %v2890_v31 = vld [vmem:[#allocation5 + $0x50] sm:$0xff]  ;;  %3341 = vrot.lane.b32.xlu0 %v3180_v18, %s5275_s16 }
 0x462   : > { %2616 = vst.msk [vmem:[#allocation5 + $0x60] sm:$0xff] %vm2609_vm1, %v2598_v36  ;;  %v2900_v32 = vpack.c.bf16 %v2890_v31, %v2888_v58  ;;  %v2698_v41 = vpop.permute.xlu2 %2697 }
 0x463   : > { %2665 = vst.msk [vmem:[#allocation5 + $0x60] sm:$0xff] %vm2658_vm2, %v2647_v3 }
 0x464   : > { %2989 = vmatmul.bf16.gmra.mxu1 %v2900_v32 }
 0x465   : > { %3389 = vrot.lane.b32.xlu2 %v6918_v57, %s5276_s30 }
 0x468   : > { %v2600_v62 = vpop.permute.xlu1 %2599 }
 0x469   : > { %2617 = vst.msk [vmem:[#allocation5 + $0x70] sm:$0xff] %vm2609_vm1, %v2600_v62 }
 0x46a   : > { %v2795_v63 = vpop.permute.xlu2 %2794 }
 0x470   : > { %v2696_v40 = vpop.permute.xlu1 %2695 }
 0x471   : > { %2714 = vst.msk [vmem:[#allocation5 + $0x60] sm:$0xff] %vm2707_vm3, %v2696_v40 }
 0x472   : > { %v2846_v35 = vpop.permute.xlu2 %2845 }
 0x479   : > { %v2747_v47 = vpop.permute.xlu1 %2746 }
 0x47a   : > { %v3146_v2 = vpop.permute.xlu2 %3145 }
 0x47b   : > { %v2649_v19 = vpop.permute.xlu0 %2648 }
 0x47c   : > { %2666 = vst.msk [vmem:[#allocation5 + $0x70] sm:$0xff] %vm2658_vm2, %v2649_v19 }
 0x47d   : > { %2715 = vst.msk [vmem:[#allocation5 + $0x70] sm:$0xff] %vm2707_vm3, %v2698_v41  ;;  %v3019_v41 = vpop.f32.mrf.mxu2 }
 0x47e   : > { %2764 = vst.msk [vmem:[#allocation5 + $0x70] sm:$0xff] %vm2756_vm4, %v2747_v47 }
 0x481   : > { %v2844_v27 = vpop.permute.xlu1 %2843 }
 0x482   : > { %v3196_v29 = vpop.permute.xlu2 %3195 }
 0x483   : > { %v2745_v0 = vpop.permute.xlu0 %2744 }
 0x484   : > { %2763 = vst.msk [vmem:[#allocation5 + $0x60] sm:$0xff] %vm2756_vm4, %v2745_v0 }
 0x485   : > { %2813 = vst.msk [vmem:[#allocation5 + $0x60] sm:$0xff] %vm2806_vm5, %v2795_v63  ;;  %v3021_v19 = vpop.f32.mrf.mxu2 }
 0x486   : > { %2862 = vst.msk [vmem:[#allocation5 + $0x60] sm:$0xff] %vm2855_vm6, %v2844_v27 }
 0x489   : > { %v3100_v9 = vpop.permute.xlu1 %3099 }
 0x48a   : > { %3122 = vst.msk [vmem:[#allocation5 + $0x10] sm:$0xff] %vm2560_vm0, %v3100_v9  ;;  %v3290_v56 = vpop.permute.xlu2 %3289 }
 0x48b   : > { %v2797_v45 = vpop.permute.xlu0 %2796 }
 0x48c   : > { %2814 = vst.msk [vmem:[#allocation5 + $0x70] sm:$0xff] %vm2806_vm5, %v2797_v45 }
 0x48d   : > { %2863 = vst.msk [vmem:[#allocation5 + $0x70] sm:$0xff] %vm2855_vm6, %v2846_v35  ;;  %v2892_v38 = vld [vmem:[#allocation5 + $0x60] sm:$0xff] }
 0x491   : > { %v3194_v12 = vpop.permute.xlu1 %3193 }
 0x493   : > { %v3098_v37 = vpop.permute.xlu0 %3097 }
 0x494   : > { %3121 = vst.msk [vmem:[#allocation5] sm:$0xff] %vm2560_vm0, %v3098_v37  ;;  %v2894_v23 = vld [vmem:[#allocation5 + $0x70] sm:$0xff] }
 0x495   : > { %3169 = vst.msk [vmem:[#allocation5] sm:$0xff] %vm2609_vm1, %v3146_v2  ;;  %v2902_v11 = vpack.c.bf16 %v2894_v23, %v2892_v38  ;;  %v3448_v23 = vld [vmem:[#allocation5 + $0x78] sm:$0xff] }
 0x496   : > { %3217 = vst.msk [vmem:[#allocation5] sm:$0xff] %vm2658_vm2, %v3194_v12 }
 0x497   : > { %v3340_v44 = vpop.permute.xlu2 %3339  ;;  %2994 = vmatmul.bf16.gmra.mxu1 %v2902_v11  ;;  %3993 = vst.msk [vmem:[#allocation5 + $0x78] sm:$0xff] %vm270_vm13, %v6828_v7 }
 0x499   : > { %v3244_v43 = vpop.permute.xlu1 %3243 }
 0x49b   : > { %v3148_v49 = vpop.permute.xlu0 %3147 }
 0x49c   : > { %3170 = vst.msk [vmem:[#allocation5 + $0x10] sm:$0xff] %vm2609_vm1, %v3148_v49 }
 0x49d   : > { %3218 = vst.msk [vmem:[#allocation5 + $0x10] sm:$0xff] %vm2658_vm2, %v3196_v29 }
 0x49e   : > { %3266 = vst.msk [vmem:[#allocation5 + $0x10] sm:$0xff] %vm2707_vm3, %v3244_v43 }
 0x49f   : > { %v3102_v14 = vpop.permute.xlu2 %3101 }
 0x4a0   : > { %3123 = vst.msk [vmem:[#allocation5 + $0x20] sm:$0xff] %vm2560_vm0, %v3102_v14 }
 0x4a1   : > { %v3338_v6 = vpop.permute.xlu1 %3337 }
 0x4a3   : > { %v3242_v28 = vpop.permute.xlu0 %3241 }
 0x4a4   : > { %3265 = vst.msk [vmem:[#allocation5] sm:$0xff] %vm2707_vm3, %v3242_v28 }
 0x4a5   : > { %3313 = vst.msk [vmem:[#allocation5] sm:$0xff] %vm2756_vm4, %v3290_v56 }
 0x4a6   : > { %3361 = vst.msk [vmem:[#allocation5] sm:$0xff] %vm2806_vm5, %v3338_v6 }
 0x4a7   : > { %v3152_v1 = vpop.permute.xlu2 %3151 }
 0x4ab   : > { %v3292_v20 = vpop.permute.xlu0 %3291 }
 0x4ac   : > { %3314 = vst.msk [vmem:[#allocation5 + $0x10] sm:$0xff] %vm2756_vm4, %v3292_v20 }
 0x4ad   : > { %3362 = vst.msk [vmem:[#allocation5 + $0x10] sm:$0xff] %vm2806_vm5, %v3340_v44 }
 0x4ae   : > { %v3388_v46 = vpop.permute.xlu1 %3387 }
 0x4af   : > { %3410 = vst.msk [vmem:[#allocation5 + $0x10] sm:$0xff] %vm2855_vm6, %v3388_v46  ;;  %v3246_v59 = vpop.permute.xlu2 %3245 }
 0x4b3   : > { %v3386_v10 = vpop.permute.xlu0 %3385 }
 0x4b4   : > { %3409 = vst.msk [vmem:[#allocation5] sm:$0xff] %vm2855_vm6, %v3386_v10 }
 0x4b6   : > { %v3150_v50 = vpop.permute.xlu1 %3149  ;;  %v3435_v4 = vld [vmem:[#allocation5 + $0x10] sm:$0xff] }
 0x4b7   : > { %3171 = vst.msk [vmem:[#allocation5 + $0x20] sm:$0xff] %vm2609_vm1, %v3150_v50  ;;  %v3296_v17 = vpop.permute.xlu2 %3295 }
 0x4bb   : > { %v3104_v18 = vpop.permute.xlu0 %3103  ;;  %v3433_v48 = vld [vmem:[#allocation5] sm:$0xff] }
 0x4bc   : > { %3124 = vst.msk [vmem:[#allocation5 + $0x30] sm:$0xff] %vm2560_vm0, %v3104_v18  ;;  %v3449_v55 = vpack.c.bf16 %v3435_v4, %v3433_v48 }
 0x4bd   : > { %3172 = vst.msk [vmem:[#allocation5 + $0x30] sm:$0xff] %vm2609_vm1, %v3152_v1  ;;  %v7041_v1 = vld [vmem:[%s7625_s4 + $0x1] ss:$0 sm:$0xff] }
 0x4be   : > { %v3200_v58 = vpop.permute.xlu1 %3199  ;;  %3532 = vmatmul.bf16.vlgmr.msrb.gmra.mxu3 %v3449_v55 }
 0x4bf   : > { %3220 = vst.msk [vmem:[#allocation5 + $0x30] sm:$0xff] %vm2658_vm2, %v3200_v58  ;;  %v3390_v32 = vpop.permute.xlu2 %3389 }
 0x4c3   : > { %v3198_v26 = vpop.permute.xlu0 %3197 }
 0x4c4   : > { %3219 = vst.msk [vmem:[#allocation5 + $0x20] sm:$0xff] %vm2658_vm2, %v3198_v26 }
 0x4c5   : > { %3267 = vst.msk [vmem:[#allocation5 + $0x20] sm:$0xff] %vm2707_vm3, %v3246_v59 }
 0x4c6   : > { %v3294_v3 = vpop.permute.xlu1 %3293 }
 0x4c7   : > { %3315 = vst.msk [vmem:[#allocation5 + $0x20] sm:$0xff] %vm2756_vm4, %v3294_v3 }
 0x4cb   : > { %v3248_v36 = vpop.permute.xlu0 %3247 }
 0x4cc   : > { %3268 = vst.msk [vmem:[#allocation5 + $0x30] sm:$0xff] %vm2707_vm3, %v3248_v36 }
 0x4cd   : > { %3316 = vst.msk [vmem:[#allocation5 + $0x30] sm:$0xff] %vm2756_vm4, %v3296_v17 }
 0x4d3   : > { %v3342_v31 = vpop.permute.xlu0 %3341 }
 0x4d4   : > { %3363 = vst.msk [vmem:[#allocation5 + $0x20] sm:$0xff] %vm2806_vm5, %v3342_v31 }
 0x4d5   : > { %3411 = vst.msk [vmem:[#allocation5 + $0x20] sm:$0xff] %vm2855_vm6, %v3390_v32 }
 0x4e1   : > { %v2990_v62 = vpop.f32.mrf.mxu1 }
 0x4e2   : > { %v2991_v63 = vadd.f32 %v6843_v16, %v2990_v62 }
 0x4e4   : > { %v3020_v40 = vadd.f32 %v3019_v41, %v2991_v63  ;;  %v7063_v41 = vld [vmem:[#allocation4 + $0x1] sm:$0xff] }
 0x4e6   : > { %v3033_v35 = vmax.f32 %v3020_v40, 0.0 }
 0x4e8   : > { %3041 = vst.msk [vmem:[#allocation4 + $0x51] sm:$0xff] %vm270_vm13, %v3033_v35 }
 0x4e9   : > { %v2992_v47 = vpop.f32.mrf.mxu1 }
 0x4ea   : > { %v2993_v2 = vadd.f32 %v6843_v16, %v2992_v47 }
 0x4ec   : > { %v3022_v5 = vadd.f32 %v3021_v19, %v2993_v2 }
 0x4ee   : > { %v3034_v27 = vmax.f32 %v3022_v5, 0.0 }
 0x4ef   : > { %v3324_v29 = vld [vmem:[#allocation4 + $0x50] sm:$0xff] }
 0x4f0   : > { %v3086_v33 = vld [vmem:[#allocation4 + $0x51] sm:$0xff]  ;;  %3042 = vst.msk [vmem:[#allocation4 + $0x61] sm:$0xff] %vm270_vm13, %v3034_v27  ;;  %3343 = vrot.lane.b32.xlu1 %v3324_v29, %s5275_s16 }
 0x4f1   : > { %v3420_v0 = vld [vmem:[#allocation4 + $0x52] sm:$0xff]  ;;  %3107 = vrot.lane.b32.xlu2 %v3086_v33, %s5266_s13  ;;  %3391 = vrot.lane.b32.xlu0 %v3086_v33, %s5276_s30  ;;  %3078 = vst.msk [vmem:[#allocation5 + $0x50] sm:$0xff] %vm270_vm13, %v3324_v29 }
 0x4f2   : > { %3428 = vst.msk [vmem:[#allocation5 + $0x38] sm:$0xff] %vm270_vm13, %v3420_v0 }
 0x4f7   : > { %v3182_v8 = vld [vmem:[#allocation4 + $0x60] sm:$0xff] }
 0x4f8   : > { %v3278_v9 = vld [vmem:[#allocation4 + $0x62] sm:$0xff]  ;;  %3105 = vrot.lane.b32.xlu1 %v6918_v57, %s5266_s13  ;;  %3079 = vst.msk [vmem:[#allocation5 + $0x60] sm:$0xff] %vm270_vm13, %v3182_v8 }
 0x4f9   : > { %3201 = vrot.lane.b32.xlu2 %v3324_v29, %s5272_s12  ;;  %v3440_v45 = vld [vmem:[#allocation5 + $0x38] sm:$0xff]  ;;  %3429 = vst.msk [vmem:[#allocation5 + $0x48] sm:$0xff] %vm270_vm13, %v3278_v9  ;;  %3153 = vrot.lane.b32.xlu0 %v6901_v25, %s5270_s17  ;;  %v3230_v15 = vld [vmem:[#allocation4 + $0x61] sm:$0xff]  ;;  %v3024_v25 = vpop.f32.mrf.mxu2 }
 0x4fa   : > { %v3452_v56 = vpack.c.bf16 %v3440_v45, %v3438_v61 }
 0x4fc   : > { %4962 = vmatmul.msk.bf16.gmra.mxu2 %vm270_vm13, %v3452_v56 }
 0x500   : > { %3155 = vrot.lane.b32.xlu1 %v3420_v0, %s5270_s17  ;;  %v3442_v7 = vld [vmem:[#allocation5 + $0x48] sm:$0xff] }
 0x501   : > { %3251 = vrot.lane.b32.xlu2 %v3230_v15, %s5273_s14  ;;  %3203 = vrot.lane.b32.xlu0 %v3182_v8, %s5272_s12  ;;  %v3026_v11 = vpop.f32.mrf.mxu2 }
 0x508   : > { %3249 = vrot.lane.b32.xlu1 %v3086_v33, %s5273_s14 }
 0x509   : > { %3345 = vrot.lane.b32.xlu2 %v3182_v8, %s5275_s16  ;;  %3297 = vrot.lane.b32.xlu0 %v3420_v0, %s5274_s15  ;;  %v3562_v18 = vpop.f32.mrf.mxu2 }
 0x510   : > { %3299 = vrot.lane.b32.xlu1 %v3278_v9, %s5274_s15 }
 0x511   : > { %v3564_v36 = vpop.f32.mrf.mxu2 }
 0x514   : > { %v2995_v57 = vpop.f32.mrf.mxu1 }
 0x515   : > { %v2996_v12 = vadd.f32 %v6843_v16, %v2995_v57 }
 0x517   : > { %v3025_v30 = vadd.f32 %v3024_v25, %v2996_v12 }
 0x518   : > { %3393 = vrot.lane.b32.xlu1 %v3230_v15, %s5276_s30 }
 0x519   : > { %v3035_v37 = vmax.f32 %v3025_v30, 0.0 }
 0x51b   : > { %3043 = vst.msk [vmem:[#allocation4 + $0x71] sm:$0xff] %vm270_vm13, %v3035_v37 }
 0x51c   : > { %v2997_v38 = vpop.f32.mrf.mxu1 }
 0x51d   : > { %v2998_v44 = vadd.f32 %v6843_v16, %v2997_v38 }
 0x51f   : > { %v3027_v54 = vadd.f32 %v3026_v11, %v2998_v44 }
 0x521   : > { %v3036_v43 = vmax.f32 %v3027_v54, 0.0 }
 0x522   : > { %v3088_v53 = vld [vmem:[#allocation4 + $0x71] sm:$0xff] }
 0x523   : > { %v3326_v49 = vld [vmem:[#allocation4 + $0x70] sm:$0xff]  ;;  %3044 = vst.msk [vmem:[#allocation4 + $0x81] sm:$0xff] %vm270_vm13, %v3036_v43  ;;  %3111 = vrot.lane.b32.xlu1 %v3088_v53, %s5266_s13  ;;  %3395 = vrot.lane.b32.xlu2 %v3088_v53, %s5276_s30 }
 0x524   : > { %v3422_v14 = vld [vmem:[#allocation4 + $0x72] sm:$0xff]  ;;  %3347 = vrot.lane.b32.xlu0 %v3326_v49, %s5275_s16  ;;  %3080 = vst.msk [vmem:[#allocation5 + $0x70] sm:$0xff] %vm270_vm13, %v3326_v49 }
 0x525   : > { %3430 = vst.msk [vmem:[#allocation5 + $0x58] sm:$0xff] %vm270_vm13, %v3422_v14 }
 0x52a   : > { %v3423_v16 = vld [vmem:[#allocation4 + $0x82] sm:$0xff] }
 0x52b   : > { %3205 = vrot.lane.b32.xlu1 %v3326_v49, %s5272_s12  ;;  %3157 = vrot.lane.b32.xlu2 %v3278_v9, %s5270_s17  ;;  %3431 = vst.msk [vmem:[#allocation5 + $0x68] sm:$0xff] %vm270_vm13, %v3423_v16  ;;  %v3232_v20 = vld [vmem:[#allocation4 + $0x81] sm:$0xff] }
 0x52c   : > { %v3444_v28 = vld [vmem:[#allocation5 + $0x58] sm:$0xff]  ;;  %3109 = vrot.lane.b32.xlu0 %v3230_v15, %s5266_s13  ;;  %v3184_v46 = vld [vmem:[#allocation4 + $0x80] sm:$0xff] }
 0x52d   : > { %v3454_v6 = vpack.c.bf16 %v3444_v28, %v3442_v7 }
 0x52f   : > { %4963 = vmatmul.msk.bf16.gmra.mxu2 %vm270_vm13, %v3454_v6 }
 0x532   : > { %v3446_v10 = vld [vmem:[#allocation5 + $0x68] sm:$0xff] }
 0x533   : > { %3255 = vrot.lane.b32.xlu1 %v3232_v20, %s5273_s14  ;;  %3207 = vrot.lane.b32.xlu2 %v3184_v46, %s5272_s12  ;;  %v3456_v50 = vpack.c.bf16 %v3448_v23, %v3446_v10 }
 0x534   : > { %3159 = vrot.lane.b32.xlu0 %v3422_v14, %s5270_s17 }
 0x53b   : > { %3349 = vrot.lane.b32.xlu1 %v3184_v46, %s5275_s16  ;;  %3301 = vrot.lane.b32.xlu2 %v3422_v14, %s5274_s15 }
 0x53c   : > { %3253 = vrot.lane.b32.xlu0 %v3088_v53, %s5273_s14 }
 0x53f   : > { %4964 = vmatmul.msk.bf16.gmra.mxu2 %vm270_vm13, %v3456_v50 }
 0x541   : > { %v3533_v48 = vpop.f32.mrf.mxu3 }
 0x542   : > { %v3534_v4 = vadd.f32 %v7041_v1, %v3533_v48 }
 0x543   : > { %3399 = vrot.lane.b32.xlu1 %v6866_v34, %s5276_s30  ;;  %3351 = vrot.lane.b32.xlu2 %v6868_v39, %s5275_s16 }
 0x544   : > { %v3563_v58 = vadd.f32 %v3562_v18, %v3534_v4  ;;  %3303 = vrot.lane.b32.xlu0 %v3423_v16, %s5274_s15  ;;  %v3626_v16 = vld [vmem:[#allocation4] sm:$0xff] }
 0x545   : > { %3634 = vst.msk [vmem:[#allocation5] sm:$0xff] %vm270_vm13, %v3626_v16 }
 0x546   : > { %v7050_v55 = vadd.f32 %v3563_v58, %v6202_v24 }
 0x548   : > { %v3590_v26 = vmax.f32 %v7050_v55, 0.0 }
 0x549   : > { %v3535_v3 = vpop.f32.mrf.mxu3 }
 0x54a   : > { %3598 = vst.msk [vmem:[#allocation4 + $0x11] sm:$0xff] %vm270_vm13, %v3590_v26  ;;  %v3536_v17 = vadd.f32 %v7041_v1, %v3535_v3 }
 0x54b   : > { %v3108_v59 = vpop.permute.xlu2 %3107  ;;  %3912 = vrot.lane.b32.xlu1 %v6868_v39, %s5275_s16  ;;  %v7072_v39 = vld [vmem:[#allocation4 + $0x2] sm:$0xff] }
 0x54c   : > { %3126 = vst.msk [vmem:[#allocation5 + $0x50] sm:$0xff] %vm2560_vm0, %v3108_v59  ;;  %v3565_v31 = vadd.f32 %v3564_v36, %v3536_v17  ;;  %3397 = vrot.lane.b32.xlu0 %v3232_v20, %s5276_s30 }
 0x54e   : > { %v7060_v24 = vadd.f32 %v3565_v31, %v6286_v21  ;;  %v3437_v21 = vld [vmem:[#allocation5 + $0x20] sm:$0xff] }
 0x550   : > { %v3591_v32 = vmax.f32 %v7060_v24, 0.0 }
 0x551   : > { %v3643_v62 = vld [vmem:[#allocation4 + $0x11] sm:$0xff] }
 0x552   : > { %v3738_v63 = vld [vmem:[#allocation4 + $0x10] sm:$0xff]  ;;  %3599 = vst.msk [vmem:[#allocation4 + $0x21] sm:$0xff] %vm270_vm13, %v3591_v32  ;;  %3660 = vrot.lane.b32.xlu2 %v3643_v62, %s5266_s13 }
 0x553   : > { %3658 = vrot.lane.b32.xlu1 %v7063_v41, %s5266_s13  ;;  %3635 = vst.msk [vmem:[#allocation5 + $0x10] sm:$0xff] %vm270_vm13, %v3738_v63  ;;  %v3691_v47 = vld [vmem:[#allocation4 + $0x12] sm:$0xff]  ;;  %v3202_v19 = vpop.permute.xlu2 %3201 }
 0x554   : > { %3960 = vrot.lane.b32.xlu0 %v6866_v34, %s5276_s30 }
 0x559   : > { %v3739_v40 = vld [vmem:[#allocation4 + $0x20] sm:$0xff] }
 0x55a   : > { %v3835_v35 = vld [vmem:[#allocation4 + $0x22] sm:$0xff]  ;;  %3754 = vrot.lane.b32.xlu2 %v3738_v63, %s5272_s12  ;;  %3636 = vst.msk [vmem:[#allocation5 + $0x20] sm:$0xff] %vm270_vm13, %v3739_v40 }
 0x55b   : > { %3708 = vrot.lane.b32.xlu1 %v3691_v47, %s5270_s17  ;;  %3986 = vst.msk [vmem:[#allocation5 + $0x8] sm:$0xff] %vm270_vm13, %v3835_v35  ;;  %v3787_v5 = vld [vmem:[#allocation4 + $0x21] sm:$0xff]  ;;  %v3252_v8 = vpop.permute.xlu2 %3251 }
 0x55c   : > { %3706 = vrot.lane.b32.xlu0 %v7072_v39, %s5270_s17 }
 0x562   : > { %v3344_v2 = vpop.permute.xlu1 %3343  ;;  %3804 = vrot.lane.b32.xlu2 %v3787_v5, %s5273_s14 }
 0x563   : > { %3364 = vst.msk [vmem:[#allocation5 + $0x30] sm:$0xff] %vm2806_vm5, %v3344_v2  ;;  %v3392_v34 = vpop.permute.xlu0 %3391  ;;  %3802 = vrot.lane.b32.xlu1 %v3643_v62, %s5273_s14  ;;  %v3346_v45 = vpop.permute.xlu2 %3345 }
 0x564   : > { %3412 = vst.msk [vmem:[#allocation5 + $0x30] sm:$0xff] %vm2855_vm6, %v3392_v34  ;;  %3756 = vrot.lane.b32.xlu0 %v3739_v40, %s5272_s12 }
 0x56a   : > { %v3106_v27 = vpop.permute.xlu1 %3105  ;;  %3898 = vrot.lane.b32.xlu2 %v3739_v40, %s5275_s16 }
 0x56b   : > { %3125 = vst.msk [vmem:[#allocation5 + $0x40] sm:$0xff] %vm2560_vm0, %v3106_v27  ;;  %v3154_v29 = vpop.permute.xlu0 %3153  ;;  %v3439_v33 = vld [vmem:[#allocation5 + $0x30] sm:$0xff]  ;;  %3852 = vrot.lane.b32.xlu1 %v3835_v35, %s5274_s15 }
 0x56c   : > { %3173 = vst.msk [vmem:[#allocation5 + $0x40] sm:$0xff] %vm2609_vm1, %v3154_v29  ;;  %v3451_v0 = vpack.c.bf16 %v3439_v33, %v3437_v21  ;;  %3850 = vrot.lane.b32.xlu0 %v3691_v47, %s5274_s15 }
 0x56d   : > { %3221 = vst.msk [vmem:[#allocation5 + $0x40] sm:$0xff] %vm2658_vm2, %v3202_v19 }
 0x56e   : > { %3537 = vmatmul.bf16.gmra.mxu3 %v3451_v0 }
 0x572   : > { %v3156_v9 = vpop.permute.xlu1 %3155  ;;  %3710 = vrot.lane.b32.xlu2 %v3835_v35, %s5270_s17 }
 0x573   : > { %3174 = vst.msk [vmem:[#allocation5 + $0x50] sm:$0xff] %vm2609_vm1, %v3156_v9  ;;  %v3204_v61 = vpop.permute.xlu0 %3203  ;;  %3946 = vrot.lane.b32.xlu1 %v3787_v5, %s5276_s30 }
 0x574   : > { %3222 = vst.msk [vmem:[#allocation5 + $0x50] sm:$0xff] %vm2658_vm2, %v3204_v61  ;;  %3662 = vrot.lane.b32.xlu0 %v3787_v5, %s5266_s13 }
 0x575   : > { %3270 = vst.msk [vmem:[#allocation5 + $0x50] sm:$0xff] %vm2707_vm3, %v3252_v8 }
 0x57a   : > { %v3250_v56 = vpop.permute.xlu1 %3249 }
 0x57b   : > { %3269 = vst.msk [vmem:[#allocation5 + $0x40] sm:$0xff] %vm2707_vm3, %v3250_v56  ;;  %v3298_v15 = vpop.permute.xlu0 %3297 }
 0x57c   : > { %3317 = vst.msk [vmem:[#allocation5 + $0x40] sm:$0xff] %vm2756_vm4, %v3298_v15 }
 0x57d   : > { %3365 = vst.msk [vmem:[#allocation5 + $0x40] sm:$0xff] %vm2806_vm5, %v3346_v45  ;;  %v3396_v25 = vpop.permute.xlu2 %3395 }
 0x57f   : > { %v3567_v5 = vpop.f32.mrf.mxu2 }
 0x582   : > { %v3300_v57 = vpop.permute.xlu1 %3299 }
 0x583   : > { %3318 = vst.msk [vmem:[#allocation5 + $0x50] sm:$0xff] %vm2756_vm4, %v3300_v57 }
 0x585   : > { %v3158_v12 = vpop.permute.xlu2 %3157 }
 0x587   : > { %v3569_v45 = vpop.f32.mrf.mxu2 }
 0x58a   : > { %v3394_v30 = vpop.permute.xlu1 %3393 }
 0x58b   : > { %3413 = vst.msk [vmem:[#allocation5 + $0x40] sm:$0xff] %vm2855_vm6, %v3394_v30 }
 0x58d   : > { %v3208_v37 = vpop.permute.xlu2 %3207 }
 0x592   : > { %v3441_v43 = vld [vmem:[#allocation5 + $0x40] sm:$0xff] }
 0x595   : > { %v3112_v38 = vpop.permute.xlu1 %3111  ;;  %v3302_v44 = vpop.permute.xlu2 %3301 }
 0x596   : > { %3128 = vst.msk [vmem:[#allocation5 + $0x70] sm:$0xff] %vm2560_vm0, %v3112_v38  ;;  %v3348_v23 = vpop.permute.xlu0 %3347 }
 0x597   : > { %3366 = vst.msk [vmem:[#allocation5 + $0x50] sm:$0xff] %vm2806_vm5, %v3348_v23 }
 0x598   : > { %3414 = vst.msk [vmem:[#allocation5 + $0x50] sm:$0xff] %vm2855_vm6, %v3396_v25 }
 0x59d   : > { %v3206_v11 = vpop.permute.xlu1 %3205  ;;  %v3352_v14 = vpop.permute.xlu2 %3351 }
 0x59e   : > { %v3110_v54 = vpop.permute.xlu0 %3109 }
 0x59f   : > { %3127 = vst.msk [vmem:[#allocation5 + $0x60] sm:$0xff] %vm2560_vm0, %v3110_v54  ;;  %v3443_v53 = vld [vmem:[#allocation5 + $0x50] sm:$0xff] }
 0x5a0   : > { %3175 = vst.msk [vmem:[#allocation5 + $0x60] sm:$0xff] %vm2609_vm1, %v3158_v12  ;;  %v3453_v49 = vpack.c.bf16 %v3443_v53, %v3441_v43 }
 0x5a1   : > { %3223 = vst.msk [vmem:[#allocation5 + $0x60] sm:$0xff] %vm2658_vm2, %v3206_v11 }
 0x5a2   : > { %3542 = vmatmul.bf16.gmra.mxu3 %v3453_v49 }
 0x5a5   : > { %v3256_v7 = vpop.permute.xlu1 %3255 }
 0x5a6   : > { %v3160_v28 = vpop.permute.xlu0 %3159 }
 0x5a7   : > { %3176 = vst.msk [vmem:[#allocation5 + $0x70] sm:$0xff] %vm2609_vm1, %v3160_v28 }
 0x5a8   : > { %3224 = vst.msk [vmem:[#allocation5 + $0x70] sm:$0xff] %vm2658_vm2, %v3208_v37 }
 0x5a9   : > { %3272 = vst.msk [vmem:[#allocation5 + $0x70] sm:$0xff] %vm2707_vm3, %v3256_v7 }
 0x5ac   : > { %v3661_v6 = vpop.permute.xlu2 %3660 }
 0x5ad   : > { %3683 = vst.msk [vmem:[#allocation5 + $0x10] sm:$0xff] %vm2560_vm0, %v3661_v6  ;;  %v3350_v20 = vpop.permute.xlu1 %3349 }
 0x5ae   : > { %v3254_v46 = vpop.permute.xlu0 %3253 }
 0x5af   : > { %3271 = vst.msk [vmem:[#allocation5 + $0x60] sm:$0xff] %vm2707_vm3, %v3254_v46  ;;  %v5114_v46 = vld [vmem:[%s7624_s3 + $0xc8] sm:$0xff] }
 0x5b0   : > { %3319 = vst.msk [vmem:[#allocation5 + $0x60] sm:$0xff] %vm2756_vm4, %v3302_v44  ;;  %4085 = vmatpush.bf16.msrb.mxu1 %v5114_v46  ;;  %5129 = vmatpush.bf16.msra.mxu3 %v5114_v46 }
 0x5b1   : > { %3367 = vst.msk [vmem:[#allocation5 + $0x60] sm:$0xff] %vm2806_vm5, %v3350_v20 }
 0x5b2   : > { %v3572_v37 = vpop.f32.mrf.mxu2 }
 0x5b4   : > { %v3755_v17 = vpop.permute.xlu2 %3754 }
 0x5b5   : > { %v3400_v10 = vpop.permute.xlu1 %3399 }
 0x5b6   : > { %v3304_v50 = vpop.permute.xlu0 %3303 }
 0x5b7   : > { %3320 = vst.msk [vmem:[#allocation5 + $0x70] sm:$0xff] %vm2756_vm4, %v3304_v50  ;;  %v5112_v50 = vld [vmem:[%s7624_s3 + $0xb8] sm:$0xff] }
 0x5b8   : > { %3368 = vst.msk [vmem:[#allocation5 + $0x70] sm:$0xff] %vm2806_vm5, %v3352_v14 }
 0x5b9   : > { %3416 = vst.msk [vmem:[#allocation5 + $0x70] sm:$0xff] %vm2855_vm6, %v3400_v10  ;;  %v5113_v10 = vld [vmem:[%s7624_s3 + $0xc0] sm:$0xff] }
 0x5ba   : > { %v3574_v49 = vpop.f32.mrf.mxu2  ;;  %4086 = vmatpush.bf16.msrb.mxu1 %v5113_v10  ;;  %5130 = vmatpush.bf16.msra.mxu3 %v5113_v10 }
 0x5bc   : > { %v3805_v32 = vpop.permute.xlu2 %3804 }
 0x5bd   : > { %v7119_v18 = vpop.permute.xlu1 %3912 }
 0x5be   : > { %v3398_v48 = vpop.permute.xlu0 %3397  ;;  %4087 = vmatpush.bf16.msrb.mxu1 %v5112_v50  ;;  %5131 = vmatpush.bf16.msra.mxu3 %v5112_v50 }
 0x5bf   : > { %3415 = vst.msk [vmem:[#allocation5 + $0x60] sm:$0xff] %vm2855_vm6, %v3398_v48 }
 0x5c0   : > { %v3447_v4 = vld [vmem:[#allocation5 + $0x70] sm:$0xff] }
 0x5c2   : > { %v3577_v48 = vpop.f32.mrf.mxu2 }
 0x5c4   : > { %v3899_v21 = vpop.permute.xlu2 %3898 }
 0x5c5   : > { %v3659_v58 = vpop.permute.xlu1 %3658 }
 0x5c6   : > { %3682 = vst.msk [vmem:[#allocation5] sm:$0xff] %vm2560_vm0, %v3659_v58  ;;  %v7123_v59 = vpop.permute.xlu0 %3960  ;;  %v3445_v26 = vld [vmem:[#allocation5 + $0x60] sm:$0xff] }
 0x5c7   : > { %v3455_v3 = vpack.c.bf16 %v3447_v4, %v3445_v26  ;;  %v5111_v26 = vld [vmem:[%s7624_s3 + $0xb0] sm:$0xff] }
 0x5c8   : > { %4088 = vmatpush.bf16.msrb.mxu1 %v5111_v26  ;;  %5132 = vmatpush.bf16.msra.mxu3 %v5111_v26 }
 0x5c9   : > { %3547 = vmatmul.bf16.gmra.mxu3 %v3455_v3 }
 0x5cc   : > { %v3711_v34 = vpop.permute.xlu2 %3710 }
 0x5cd   : > { %v3709_v36 = vpop.permute.xlu1 %3708 }
 0x5ce   : > { %3731 = vst.msk [vmem:[#allocation5 + $0x10] sm:$0xff] %vm2609_vm1, %v3709_v36  ;;  %v3707_v31 = vpop.permute.xlu0 %3706 }
 0x5cf   : > { %3730 = vst.msk [vmem:[#allocation5] sm:$0xff] %vm2609_vm1, %v3707_v31 }
 0x5d0   : > { %3778 = vst.msk [vmem:[#allocation5] sm:$0xff] %vm2658_vm2, %v3755_v17  ;;  %v5110_v17 = vld [vmem:[%s7624_s3 + $0xa8] sm:$0xff] }
 0x5d1   : > { %4089 = vmatpush.bf16.msrb.mxu1 %v5110_v17  ;;  %5133 = vmatpush.bf16.msra.mxu3 %v5110_v17 }
 0x5d5   : > { %v3803_v62 = vpop.permute.xlu1 %3802 }
 0x5d6   : > { %3826 = vst.msk [vmem:[#allocation5] sm:$0xff] %vm2707_vm3, %v3803_v62  ;;  %v3757_v63 = vpop.permute.xlu0 %3756 }
 0x5d7   : > { %3779 = vst.msk [vmem:[#allocation5 + $0x10] sm:$0xff] %vm2658_vm2, %v3757_v63  ;;  %v3579_v63 = vpop.f32.mrf.mxu2 }
 0x5d8   : > { %3827 = vst.msk [vmem:[#allocation5 + $0x10] sm:$0xff] %vm2707_vm3, %v3805_v32 }
 0x5dd   : > { %v3853_v40 = vpop.permute.xlu1 %3852 }
 0x5de   : > { %3875 = vst.msk [vmem:[#allocation5 + $0x10] sm:$0xff] %vm2756_vm4, %v3853_v40  ;;  %v3851_v35 = vpop.permute.xlu0 %3850 }
 0x5df   : > { %3874 = vst.msk [vmem:[#allocation5] sm:$0xff] %vm2756_vm4, %v3851_v35 }
 0x5e0   : > { %3922 = vst.msk [vmem:[#allocation5] sm:$0xff] %vm2806_vm5, %v3899_v21  ;;  %v5109_v21 = vld [vmem:[%s7624_s3 + $0xa0] sm:$0xff] }
 0x5e1   : > { %4090 = vmatpush.bf16.msrb.mxu1 %v5109_v21  ;;  %5134 = vmatpush.bf16.msra.mxu3 %v5109_v21 }
 0x5e5   : > { %v3947_v47 = vpop.permute.xlu1 %3946 }
 0x5e6   : > { %3970 = vst.msk [vmem:[#allocation5] sm:$0xff] %vm2855_vm6, %v3947_v47  ;;  %v3663_v2 = vpop.permute.xlu0 %3662 }
 0x5e7   : > { %3684 = vst.msk [vmem:[#allocation5 + $0x20] sm:$0xff] %vm2560_vm0, %v3663_v2 }
 0x5e8   : > { %3732 = vst.msk [vmem:[#allocation5 + $0x20] sm:$0xff] %vm2609_vm1, %v3711_v34 }
 0x5ed   : > { %v7137_v19 = vld [vmem:[#allocation5] sm:$0xff] }
 0x5ee   : > { %4187 = vst.msk [vmem:[#allocation5] sm:$0xff] %vm270_vm13, %v3626_v16 }
 0x5f1   : > { %v3538_v27 = vpop.f32.mrf.mxu3 }
 0x5f2   : > { %v3539_v29 = vadd.f32 %v7041_v1, %v3538_v27 }
 0x5f4   : > { %v3568_v33 = vadd.f32 %v3567_v5, %v3539_v29 }
 0x5f6   : > { %v7142_v0 = vadd.f32 %v3568_v33, %v6454_v51 }
 0x5f8   : > { %v3592_v8 = vmax.f32 %v7142_v0, 0.0 }
 0x5f9   : > { %v3540_v9 = vpop.f32.mrf.mxu3 }
 0x5fa   : > { %3600 = vst.msk [vmem:[#allocation4 + $0x31] sm:$0xff] %vm270_vm13, %v3592_v8  ;;  %v3541_v61 = vadd.f32 %v7041_v1, %v3540_v9 }
 0x5fc   : > { %v3570_v56 = vadd.f32 %v3569_v45, %v3541_v61 }
 0x5fe   : > { %v7148_v15 = vadd.f32 %v3570_v56, %v6545_v13 }
 0x600   : > { %v3593_v25 = vmax.f32 %v7148_v15, 0.0 }
 0x601   : > { %v3931_v57 = vld [vmem:[#allocation4 + $0x31] sm:$0xff] }
 0x602   : > { %v3883_v12 = vld [vmem:[#allocation4 + $0x30] sm:$0xff]  ;;  %3601 = vst.msk [vmem:[#allocation4 + $0x41] sm:$0xff] %vm270_vm13, %v3593_v25  ;;  %3948 = vrot.lane.b32.xlu2 %v3931_v57, %s5276_s30  ;;  %3664 = vrot.lane.b32.xlu1 %v3931_v57, %s5266_s13 }
 0x603   : > { %v7151_v30 = vld [vmem:[#allocation4 + $0x32] sm:$0xff]  ;;  %3900 = vrot.lane.b32.xlu0 %v3883_v12, %s5275_s16  ;;  %3637 = vst.msk [vmem:[#allocation5 + $0x30] sm:$0xff] %vm270_vm13, %v3883_v12 }
 0x604   : > { %3987 = vst.msk [vmem:[#allocation5 + $0x18] sm:$0xff] %vm270_vm13, %v7151_v30 }
 0x609   : > { %v7160_v51 = vld [vmem:[#allocation4 + $0x40] sm:$0xff] }
 0x60a   : > { %3760 = vrot.lane.b32.xlu2 %v7160_v51, %s5272_s12  ;;  %3638 = vst.msk [vmem:[#allocation5 + $0x40] sm:$0xff] %vm270_vm13, %v7160_v51  ;;  %3758 = vrot.lane.b32.xlu1 %v3883_v12, %s5272_s12  ;;  %v7169_v13 = vld [vmem:[#allocation4 + $0x42] sm:$0xff] }
 0x60b   : > { %3712 = vrot.lane.b32.xlu0 %v7151_v30, %s5270_s17  ;;  %3988 = vst.msk [vmem:[#allocation5 + $0x28] sm:$0xff] %vm270_vm13, %v7169_v13  ;;  %v3789_v33 = vld [vmem:[#allocation4 + $0x41] sm:$0xff]  ;;  %v3997_v17 = vld [vmem:[#allocation5 + $0x18] sm:$0xff] }
 0x613   : > { %3806 = vrot.lane.b32.xlu0 %v3931_v57, %s5273_s14 }
 0x625   : > { %v3543_v38 = vpop.f32.mrf.mxu3 }
 0x626   : > { %v3544_v23 = vadd.f32 %v7041_v1, %v3543_v38 }
 0x628   : > { %v3573_v44 = vadd.f32 %v3572_v37, %v3544_v23 }
 0x62a   : > { %v7176_v11 = vadd.f32 %v3573_v44, %v6644_v52 }
 0x62c   : > { %v3594_v54 = vmax.f32 %v7176_v11, 0.0 }
 0x62d   : > { %v3545_v43 = vpop.f32.mrf.mxu3 }
 0x62e   : > { %3602 = vst.msk [vmem:[#allocation4 + $0x51] sm:$0xff] %vm270_vm13, %v3594_v54  ;;  %v3546_v53 = vadd.f32 %v7041_v1, %v3545_v43  ;;  %v5115_v43 = vld [vmem:[%s7624_s3 + $0xd0] sm:$0xff] }
 0x630   : > { %v3575_v14 = vadd.f32 %v3574_v49, %v3546_v53 }
 0x632   : > { %v7182_v16 = vadd.f32 %v3575_v14, %v6760_v22 }
 0x634   : > { %v3595_v7 = vmax.f32 %v7182_v16, 0.0 }
 0x635   : > { %v7185_v28 = vld [vmem:[#allocation4 + $0x50] sm:$0xff] }
 0x636   : > { %v7187_v6 = vld [vmem:[#allocation4 + $0x52] sm:$0xff]  ;;  %3603 = vst.msk [vmem:[#allocation4 + $0x61] sm:$0xff] %vm270_vm13, %v3595_v7 }
 0x637   : > { %3639 = vst.msk [vmem:[#allocation5 + $0x50] sm:$0xff] %vm270_vm13, %v7185_v28  ;;  %v3933_v37 = vld [vmem:[#allocation4 + $0x51] sm:$0xff] }
 0x638   : > { %3989 = vst.msk [vmem:[#allocation5 + $0x38] sm:$0xff] %vm270_vm13, %v7187_v6 }
 0x63d   : > { %v7194_v52 = vld [vmem:[#allocation4 + $0x61] sm:$0xff] }
 0x63e   : > { %v7196_v20 = vld [vmem:[#allocation4 + $0x62] sm:$0xff]  ;;  %3670 = vrot.lane.b32.xlu2 %v7194_v52, %s5266_s13 }
 0x63f   : > { %v7198_v22 = vld [vmem:[#allocation4 + $0x60] sm:$0xff]  ;;  %3718 = vrot.lane.b32.xlu1 %v7196_v20, %s5270_s17  ;;  %3990 = vst.msk [vmem:[#allocation5 + $0x48] sm:$0xff] %vm270_vm13, %v7196_v20 }
 0x640   : > { %3640 = vst.msk [vmem:[#allocation5 + $0x60] sm:$0xff] %vm270_vm13, %v7198_v22 }
 0x64c   : > { %v3548_v4 = vpop.f32.mrf.mxu3 }
 0x64d   : > { %v3549_v58 = vadd.f32 %v7041_v1, %v3548_v4 }
 0x64f   : > { %v3578_v3 = vadd.f32 %v3577_v48, %v3549_v58 }
 0x651   : > { %v7225_v36 = vadd.f32 %v3578_v3, %v6806_v60  ;;  %v5108_v60 = vld [vmem:[%s7624_s3 + $0x98] sm:$0xff] }
 0x652   : > { %4091 = vmatpush.bf16.msrb.mxu1 %v5108_v60  ;;  %5135 = vmatpush.bf16.msra.mxu3 %v5108_v60 }
 0x653   : > { %v3596_v31 = vmax.f32 %v7225_v36, 0.0 }
 0x654   : > { %v3550_v32 = vpop.f32.mrf.mxu3 }
 0x655   : > { %3604 = vst.msk [vmem:[#allocation4 + $0x71] sm:$0xff] %vm270_vm13, %v3596_v31  ;;  %v3551_v62 = vadd.f32 %v7041_v1, %v3550_v32 }
 0x657   : > { %v3580_v40 = vadd.f32 %v3579_v63, %v3551_v62  ;;  %v3995_v62 = vld [vmem:[#allocation5 + $0x8] sm:$0xff] }
 0x658   : > { %v4011_v63 = vpack.c.bf16 %v3997_v17, %v3995_v62 }
 0x659   : > { %v7237_v35 = vadd.f32 %v3580_v40, %v6837_v42  ;;  %v5107_v42 = vld [vmem:[%s7624_s3 + $0x90] sm:$0xff] }
 0x65a   : > { %4092 = vmatpush.bf16.msrb.mxu1 %v5107_v42  ;;  %5136 = vmatpush.bf16.msra.mxu3 %v5107_v42  ;;  %v3999_v42 = vld [vmem:[#allocation5 + $0x28] sm:$0xff] }
 0x65b   : > { %v3597_v47 = vmax.f32 %v7237_v35, 0.0 }
 0x65c   : > { %v3697_v2 = vld [vmem:[#allocation4 + $0x72] sm:$0xff]  ;;  %v3949_v8 = vpop.permute.xlu2 %3948 }
 0x65d   : > { %v7240_v34 = vld [vmem:[#allocation4 + $0x71] sm:$0xff]  ;;  %3605 = vst.msk [vmem:[#allocation4 + $0x81] sm:$0xff] %vm270_vm13, %v3597_v47  ;;  %3720 = vrot.lane.b32.xlu2 %v3697_v2, %s5270_s17  ;;  %3862 = vrot.lane.b32.xlu1 %v3697_v2, %s5274_s15 }
 0x65e   : > { %v3744_v1 = vld [vmem:[#allocation4 + $0x70] sm:$0xff]  ;;  %3672 = vrot.lane.b32.xlu0 %v7240_v34, %s5266_s13  ;;  %3991 = vst.msk [vmem:[#allocation5 + $0x58] sm:$0xff] %vm270_vm13, %v3697_v2  ;;  %4121 = vmatpush.bf16.msrb.mxu3 %v5115_v43 }
 0x65f   : > { %3641 = vst.msk [vmem:[#allocation5 + $0x70] sm:$0xff] %vm270_vm13, %v3744_v1 }
 0x664   : > { %v3745_v5 = vld [vmem:[#allocation4 + $0x80] sm:$0xff]  ;;  %v3761_v56 = vpop.permute.xlu2 %3760 }
 0x665   : > { %v3841_v27 = vld [vmem:[#allocation4 + $0x82] sm:$0xff]  ;;  %3814 = vrot.lane.b32.xlu2 %v7240_v34, %s5273_s14  ;;  %3768 = vrot.lane.b32.xlu1 %v3745_v5, %s5272_s12 }
 0x666   : > { %3766 = vrot.lane.b32.xlu0 %v3744_v1, %s5272_s12  ;;  %3992 = vst.msk [vmem:[#allocation5 + $0x68] sm:$0xff] %vm270_vm13, %v3841_v27  ;;  %v3793_v29 = vld [vmem:[#allocation4 + $0x81] sm:$0xff] }
 0x66d   : > { %3864 = vrot.lane.b32.xlu2 %v3841_v27, %s5274_s15  ;;  %3808 = vrot.lane.b32.xlu1 %v3789_v33, %s5273_s14  ;;  %v4009_v27 = vld [vmem:[#allocation5 + $0x78] sm:$0xff] }
 0x66e   : > { %3816 = vrot.lane.b32.xlu0 %v3793_v29, %s5273_s14 }
 0x674   : > { %v3665_v61 = vpop.permute.xlu1 %3664 }
 0x675   : > { %v3901_v9 = vpop.permute.xlu0 %3900  ;;  %3685 = vst.msk [vmem:[#allocation5 + $0x30] sm:$0xff] %vm2560_vm0, %v3665_v61  ;;  %3958 = vrot.lane.b32.xlu2 %v3793_v29, %s5276_s30  ;;  %3902 = vrot.lane.b32.xlu1 %v7160_v51, %s5275_s16  ;;  %v4538_v29 = vld [vmem:[#allocation4 + $0x92] sm:$0xff] }
 0x676   : > { %3923 = vst.msk [vmem:[#allocation5 + $0x10] sm:$0xff] %vm2806_vm5, %v3901_v9  ;;  %3910 = vrot.lane.b32.xlu0 %v3745_v5, %s5275_s16  ;;  %v4005_v61 = vld [vmem:[#allocation5 + $0x58] sm:$0xff] }
 0x677   : > { %3971 = vst.msk [vmem:[#allocation5 + $0x10] sm:$0xff] %vm2855_vm6, %v3949_v8 }
 0x678   : > { %4546 = vst.msk [vmem:[#allocation5 + $0x78] sm:$0xff] %vm270_vm13, %v4538_v29 }
 0x67c   : > { %v3759_v25 = vpop.permute.xlu1 %3758 }
 0x67d   : > { %v3713_v45 = vpop.permute.xlu0 %3712  ;;  %3780 = vst.msk [vmem:[#allocation5 + $0x20] sm:$0xff] %vm2658_vm2, %v3759_v25  ;;  %3854 = vrot.lane.b32.xlu2 %v7151_v30, %s5274_s15  ;;  %3952 = vrot.lane.b32.xlu1 %v3933_v37, %s5276_s30 }
 0x67e   : > { %3733 = vst.msk [vmem:[#allocation5 + $0x30] sm:$0xff] %vm2609_vm1, %v3713_v45  ;;  %v3996_v57 = vld [vmem:[#allocation5 + $0x10] sm:$0xff]  ;;  %3856 = vrot.lane.b32.xlu0 %v7169_v13, %s5274_s15  ;;  %v4003_v45 = vld [vmem:[#allocation5 + $0x48] sm:$0xff] }
 0x67f   : > { %3781 = vst.msk [vmem:[#allocation5 + $0x30] sm:$0xff] %vm2658_vm2, %v3761_v56  ;;  %v4010_v12 = vpack.c.bf16 %v3996_v57, %v7137_v19  ;;  %v4015_v56 = vpack.c.bf16 %v4005_v61, %v4003_v45 }
 0x681   : > { %4093 = vmatmul.bf16.vlgmr.msrb.gmra.mxu1 %v4010_v12 }
 0x685   : > { %v3807_v51 = vpop.permute.xlu0 %3806  ;;  %3904 = vrot.lane.b32.xlu2 %v7185_v28, %s5275_s16  ;;  %3714 = vrot.lane.b32.xlu1 %v7169_v13, %s5270_s17 }
 0x686   : > { %3828 = vst.msk [vmem:[#allocation5 + $0x20] sm:$0xff] %vm2707_vm3, %v3807_v51  ;;  %3950 = vrot.lane.b32.xlu0 %v3789_v33, %s5276_s30 }
 0x68d   : > { %3666 = vrot.lane.b32.xlu2 %v3789_v33, %s5266_s13  ;;  %3764 = vrot.lane.b32.xlu1 %v7198_v22, %s5272_s12 }
 0x68e   : > { %3668 = vrot.lane.b32.xlu0 %v3933_v37, %s5266_s13 }
 0x695   : > { %3716 = vrot.lane.b32.xlu2 %v7187_v6, %s5270_s17  ;;  %3858 = vrot.lane.b32.xlu1 %v7187_v6, %s5274_s15 }
 0x696   : > { %3762 = vrot.lane.b32.xlu0 %v7185_v28, %s5272_s12 }
 0x698   : > { %v3671_v19 = vpop.permute.xlu2 %3670 }
 0x699   : > { %3688 = vst.msk [vmem:[#allocation5 + $0x60] sm:$0xff] %vm2560_vm0, %v3671_v19 }
 0x69d   : > { %3810 = vrot.lane.b32.xlu2 %v3933_v37, %s5273_s14  ;;  %3908 = vrot.lane.b32.xlu1 %v3744_v1, %s5275_s16  ;;  %v4007_v37 = vld [vmem:[#allocation5 + $0x68] sm:$0xff] }
 0x69e   : > { %3812 = vrot.lane.b32.xlu0 %v7194_v52, %s5273_s14  ;;  %v4017_v51 = vpack.c.bf16 %v4009_v27, %v4007_v37 }
 0x6a5   : > { %3860 = vrot.lane.b32.xlu2 %v7196_v20, %s5274_s15  ;;  %4211 = vrot.lane.b32.xlu1 %v7063_v41, %s5266_s13 }
 0x6a6   : > { %3906 = vrot.lane.b32.xlu0 %v7198_v22, %s5275_s16 }
 0x6ad   : > { %3954 = vrot.lane.b32.xlu2 %v7194_v52, %s5276_s30 }
 0x6ae   : > { %3956 = vrot.lane.b32.xlu0 %v7240_v34, %s5276_s30  ;;  %v4001_v34 = vld [vmem:[#allocation5 + $0x38] sm:$0xff] }
 0x6af   : > { %v4013_v5 = vpack.c.bf16 %v4001_v34, %v3999_v42 }
 0x6b1   : > { %v3719_v30 = vpop.permute.xlu1 %3718 }
 0x6b2   : > { %3736 = vst.msk [vmem:[#allocation5 + $0x60] sm:$0xff] %vm2609_vm1, %v3719_v30 }
 0x6b6   : > { %4259 = vrot.lane.b32.xlu0 %v7072_v39, %s5270_s17 }
 0x6b7   : > { %v3721_v13 = vpop.permute.xlu2 %3720 }
 0x6bf   : > { %v3815_v38 = vpop.permute.xlu2 %3814 }
 0x6c7   : > { %v3865_v23 = vpop.permute.xlu2 %3864 }
 0x6cf   : > { %v3959_v44 = vpop.permute.xlu2 %3958  ;;  %v3863_v41 = vpop.permute.xlu1 %3862 }
 0x6d0   : > { %v3673_v54 = vpop.permute.xlu0 %3672 }
 0x6d1   : > { %3689 = vst.msk [vmem:[#allocation5 + $0x70] sm:$0xff] %vm2560_vm0, %v3673_v54 }
 0x6d2   : > { %3737 = vst.msk [vmem:[#allocation5 + $0x70] sm:$0xff] %vm2609_vm1, %v3721_v13 }
 0x6d7   : > { %v3855_v53 = vpop.permute.xlu2 %3854  ;;  %v3769_v39 = vpop.permute.xlu1 %3768 }
 0x6d8   : > { %v3767_v49 = vpop.permute.xlu0 %3766  ;;  %3876 = vst.msk [vmem:[#allocation5 + $0x20] sm:$0xff] %vm2756_vm4, %v3855_v53 }
 0x6d9   : > { %3784 = vst.msk [vmem:[#allocation5 + $0x60] sm:$0xff] %vm2658_vm2, %v3767_v49  ;;  %v5124_v49 = vld [vmem:[%s7624_s3 + $0x118] sm:$0xff] }
 0x6da   : > { %3832 = vst.msk [vmem:[#allocation5 + $0x60] sm:$0xff] %vm2707_vm3, %v3815_v38  ;;  %v7360_v38 = vld [vmem:[%s7625_s4 + $0x2] ss:$0 sm:$0xff]  ;;  %4674 = vmatpush.bf16.msra.mxu1 %v5124_v49 }
 0x6db   : > { %3880 = vst.msk [vmem:[#allocation5 + $0x60] sm:$0xff] %vm2756_vm4, %v3863_v41 }
 0x6dc   : > { %3785 = vst.msk [vmem:[#allocation5 + $0x70] sm:$0xff] %vm2658_vm2, %v3769_v39 }
 0x6df   : > { %v3905_v14 = vpop.permute.xlu2 %3904  ;;  %v3809_v28 = vpop.permute.xlu1 %3808 }
 0x6e0   : > { %v3817_v7 = vpop.permute.xlu0 %3816  ;;  %3829 = vst.msk [vmem:[#allocation5 + $0x30] sm:$0xff] %vm2707_vm3, %v3809_v28 }
 0x6e1   : > { %3833 = vst.msk [vmem:[#allocation5 + $0x70] sm:$0xff] %vm2707_vm3, %v3817_v7 }
 0x6e2   : > { %3881 = vst.msk [vmem:[#allocation5 + $0x70] sm:$0xff] %vm2756_vm4, %v3865_v23 }
 0x6e3   : > { %3929 = vst.msk [vmem:[#allocation5 + $0x70] sm:$0xff] %vm2806_vm5, %v7119_v18 }
 0x6e4   : > { %3977 = vst.msk [vmem:[#allocation5 + $0x70] sm:$0xff] %vm2855_vm6, %v7123_v59 }
 0x6e7   : > { %v3667_v6 = vpop.permute.xlu2 %3666  ;;  %v3903_v20 = vpop.permute.xlu1 %3902 }
 0x6e8   : > { %v3911_v52 = vpop.permute.xlu0 %3910  ;;  %3686 = vst.msk [vmem:[#allocation5 + $0x40] sm:$0xff] %vm2560_vm0, %v3667_v6 }
 0x6e9   : > { %3928 = vst.msk [vmem:[#allocation5 + $0x60] sm:$0xff] %vm2806_vm5, %v3911_v52 }
 0x6ea   : > { %3976 = vst.msk [vmem:[#allocation5 + $0x60] sm:$0xff] %vm2855_vm6, %v3959_v44 }
 0x6eb   : > { %3924 = vst.msk [vmem:[#allocation5 + $0x20] sm:$0xff] %vm2806_vm5, %v3903_v20  ;;  %v4008_v46 = vld [vmem:[#allocation5 + $0x70] sm:$0xff] }
 0x6ef   : > { %v3953_v18 = vpop.permute.xlu1 %3952  ;;  %v3717_v4 = vpop.permute.xlu2 %3716 }
 0x6f0   : > { %v3857_v22 = vpop.permute.xlu0 %3856 }
 0x6f1   : > { %3877 = vst.msk [vmem:[#allocation5 + $0x30] sm:$0xff] %vm2756_vm4, %v3857_v22  ;;  %v4006_v59 = vld [vmem:[#allocation5 + $0x60] sm:$0xff] }
 0x6f2   : > { %3925 = vst.msk [vmem:[#allocation5 + $0x30] sm:$0xff] %vm2806_vm5, %v3905_v14  ;;  %v4016_v10 = vpack.c.bf16 %v4008_v46, %v4006_v59 }
 0x6f3   : > { %3973 = vst.msk [vmem:[#allocation5 + $0x30] sm:$0xff] %vm2855_vm6, %v3953_v18 }
 0x6f4   : > { %4108 = vmatmul.bf16.vlgmr.msra.gmra.mxu3 %v4016_v10 }
 0x6f7   : > { %v3715_v48 = vpop.permute.xlu1 %3714  ;;  %v3811_v21 = vpop.permute.xlu2 %3810 }
 0x6f8   : > { %v3951_v50 = vpop.permute.xlu0 %3950  ;;  %3734 = vst.msk [vmem:[#allocation5 + $0x40] sm:$0xff] %vm2609_vm1, %v3715_v48 }
 0x6f9   : > { %3972 = vst.msk [vmem:[#allocation5 + $0x20] sm:$0xff] %vm2855_vm6, %v3951_v50 }
 0x6fa   : > { %v4000_v3 = vld [vmem:[#allocation5 + $0x30] sm:$0xff] }
 0x6fe   : > { %v4094_v30 = vpop.f32.mrf.mxu1 }
 0x6ff   : > { %v3765_v31 = vpop.permute.xlu1 %3764  ;;  %v3861_v47 = vpop.permute.xlu2 %3860  ;;  %v4095_v23 = vadd.f32 %v7360_v38, %v4094_v30 }
 0x700   : > { %v3669_v58 = vpop.permute.xlu0 %3668  ;;  %v3998_v26 = vld [vmem:[#allocation5 + $0x20] sm:$0xff] }
 0x701   : > { %3687 = vst.msk [vmem:[#allocation5 + $0x50] sm:$0xff] %vm2560_vm0, %v3669_v58  ;;  %v4012_v32 = vpack.c.bf16 %v4000_v3, %v3998_v26 }
 0x702   : > { %3735 = vst.msk [vmem:[#allocation5 + $0x50] sm:$0xff] %vm2609_vm1, %v3717_v4 }
 0x703   : > { %3783 = vst.msk [vmem:[#allocation5 + $0x50] sm:$0xff] %vm2658_vm2, %v3765_v31  ;;  %4098 = vmatmul.bf16.gmra.mxu1 %v4012_v32 }
 0x704   : > { %5019 = vmatmul.msk.bf16.vlgmr.msrb.gmra.mxu3 %vm270_vm13, %v4011_v63 }
 0x706   : > { %v4096_v41 = vpop.f32.mrf.mxu1 }
 0x707   : > { %v3859_v60 = vpop.permute.xlu1 %3858  ;;  %v3955_v8 = vpop.permute.xlu2 %3954  ;;  %v4097_v53 = vadd.f32 %v7360_v38, %v4096_v41 }
 0x708   : > { %v3763_v40 = vpop.permute.xlu0 %3762 }
 0x709   : > { %3782 = vst.msk [vmem:[#allocation5 + $0x40] sm:$0xff] %vm2658_vm2, %v3763_v40 }
 0x70a   : > { %3830 = vst.msk [vmem:[#allocation5 + $0x40] sm:$0xff] %vm2707_vm3, %v3811_v21 }
 0x70b   : > { %3878 = vst.msk [vmem:[#allocation5 + $0x40] sm:$0xff] %vm2756_vm4, %v3859_v60 }
 0x70f   : > { %v3909_v1 = vpop.permute.xlu1 %3908 }
 0x710   : > { %v3813_v2 = vpop.permute.xlu0 %3812 }
 0x711   : > { %3831 = vst.msk [vmem:[#allocation5 + $0x50] sm:$0xff] %vm2707_vm3, %v3813_v2 }
 0x712   : > { %3879 = vst.msk [vmem:[#allocation5 + $0x50] sm:$0xff] %vm2756_vm4, %v3861_v47 }
 0x713   : > { %3927 = vst.msk [vmem:[#allocation5 + $0x50] sm:$0xff] %vm2806_vm5, %v3909_v1 }
 0x714   : > { %5020 = vmatmul.msk.bf16.gmra.mxu3 %vm270_vm13, %v4013_v5 }
 0x718   : > { %v3907_v33 = vpop.permute.xlu0 %3906 }
 0x719   : > { %3926 = vst.msk [vmem:[#allocation5 + $0x40] sm:$0xff] %vm2806_vm5, %v3907_v33 }
 0x71a   : > { %3974 = vst.msk [vmem:[#allocation5 + $0x40] sm:$0xff] %vm2855_vm6, %v3955_v8 }
 0x720   : > { %v3957_v9 = vpop.permute.xlu0 %3956 }
 0x721   : > { %3975 = vst.msk [vmem:[#allocation5 + $0x50] sm:$0xff] %vm2855_vm6, %v3957_v9  ;;  %v4002_v25 = vld [vmem:[#allocation5 + $0x40] sm:$0xff] }
 0x724   : > { %5021 = vmatmul.msk.bf16.gmra.mxu3 %vm270_vm13, %v4015_v56 }
 0x728   : > { %v4004_v57 = vld [vmem:[#allocation5 + $0x50] sm:$0xff] }
 0x729   : > { %v4014_v12 = vpack.c.bf16 %v4004_v57, %v4002_v25 }
 0x72b   : > { %4103 = vmatmul.bf16.gmra.mxu1 %v4014_v12 }
 0x734   : > { %5022 = vmatmul.msk.bf16.gmra.mxu3 %vm270_vm13, %v4017_v51 }
 0x777   : > { %v7353_v19 = vpop.f32.mrf.mxu3 }
 0x778   : > { %v4110_v56 = vadd.f32 %v7360_v38, %v7353_v19 }
 0x77f   : > { %v7355_v13 = vpop.f32.mrf.mxu3 }
 0x780   : > { %v4099_v7 = vpop.f32.mrf.mxu1  ;;  %v4112_v51 = vadd.f32 %v7360_v38, %v7355_v13 }
 0x781   : > { %v4100_v22 = vadd.f32 %v7360_v38, %v4099_v7 }
 0x787   : > { %v4123_v44 = vpop.f32.mrf.mxu3 }
 0x788   : > { %v4124_v54 = vadd.f32 %v4123_v44, %v4095_v23  ;;  %v4101_v10 = vpop.f32.mrf.mxu1 }
 0x789   : > { %v4102_v4 = vadd.f32 %v7360_v38, %v4101_v10 }
 0x78a   : > { %v4143_v43 = vmax.f32 %v4124_v54, 0.0 }
 0x78c   : > { %4151 = vst.msk [vmem:[#allocation4 + $0x11] sm:$0xff] %vm270_vm13, %v4143_v43 }
 0x78f   : > { %v4125_v39 = vpop.f32.mrf.mxu3 }
 0x790   : > { %v4126_v14 = vadd.f32 %v4125_v39, %v4097_v53 }
 0x792   : > { %v4144_v28 = vmax.f32 %v4126_v14, 0.0 }
 0x793   : > { %v4387_v6 = vld [vmem:[#allocation4 + $0x12] sm:$0xff] }
 0x794   : > { %v4196_v52 = vld [vmem:[#allocation4 + $0x11] sm:$0xff]  ;;  %4152 = vst.msk [vmem:[#allocation4 + $0x21] sm:$0xff] %vm270_vm13, %v4144_v28  ;;  %4403 = vrot.lane.b32.xlu0 %v4387_v6, %s5274_s15  ;;  %4261 = vrot.lane.b32.xlu1 %v4387_v6, %s5270_s17  ;;  %v4212_v28 = vpop.permute.xlu1 %4211 }
 0x795   : > { %v4291_v20 = vld [vmem:[#allocation4 + $0x10] sm:$0xff]  ;;  %4213 = vrot.lane.b32.xlu2 %v4196_v52, %s5266_s13  ;;  %4235 = vst.msk [vmem:[#allocation5] sm:$0xff] %vm2560_vm0, %v4212_v28 }
 0x796   : > { %4188 = vst.msk [vmem:[#allocation5 + $0x10] sm:$0xff] %vm270_vm13, %v4291_v20 }
 0x797   : > { %v4128_v18 = vpop.f32.mrf.mxu3 }
 0x798   : > { %v4129_v59 = vadd.f32 %v4128_v18, %v4100_v22  ;;  %v4562_v22 = vld [vmem:[#allocation5 + $0x78] sm:$0xff] }
 0x79a   : > { %v4145_v46 = vmax.f32 %v4129_v59, 0.0 }
 0x79b   : > { %v4292_v50 = vld [vmem:[#allocation4 + $0x20] sm:$0xff] }
 0x79c   : > { %v4388_v48 = vld [vmem:[#allocation4 + $0x22] sm:$0xff]  ;;  %4153 = vst.msk [vmem:[#allocation4 + $0x31] sm:$0xff] %vm270_vm13, %v4145_v46  ;;  %4309 = vrot.lane.b32.xlu0 %v4292_v50, %s5272_s12  ;;  %4355 = vrot.lane.b32.xlu1 %v4196_v52, %s5273_s14  ;;  %v4260_v52 = vpop.permute.xlu0 %4259 }
 0x79d   : > { %4307 = vrot.lane.b32.xlu2 %v4291_v20, %s5272_s12  ;;  %4539 = vst.msk [vmem:[#allocation5 + $0x8] sm:$0xff] %vm270_vm13, %v4388_v48  ;;  %v4197_v17 = vld [vmem:[#allocation4 + $0x21] sm:$0xff] }
 0x79e   : > { %4189 = vst.msk [vmem:[#allocation5 + $0x20] sm:$0xff] %vm270_vm13, %v4292_v50  ;;  %v5123_v46 = vld [vmem:[%s7624_s3 + $0x110] sm:$0xff] }
 0x79f   : > { %v4130_v58 = vpop.f32.mrf.mxu3  ;;  %4283 = vst.msk [vmem:[#allocation5] sm:$0xff] %vm2609_vm1, %v4260_v52  ;;  %4638 = vmatpush.bf16.msra.mxu2 %v5123_v46 }
 0x7a0   : > { %v4131_v26 = vadd.f32 %v4130_v58, %v4102_v4  ;;  %v5120_v58 = vld [vmem:[%s7624_s3 + $0xf8] sm:$0xff] }
 0x7a2   : > { %v4146_v3 = vmax.f32 %v4131_v26, 0.0 }
 0x7a3   : > { %v4436_v31 = vld [vmem:[#allocation4 + $0x30] sm:$0xff] }
 0x7a4   : > { %v7381_v32 = vld [vmem:[#allocation4 + $0x32] sm:$0xff]  ;;  %4154 = vst.msk [vmem:[#allocation4 + $0x41] sm:$0xff] %vm270_vm13, %v4146_v3  ;;  %4215 = vrot.lane.b32.xlu0 %v4197_v17, %s5266_s13  ;;  %4405 = vrot.lane.b32.xlu1 %v4388_v48, %s5274_s15  ;;  %v4548_v34 = vld [vmem:[#allocation5 + $0x8] sm:$0xff]  ;;  %v5119_v3 = vld [vmem:[%s7624_s3 + $0xf0] sm:$0xff] }
 0x7a5   : > { %4357 = vrot.lane.b32.xlu2 %v4197_v17, %s5273_s14  ;;  %4540 = vst.msk [vmem:[#allocation5 + $0x18] sm:$0xff] %vm270_vm13, %v7381_v32  ;;  %v4198_v8 = vld [vmem:[#allocation4 + $0x31] sm:$0xff] }
 0x7a6   : > { %4190 = vst.msk [vmem:[#allocation5 + $0x30] sm:$0xff] %vm270_vm13, %v4436_v31 }
 0x7a7   : > { %v4133_v62 = vpop.f32.mrf.mxu3 }
 0x7a8   : > { %v4104_v63 = vpop.f32.mrf.mxu1 }
 0x7a9   : > { %v4105_v21 = vadd.f32 %v7360_v38, %v4104_v63 }
 0x7ab   : > { %v4134_v40 = vadd.f32 %v4133_v62, %v4105_v21  ;;  %v7391_v60 = vld [vmem:[#allocation4 + $0x42] sm:$0xff] }
 0x7ac   : > { %v4294_v47 = vld [vmem:[#allocation4 + $0x40] sm:$0xff]  ;;  %4499 = vrot.lane.b32.xlu1 %v4197_v17, %s5276_s30  ;;  %4453 = vrot.lane.b32.xlu0 %v4436_v31, %s5275_s16  ;;  %v4550_v1 = vld [vmem:[#allocation5 + $0x18] sm:$0xff]  ;;  %4541 = vst.msk [vmem:[#allocation5 + $0x28] sm:$0xff] %vm270_vm13, %v7391_v60 }
 0x7ad   : > { %v4147_v2 = vmax.f32 %v4134_v40, 0.0  ;;  %4451 = vrot.lane.b32.xlu2 %v4292_v50, %s5275_s16  ;;  %v4564_v42 = vpack.c.bf16 %v4550_v1, %v4548_v34  ;;  %4191 = vst.msk [vmem:[#allocation5 + $0x40] sm:$0xff] %vm270_vm13, %v4294_v47  ;;  %v4342_v53 = vld [vmem:[#allocation4 + $0x41] sm:$0xff]  ;;  %v5122_v50 = vld [vmem:[%s7624_s3 + $0x108] sm:$0xff]  ;;  %v4442_v1 = vld [vmem:[#allocation4 + $0x90] sm:$0xff] }
 0x7ae   : > { %4639 = vmatpush.bf16.msra.mxu2 %v5122_v50  ;;  %v5116_v40 = vld [vmem:[%s7624_s3 + $0xd8] sm:$0xff] }
 0x7af   : > { %4155 = vst.msk [vmem:[#allocation4 + $0x51] sm:$0xff] %vm270_vm13, %v4147_v2  ;;  %5077 = vmatmul.msk.bf16.vlgmr.msra.gmra.mxu1 %vm270_vm13, %v4564_v42  ;;  %v4135_v5 = vpop.f32.mrf.mxu3 }
 0x7b0   : > { %v4106_v27 = vpop.f32.mrf.mxu1 }
 0x7b1   : > { %v4107_v29 = vadd.f32 %v7360_v38, %v4106_v27 }
 0x7b3   : > { %v4136_v33 = vadd.f32 %v4135_v5, %v4107_v29  ;;  %v4552_v19 = vld [vmem:[#allocation5 + $0x28] sm:$0xff] }
 0x7b4   : > { %4265 = vrot.lane.b32.xlu0 %v7381_v32, %s5270_s17  ;;  %4217 = vrot.lane.b32.xlu1 %v4198_v8, %s5266_s13 }
 0x7b5   : > { %v4148_v9 = vmax.f32 %v4136_v33, 0.0  ;;  %4263 = vrot.lane.b32.xlu2 %v4388_v48, %s5270_s17  ;;  %v5121_v48 = vld [vmem:[%s7624_s3 + $0x100] sm:$0xff] }
 0x7b6   : > { %v4534_v61 = vld [vmem:[#allocation4 + $0x52] sm:$0xff]  ;;  %4640 = vmatpush.bf16.msra.mxu2 %v5121_v48 }
 0x7b7   : > { %v4438_v45 = vld [vmem:[#allocation4 + $0x50] sm:$0xff]  ;;  %4156 = vst.msk [vmem:[#allocation4 + $0x61] sm:$0xff] %vm270_vm13, %v4148_v9  ;;  %v4138_v25 = vpop.f32.mrf.mxu3 }
 0x7b8   : > { %4542 = vst.msk [vmem:[#allocation5 + $0x38] sm:$0xff] %vm270_vm13, %v4534_v61  ;;  %v4139_v57 = vadd.f32 %v4138_v25, %v4110_v56  ;;  %v4200_v6 = vld [vmem:[#allocation4 + $0x51] sm:$0xff] }
 0x7b9   : > { %4192 = vst.msk [vmem:[#allocation5 + $0x50] sm:$0xff] %vm270_vm13, %v4438_v45 }
 0x7ba   : > { %v4149_v12 = vmax.f32 %v4139_v57, 0.0  ;;  %4641 = vmatpush.bf16.msra.mxu2 %v5120_v58 }
 0x7bc   : > { %4157 = vst.msk [vmem:[#allocation4 + $0x71] sm:$0xff] %vm270_vm13, %v4149_v12  ;;  %4359 = vrot.lane.b32.xlu0 %v4198_v8, %s5273_s14  ;;  %4311 = vrot.lane.b32.xlu1 %v4436_v31, %s5272_s12  ;;  %v5118_v31 = vld [vmem:[%s7624_s3 + $0xe8] sm:$0xff] }
 0x7bd   : > { %4501 = vrot.lane.b32.xlu2 %v4198_v8, %s5276_s30 }
 0x7be   : > { %v4535_v37 = vld [vmem:[#allocation4 + $0x62] sm:$0xff]  ;;  %4642 = vmatpush.bf16.msra.mxu2 %v5119_v3 }
 0x7bf   : > { %v4554_v30 = vld [vmem:[#allocation5 + $0x38] sm:$0xff]  ;;  %4543 = vst.msk [vmem:[#allocation5 + $0x48] sm:$0xff] %vm270_vm13, %v4535_v37  ;;  %v4439_v23 = vld [vmem:[#allocation4 + $0x60] sm:$0xff]  ;;  %v4140_v44 = vpop.f32.mrf.mxu3 }
 0x7c0   : > { %v4566_v54 = vpack.c.bf16 %v4554_v30, %v4552_v19  ;;  %4193 = vst.msk [vmem:[#allocation5 + $0x60] sm:$0xff] %vm270_vm13, %v4439_v23  ;;  %v4141_v41 = vadd.f32 %v4140_v44, %v4112_v51  ;;  %v4344_v59 = vld [vmem:[#allocation4 + $0x61] sm:$0xff] }
 0x7c2   : > { %5078 = vmatmul.msk.bf16.gmra.mxu1 %vm270_vm13, %v4566_v54  ;;  %v4150_v43 = vmax.f32 %v4141_v41, 0.0  ;;  %4643 = vmatpush.bf16.msra.mxu2 %v5118_v31 }
 0x7c3   : > { %v4536_v49 = vld [vmem:[#allocation4 + $0x72] sm:$0xff] }
 0x7c4   : > { %v7420_v39 = vld [vmem:[#allocation4 + $0x70] sm:$0xff]  ;;  %4158 = vst.msk [vmem:[#allocation4 + $0x81] sm:$0xff] %vm270_vm13, %v4150_v43  ;;  %4409 = vrot.lane.b32.xlu0 %v7391_v60, %s5274_s15  ;;  %4361 = vrot.lane.b32.xlu1 %v4342_v53, %s5273_s14 }
 0x7c5   : > { %4407 = vrot.lane.b32.xlu2 %v7381_v32, %s5274_s15  ;;  %4544 = vst.msk [vmem:[#allocation5 + $0x58] sm:$0xff] %vm270_vm13, %v4536_v49  ;;  %v4488_v26 = vld [vmem:[#allocation4 + $0x71] sm:$0xff] }
 0x7c6   : > { %4194 = vst.msk [vmem:[#allocation5 + $0x70] sm:$0xff] %vm270_vm13, %v7420_v39  ;;  %v4556_v14 = vld [vmem:[#allocation5 + $0x48] sm:$0xff]  ;;  %v5117_v32 = vld [vmem:[%s7624_s3 + $0xe0] sm:$0xff] }
 0x7c7   : > { %4644 = vmatpush.bf16.msra.mxu2 %v5117_v32 }
 0x7cb   : > { %v7431_v13 = vld [vmem:[#allocation4 + $0x82] sm:$0xff]  ;;  %4645 = vmatpush.bf16.msra.mxu2 %v5116_v40 }
 0x7cc   : > { %4503 = vrot.lane.b32.xlu0 %v4342_v53, %s5276_s30  ;;  %4455 = vrot.lane.b32.xlu1 %v4294_v47, %s5275_s16  ;;  %v4558_v38 = vld [vmem:[#allocation5 + $0x58] sm:$0xff]  ;;  %4545 = vst.msk [vmem:[#allocation5 + $0x68] sm:$0xff] %vm270_vm13, %v7431_v13  ;;  %v4346_v42 = vld [vmem:[#allocation4 + $0x81] sm:$0xff] }
 0x7cd   : > { %4313 = vrot.lane.b32.xlu2 %v4294_v47, %s5272_s12  ;;  %v4568_v7 = vpack.c.bf16 %v4558_v38, %v4556_v14 }
 0x7d2   : > { %5079 = vmatmul.msk.bf16.gmra.mxu1 %vm270_vm13, %v4568_v7 }
 0x7d3   : > { %v4560_v20 = vld [vmem:[#allocation5 + $0x68] sm:$0xff] }
 0x7d4   : > { %4221 = vrot.lane.b32.xlu0 %v4200_v6, %s5266_s13  ;;  %4267 = vrot.lane.b32.xlu1 %v7391_v60, %s5270_s17  ;;  %v4570_v18 = vpack.c.bf16 %v4562_v22, %v4560_v20  ;;  %v4298_v60 = vld [vmem:[#allocation4 + $0x80] sm:$0xff] }
 0x7d5   : > { %4219 = vrot.lane.b32.xlu2 %v4342_v53, %s5266_s13 }
 0x7dc   : > { %4315 = vrot.lane.b32.xlu0 %v4438_v45, %s5272_s12  ;;  %4505 = vrot.lane.b32.xlu1 %v4200_v6, %s5276_s30 }
 0x7dd   : > { %4457 = vrot.lane.b32.xlu2 %v4438_v45, %s5275_s16 }
 0x7e2   : > { %5080 = vmatmul.msk.bf16.gmra.mxu1 %vm270_vm13, %v4570_v18 }
 0x7e4   : > { %4365 = vrot.lane.b32.xlu0 %v4344_v59, %s5273_s14  ;;  %4411 = vrot.lane.b32.xlu1 %v4534_v61, %s5274_s15 }
 0x7e5   : > { %4269 = vrot.lane.b32.xlu2 %v4534_v61, %s5270_s17  ;;  %v4490_v61 = vld [vmem:[#allocation4 + $0x91] sm:$0xff] }
 0x7ec   : > { %4459 = vrot.lane.b32.xlu0 %v4439_v23, %s5275_s16  ;;  %4317 = vrot.lane.b32.xlu1 %v4439_v23, %s5272_s12 }
 0x7ed   : > { %4363 = vrot.lane.b32.xlu2 %v4200_v6, %s5273_s14 }
 0x7ef   : > { %v4214_v10 = vpop.permute.xlu2 %4213 }
 0x7f0   : > { %4236 = vst.msk [vmem:[#allocation5 + $0x10] sm:$0xff] %vm2560_vm0, %v4214_v10 }
 0x7f4   : > { %4271 = vrot.lane.b32.xlu0 %v4535_v37, %s5270_s17  ;;  %4223 = vrot.lane.b32.xlu1 %v4344_v59, %s5266_s13 }
 0x7f5   : > { %4413 = vrot.lane.b32.xlu2 %v4535_v37, %s5274_s15 }
 0x7f7   : > { %v4308_v4 = vpop.permute.xlu2 %4307 }
 0x7f8   : > { %4331 = vst.msk [vmem:[#allocation5] sm:$0xff] %vm2658_vm2, %v4308_v4 }
 0x7fc   : > { %4509 = vrot.lane.b32.xlu0 %v4488_v26, %s5276_s30  ;;  %4461 = vrot.lane.b32.xlu1 %v7420_v39, %s5275_s16 }
 0x7fd   : > { %4507 = vrot.lane.b32.xlu2 %v4344_v59, %s5276_s30 }
 0x7ff   : > { %v4358_v17 = vpop.permute.xlu2 %4357 }
 0x804   : > { %4415 = vrot.lane.b32.xlu0 %v4536_v49, %s5274_s15  ;;  %4273 = vrot.lane.b32.xlu1 %v4536_v49, %s5270_s17 }
 0x805   : > { %4225 = vrot.lane.b32.xlu2 %v4488_v26, %s5266_s13  ;;  %s5218_s13 = scalar_lea.hbm %s7626_s5, 128 }
 0x806   : > { %v4404_v62 = vpop.permute.xlu0 %4403  ;;  %v4262_v63 = vpop.permute.xlu1 %4261 }
 0x807   : > { %v4452_v21 = vpop.permute.xlu2 %4451  ;;  %4284 = vst.msk [vmem:[#allocation5 + $0x10] sm:$0xff] %vm2609_vm1, %v4262_v63 }
 0x80c   : > { %4321 = vrot.lane.b32.xlu0 %v4298_v60, %s5272_s12  ;;  %4367 = vrot.lane.b32.xlu1 %v4488_v26, %s5273_s14 }
 0x80d   : > { %4319 = vrot.lane.b32.xlu2 %v7420_v39, %s5272_s12  ;;  %s215_s12 = sand.u32 1, %s5252_s19  }
 0x80e   : > { %v4310_v47 = vpop.permute.xlu0 %4309  ;;  %v4356_v2 = vpop.permute.xlu1 %4355 }
 0x80f   : > { %4332 = vst.msk [vmem:[#allocation5 + $0x10] sm:$0xff] %vm2658_vm2, %v4310_v47  ;;  %v4264_v34 = vpop.permute.xlu2 %4263 }
 0x810   : > { %4380 = vst.msk [vmem:[#allocation5 + $0x10] sm:$0xff] %vm2707_vm3, %v4358_v17 }
 0x811   : > { %4379 = vst.msk [vmem:[#allocation5] sm:$0xff] %vm2707_vm3, %v4356_v2 }
 0x812   : > { %4427 = vst.msk [vmem:[#allocation5] sm:$0xff] %vm2756_vm4, %v4404_v62 }
 0x813   : > { %4475 = vst.msk [vmem:[#allocation5] sm:$0xff] %vm2806_vm5, %v4452_v21 }
 0x814   : > { %4417 = vrot.lane.b32.xlu1 %v7431_v13, %s5274_s15  ;;  %4465 = vrot.lane.b32.xlu0 %v4442_v1, %s5275_s16 }
 0x815   : > { %4369 = vrot.lane.b32.xlu2 %v4346_v42, %s5273_s14  ;;  %s4840_s14 = sshll.u32 %s215_s12, 6 }
 0x816   : > { %v4216_v5 = vpop.permute.xlu0 %4215  ;;  %v4406_v27 = vpop.permute.xlu1 %4405  ;;  %s7561_s15 = scalar_lea.vmem [#allocation7], %s4840_s14 }
 0x817   : > { %4237 = vst.msk [vmem:[#allocation5 + $0x20] sm:$0xff] %vm2560_vm0, %v4216_v5  ;;  %v4502_v29 = vpop.permute.xlu2 %4501  ;;  %s4725_s10 = sshll.u32 %s7561_s15, 4  ;;  %s4726_s10 = int_to_ptr.vmem [resolvable:$true] %s4725_s10 }
 0x818   : > { %4285 = vst.msk [vmem:[#allocation5 + $0x20] sm:$0xff] %vm2609_vm1, %v4264_v34 }
 0x819   : > { %4428 = vst.msk [vmem:[#allocation5 + $0x10] sm:$0xff] %vm2756_vm4, %v4406_v27 }
 0x81c   : > { %4511 = vrot.lane.b32.xlu1 %v4346_v42, %s5276_s30 }
 0x81d   : > { %4463 = vrot.lane.b32.xlu2 %v4298_v60, %s5275_s16  ;;  %s5125_s16 = sshll.u32 %s5329_s22, 6  ;;  %s4713_s22 = scalar_lea.sflag [#allocation8], %s215_s12 }
 0x81e   : > { %v4500_v33 = vpop.permute.xlu1 %4499  ;;  %v4454_v8 = vpop.permute.xlu0 %4453  ;;  %s4724_s25 = scalar_lea.hbm %s7626_s5, %s5125_s16 }
 0x81f   : > { %4523 = vst.msk [vmem:[#allocation5] sm:$0xff] %vm2855_vm6, %v4500_v33  ;;  %v4408_v9 = vpop.permute.xlu2 %4407  ;;  %s4727_s26 = sshll.u32 %s4724_s25, 4  ;;  %s4728_s26 = int_to_ptr.hbm [resolvable:$true] %s4727_s26 }
 0x820   : > { %4476 = vst.msk [vmem:[#allocation5 + $0x10] sm:$0xff] %vm2806_vm5, %v4454_v8  ;;  %s5212_s6 = sshra.s32 %s4728_s26, 4  ;;  %s5213_s6 = int_to_ptr.hbm [resolvable:$true] %s5212_s6 }
 0x821   : > { %4524 = vst.msk [vmem:[#allocation5 + $0x10] sm:$0xff] %vm2855_vm6, %v4502_v29  ;;  %v5196_v29 = vld [vmem:[%s7625_s4 + $0x3] ss:$0 sm:$0xff]  ;;  %s5214_s7 = scalar_lea.hbm %s5213_s6, 64  ;;  %p5219_p0 = scmp.lt.s32.totalorder %s5213_s6, %s7626_s5 }
 0x822   : > { %p5215_p11 = scmp.ne.s32.totalorder %s5213_s6, %s5214_s7  ;;  %p5220_p1 = scmp.lt.s32.totalorder %s5218_s13, %s5214_s7 }
 0x824   : > { %p5216_p12 = pnand %p5215_p11, %p5346_p5  ;;  %p5221_p2 = por %p5220_p1, %p5219_p0 }
 0x825   : > { %4513 = vrot.lane.b32.xlu2 %v4490_v61, %s5276_s30 }
 0x826   : > { %v4266_v45 = vpop.permute.xlu0 %4265  ;;  %v4218_v56 = vpop.permute.xlu1 %4217  ;;  %v4547_v25 = vld [vmem:[#allocation5] sm:$0xff]  ;;  %p5217_p13 = pneg %p5216_p12 }
 0x827   : > { %v4314_v57 = vpop.permute.xlu2 %4313  ;;  %4238 = vst.msk [vmem:[#allocation5 + $0x30] sm:$0xff] %vm2560_vm0, %v4218_v56 }
 0x828   : > { %4286 = vst.msk [vmem:[#allocation5 + $0x30] sm:$0xff] %vm2609_vm1, %v4266_v45  ;;  %v4549_v12 = vld [vmem:[#allocation5 + $0x10] sm:$0xff]  ;;  %p5222_p3 = pnand %p5221_p2, %p5217_p13 }
 0x829   : > { %4334 = vst.msk [vmem:[#allocation5 + $0x30] sm:$0xff] %vm2658_vm2, %v4314_v57  ;;  %v4563_v37 = vpack.c.bf16 %v4549_v12, %v4547_v25 }
 0x82b   : > { %4646 = vmatmul.bf16.vlgmr.msra.gmra.mxu2 %v4563_v37 }
 0x82c   : > { %v4676_v33 = vpop.f32.mrf.mxu1 }
 0x82e   : > { %v4360_v51 = vpop.permute.xlu0 %4359  ;;  %v4312_v19 = vpop.permute.xlu1 %4311 }
 0x82f   : > { %v4220_v30 = vpop.permute.xlu2 %4219  ;;  %4333 = vst.msk [vmem:[#allocation5 + $0x20] sm:$0xff] %vm2658_vm2, %v4312_v19 }
 0x830   : > { %4239 = vst.msk [vmem:[#allocation5 + $0x40] sm:$0xff] %vm2560_vm0, %v4220_v30 }
 0x831   : > { %4381 = vst.msk [vmem:[#allocation5 + $0x20] sm:$0xff] %vm2707_vm3, %v4360_v51 }
 0x832   : > { %4429 = vst.msk [vmem:[#allocation5 + $0x20] sm:$0xff] %vm2756_vm4, %v4408_v9 }
 0x834   : > { %v4678_v57 = vpop.f32.mrf.mxu1 }
 0x836   : > { %v4410_v23 = vpop.permute.xlu0 %4409  ;;  %v4362_v44 = vpop.permute.xlu1 %4361 }
 0x837   : > { %v4458_v54 = vpop.permute.xlu2 %4457  ;;  %4382 = vst.msk [vmem:[#allocation5 + $0x30] sm:$0xff] %vm2707_vm3, %v4362_v44 }
 0x838   : > { %4430 = vst.msk [vmem:[#allocation5 + $0x30] sm:$0xff] %vm2756_vm4, %v4410_v23 }
 0x839   : > { %4478 = vst.msk [vmem:[#allocation5 + $0x30] sm:$0xff] %vm2806_vm5, %v4458_v54 }
 0x83e   : > { %v4504_v41 = vpop.permute.xlu0 %4503  ;;  %v4456_v53 = vpop.permute.xlu1 %4455 }
 0x83f   : > { %v4270_v43 = vpop.permute.xlu2 %4269  ;;  %4477 = vst.msk [vmem:[#allocation5 + $0x20] sm:$0xff] %vm2806_vm5, %v4456_v53  ;;  %v4681_v51 = vpop.f32.mrf.mxu1 }
 0x840   : > { %4525 = vst.msk [vmem:[#allocation5 + $0x20] sm:$0xff] %vm2855_vm6, %v4504_v41 }
 0x846   : > { %v4222_v49 = vpop.permute.xlu0 %4221  ;;  %v4268_v13 = vpop.permute.xlu1 %4267 }
 0x847   : > { %v4364_v39 = vpop.permute.xlu2 %4363  ;;  %4240 = vst.msk [vmem:[#allocation5 + $0x50] sm:$0xff] %vm2560_vm0, %v4222_v49  ;;  %v4551_v20 = vld [vmem:[#allocation5 + $0x20] sm:$0xff]  ;;  %v4683_v41 = vpop.f32.mrf.mxu1 }
 0x848   : > { %4288 = vst.msk [vmem:[#allocation5 + $0x50] sm:$0xff] %vm2609_vm1, %v4270_v43 }
 0x849   : > { %4287 = vst.msk [vmem:[#allocation5 + $0x40] sm:$0xff] %vm2609_vm1, %v4268_v13 }
 0x84e   : > { %v4316_v38 = vpop.permute.xlu0 %4315  ;;  %v4506_v7 = vpop.permute.xlu1 %4505 }
 0x84f   : > { %v4414_v14 = vpop.permute.xlu2 %4413  ;;  %4335 = vst.msk [vmem:[#allocation5 + $0x40] sm:$0xff] %vm2658_vm2, %v4316_v38 }
 0x850   : > { %4383 = vst.msk [vmem:[#allocation5 + $0x40] sm:$0xff] %vm2707_vm3, %v4364_v39 }
 0x851   : > { %4526 = vst.msk [vmem:[#allocation5 + $0x30] sm:$0xff] %vm2855_vm6, %v4506_v7 }
 0x856   : > { %v4366_v28 = vpop.permute.xlu0 %4365  ;;  %v4412_v52 = vpop.permute.xlu1 %4411 }
 0x857   : > { %v4508_v6 = vpop.permute.xlu2 %4507  ;;  %4431 = vst.msk [vmem:[#allocation5 + $0x40] sm:$0xff] %vm2756_vm4, %v4412_v52 }
 0x858   : > { %v4553_v22 = vld [vmem:[#allocation5 + $0x30] sm:$0xff] }
 0x859   : > { %v4565_v18 = vpack.c.bf16 %v4553_v22, %v4551_v20 }
 0x85b   : > { %4651 = vmatmul.bf16.gmra.mxu2 %v4565_v18 }
 0x85e   : > { %v4460_v59 = vpop.permute.xlu0 %4459  ;;  %v4318_v10 = vpop.permute.xlu1 %4317 }
 0x85f   : > { %v4226_v46 = vpop.permute.xlu2 %4225  ;;  %4479 = vst.msk [vmem:[#allocation5 + $0x40] sm:$0xff] %vm2806_vm5, %v4460_v59 }
 0x860   : > { %4242 = vst.msk [vmem:[#allocation5 + $0x70] sm:$0xff] %vm2560_vm0, %v4226_v46 }
 0x861   : > { %4527 = vst.msk [vmem:[#allocation5 + $0x40] sm:$0xff] %vm2855_vm6, %v4508_v6 }
 0x862   : > { %4336 = vst.msk [vmem:[#allocation5 + $0x50] sm:$0xff] %vm2658_vm2, %v4318_v10 }
 0x863   : > { %4384 = vst.msk [vmem:[#allocation5 + $0x50] sm:$0xff] %vm2707_vm3, %v4366_v28 }
 0x864   : > { %4432 = vst.msk [vmem:[#allocation5 + $0x50] sm:$0xff] %vm2756_vm4, %v4414_v14 }
 0x866   : > { %v4272_v50 = vpop.permute.xlu0 %4271  ;;  %v4224_v48 = vpop.permute.xlu1 %4223 }
 0x867   : > { %4241 = vst.msk [vmem:[#allocation5 + $0x60] sm:$0xff] %vm2560_vm0, %v4224_v48  ;;  %v4320_v4 = vpop.permute.xlu2 %4319 }
 0x868   : > { %4289 = vst.msk [vmem:[#allocation5 + $0x60] sm:$0xff] %vm2609_vm1, %v4272_v50  ;;  %v4555_v32 = vld [vmem:[#allocation5 + $0x40] sm:$0xff] }
 0x869   : > { %4337 = vst.msk [vmem:[#allocation5 + $0x60] sm:$0xff] %vm2658_vm2, %v4320_v4 }
 0x86e   : > { %v4510_v58 = vpop.permute.xlu0 %4509  ;;  %v4462_v26 = vpop.permute.xlu1 %4461 }
 0x86f   : > { %4480 = vst.msk [vmem:[#allocation5 + $0x50] sm:$0xff] %vm2806_vm5, %v4462_v26  ;;  %v4370_v3 = vpop.permute.xlu2 %4369 }
 0x870   : > { %4528 = vst.msk [vmem:[#allocation5 + $0x50] sm:$0xff] %vm2855_vm6, %v4510_v58 }
 0x876   : > { %v4416_v17 = vpop.permute.xlu0 %4415  ;;  %v4274_v31 = vpop.permute.xlu1 %4273 }
 0x877   : > { %4290 = vst.msk [vmem:[#allocation5 + $0x70] sm:$0xff] %vm2609_vm1, %v4274_v31  ;;  %v4557_v62 = vld [vmem:[#allocation5 + $0x50] sm:$0xff]  ;;  %v4464_v40 = vpop.permute.xlu2 %4463 }
 0x878   : > { %v4567_v63 = vpack.c.bf16 %v4557_v62, %v4555_v32 }
 0x87a   : > { %4656 = vmatmul.bf16.gmra.mxu2 %v4567_v63 }
 0x87e   : > { %v4322_v21 = vpop.permute.xlu0 %4321  ;;  %v4368_v60 = vpop.permute.xlu1 %4367 }
 0x87f   : > { %4338 = vst.msk [vmem:[#allocation5 + $0x70] sm:$0xff] %vm2658_vm2, %v4322_v21  ;;  %v4514_v34 = vpop.permute.xlu2 %4513 }
 0x880   : > { %4386 = vst.msk [vmem:[#allocation5 + $0x70] sm:$0xff] %vm2707_vm3, %v4370_v3 }
 0x881   : > { %4385 = vst.msk [vmem:[#allocation5 + $0x60] sm:$0xff] %vm2707_vm3, %v4368_v60 }
 0x882   : > { %4433 = vst.msk [vmem:[#allocation5 + $0x60] sm:$0xff] %vm2756_vm4, %v4416_v17 }
 0x883   : > { %4481 = vst.msk [vmem:[#allocation5 + $0x60] sm:$0xff] %vm2806_vm5, %v4464_v40 }
 0x886   : > { %v4466_v47 = vpop.permute.xlu0 %4465  ;;  %v4418_v2 = vpop.permute.xlu1 %4417 }
 0x887   : > { %4434 = vst.msk [vmem:[#allocation5 + $0x70] sm:$0xff] %vm2756_vm4, %v4418_v2 }
 0x888   : > { %4482 = vst.msk [vmem:[#allocation5 + $0x70] sm:$0xff] %vm2806_vm5, %v4466_v47 }
 0x889   : > { %4530 = vst.msk [vmem:[#allocation5 + $0x70] sm:$0xff] %vm2855_vm6, %v4514_v34 }
 0x88e   : > { %v4512_v1 = vpop.permute.xlu1 %4511 }
 0x88f   : > { %4529 = vst.msk [vmem:[#allocation5 + $0x60] sm:$0xff] %vm2855_vm6, %v4512_v1 }
 0x890   : > { %v4561_v42 = vld [vmem:[#allocation5 + $0x70] sm:$0xff] }
 0x896   : > { %v4559_v5 = vld [vmem:[#allocation5 + $0x60] sm:$0xff] }
 0x897   : > { %v4569_v27 = vpack.c.bf16 %v4561_v42, %v4559_v5 }
 0x899   : > { %4661 = vmatmul.bf16.gmra.mxu2 %v4569_v27 }
 0x8ae   : > { %v4647_v8 = vpop.f32.mrf.mxu2 }
 0x8af   : > { %v4648_v9 = vadd.f32 %v5196_v29, %v4647_v8 }
 0x8b1   : > { %v4677_v61 = vadd.f32 %v4676_v33, %v4648_v9 }
 0x8b3   : > { %v4696_v45 = vadd.f32 %v4677_v61, %v7050_v55 }
 0x8b5   : > { %4704 = vst.msk [vmem:[%s7561_s15] sm:$0xff] %vm270_vm13, %v4696_v45 }
 0x8b6   : > { %v4649_v56 = vpop.f32.mrf.mxu2 }
 0x8b7   : > { %v4650_v25 = vadd.f32 %v5196_v29, %v4649_v56 }
 0x8b9   : > { %v4679_v12 = vadd.f32 %v4678_v57, %v4650_v25 }
 0x8bb   : > { %v4697_v37 = vadd.f32 %v4679_v12, %v7060_v24  ;;  %v4686_v24 = vpop.f32.mrf.mxu1 }
 0x8bd   : > { %4705 = vst.msk [vmem:[%s7561_s15 + $0x8] sm:$0xff] %vm270_vm13, %v4697_v37 }
 0x8c3   : > { %v4688_v7 = vpop.f32.mrf.mxu1 }
 0x8de   : > { %v4652_v19 = vpop.f32.mrf.mxu2 }
 0x8df   : > { %v4653_v55 = vadd.f32 %v5196_v29, %v4652_v19 }
 0x8e1   : > { %v4682_v30 = vadd.f32 %v4681_v51, %v4653_v55 }
 0x8e3   : > { %v4698_v23 = vadd.f32 %v4682_v30, %v7142_v0 }
 0x8e5   : > { %4706 = vst.msk [vmem:[%s7561_s15 + $0x10] sm:$0xff] %vm270_vm13, %v4698_v23 }
 0x8e6   : > { %v4654_v44 = vpop.f32.mrf.mxu2 }
 0x8e7   : > { %v4655_v54 = vadd.f32 %v5196_v29, %v4654_v44 }
 0x8e9   : > { %v4684_v43 = vadd.f32 %v4683_v41, %v4655_v54 }
 0x8eb   : > { %v4699_v53 = vadd.f32 %v4684_v43, %v7148_v15  ;;  %v4691_v15 = vpop.f32.mrf.mxu1 }
 0x8ed   : > { %4707 = vst.msk [vmem:[%s7561_s15 + $0x18] sm:$0xff] %vm270_vm13, %v4699_v53 }
 0x8f3   : > { %v4693_v59 = vpop.f32.mrf.mxu1 }
 0x8fd   : > { %v4657_v49 = vpop.f32.mrf.mxu2 }
 0x8fe   : > { %v4658_v39 = vadd.f32 %v5196_v29, %v4657_v49 }
 0x900   : > { %v4687_v13 = vadd.f32 %v4686_v24, %v4658_v39 }
 0x902   : > { %v4700_v38 = vadd.f32 %v4687_v13, %v7176_v11 }
 0x904   : > { %4708 = vst.msk [vmem:[%s7561_s15 + $0x20] sm:$0xff] %vm270_vm13, %v4700_v38 }
 0x905   : > { %v4659_v0 = vpop.f32.mrf.mxu2 }
 0x906   : > { %v4660_v14 = vadd.f32 %v5196_v29, %v4659_v0 }
 0x908   : > { %v4689_v28 = vadd.f32 %v4688_v7, %v4660_v14 }
 0x90a   : > { %v4701_v6 = vadd.f32 %v4689_v28, %v7182_v16 }
 0x90c   : > { %4709 = vst.msk [vmem:[%s7561_s15 + $0x28] sm:$0xff] %vm270_vm13, %v4701_v6 }
 0x91c   : > { %v4662_v52 = vpop.f32.mrf.mxu2 }
 0x91d   : > { %v4663_v20 = vadd.f32 %v5196_v29, %v4662_v52 }
 0x91f   : > { %v4692_v22 = vadd.f32 %v4691_v15, %v4663_v20 }
 0x921   : > { %v4702_v11 = vadd.f32 %v4692_v22, %v7225_v36 }
 0x923   : > { %4710 = vst.msk [vmem:[%s7561_s15 + $0x30] sm:$0xff] %vm270_vm13, %v4702_v11 }
 0x924   : > { %v4664_v18 = vpop.f32.mrf.mxu2 }
 0x925   : > { %v4665_v16 = vadd.f32 %v5196_v29, %v4664_v18 }
 0x927   : > { %v4694_v46 = vadd.f32 %v4693_v59, %v4665_v16 }
 0x929   : > { %v4703_v10 = vadd.f32 %v4694_v46, %v7237_v35 }
 0x92b   : > { %4711 = vst.msk [vmem:[%s7561_s15 + $0x38] sm:$0xff] %vm270_vm13, %v4703_v10 }
 0x92c   : > { %5225 = shalt.err (!%p5222_p3)
}
 0x92d   : > { %s5277_s12 = smov 128  }
 0x92e   : > { %5137 = dma.vmem_to_hbm [thread:$0]  (%p5346_p5), %s4726_s10, 1024, %s4728_s26, %s4713_s22, %s5277_s12, %s5277_s12, %s5264_s11  }
 0x92f PF: > { %p5143_p4 = scmp.ge.s32.totalorder %s5260_s21, 2  ;;  %s4742_s15 = sand.u32 1, %s5248_s18  }
 0x930   : > { %s4743_s16 = scalar_lea.sflag [#allocation8], %s4742_s15 }
 0x931   : > { %p5140_p7 = pnand %p5143_p4, %p5350_p6 }
 0x933   : > { %p5141_p8 = pneg %p5140_p7 }
 0x935   : > { %5243 = dma.done.wait (%p5141_p8), %s4743_s16, 1024  }
 0x936   : > { %5245 = vsyncadd (%p5141_p8), %s4743_s16, 4294966272  ;;  %p15_p9 = scmp.ge.s32.totalorder %s5333_s24, 4   ;;  %s7629_s18 = smov %s5252_s19 }
 0x937   : > { %s7630_s19 = smov %s5256_s20  ;;  %s7631_s20 = smov %s5344_s27 }
 0x938   : > { %s7632_s21 = smov %s5333_s24  ;;  %17 = sbr.rel (!%p15_p9) target bundleno = 3 (0x3), region = 156 }
 0x93d   :  { %4749 = vsyncpa [#allocation8], 1 }
 0x93e   :  { %4751 = vsyncpa [#allocation8 + $0x1], 1 }

</bundles_post_ra>
